<compile_context>
chip_gen: v5e
topology: v5e:2x2
jax: 0.10.0
libtpu: 0.0.40
codegen_flags: <defaults>
</compile_context>

<pallas_src>
import functools

import numpy as np
import jax
import jax.numpy as jnp
from jax.experimental import pallas as pl
from jax.experimental.pallas import tpu as pltpu

LEAKY_SLOPE = 0.01   # nn.LeakyReLU default negative_slope
BN_EPS = 1e-5        # nn.BatchNorm2d default eps

IMG_ENCODER_CHANNELS = (32, 64, 128, 256, 512)


def _leaky(v):
    return jnp.where(v > 0, v, LEAKY_SLOPE * v)


def _round_up(v, m):
    return -(-v // m) * m


_VMEM_LIMIT = None


def _vmem_limit_bytes():
    """Scoped-VMEM limit with generation-aware headroom (v7x has 64 MiB)."""
    global _VMEM_LIMIT
    if _VMEM_LIMIT is None:
        cap = 64 * 1024 * 1024
        try:
            cap = int(getattr(pltpu.get_tpu_info(), "vmem_capacity_bytes", cap))
        except Exception:
            pass
        _VMEM_LIMIT = int(min(max(cap - (16 << 20), 32 << 20), 100 << 20))
    return _VMEM_LIMIT


# ---------------------------------------------------------------------------
# Fused kernel: one grid step == one (batch, cout-split) == whole basic_conv.
# Parity-plane ("space-to-depth") layout, grid width Wg = ceil(W/2) + 2:
#   x_ref   : (4, cin, Lx)  four zero-ring-padded parity planes of x, flattened
#                           on lanes with a (Wg+1)-lane leading zero offset
#   w1_ref  : (9, cin, cin)   stage-1 folded 3x3 (tap-major)
#   b1_ref  : (cin, 1)        stage-1 folded bias (f32)
#   w2_ref  : (9, co, cin)    conv_center_next (BN folded)
#   w3_ref  : (9, co, cin)    conv_res        (BN folded)
#   bo_ref  : (co, 1)         combined stage-2 bias (f32)
#   mask_ref: (4, 1, Ly)      per-plane valid-interior mask (exact-zero halo)
#   out_ref : (co, Lout)      stride-2 outputs, lanes p = ho*Wg + wo
#   act*    : (cin, Ly)       VMEM scratch: stage-1 activation parity planes
# All lane lengths (Lx, Ly, Lout) are multiples of 128 -> lane-dense stores.
# ---------------------------------------------------------------------------
def _basic_conv_kernel(x_ref, w1_ref, b1_ref, w2_ref, w3_ref, bo_ref, mask_ref,
                       out_ref, act0, act1, act2, act3, *, Wg, Ly, Lout, cdt):
    acts = (act0, act1, act2, act3)
    b1 = b1_ref[...]

    # ---- stage 1: leaky( BN(conv1x1) + BN(pw(dw)) + BN(x) ), folded into one
    #      3x3 conv, evaluated per output parity plane (4 x 9 tap matmuls).
    for a in range(2):
        for b in range(2):
            acc = None
            for dy in range(3):
                for dx in range(3):
                    t = dy * 3 + dx
                    pa, dr = (a + dy - 1) % 2, (a + dy - 1) // 2
                    pb, dc = (b + dx - 1) % 2, (b + dx - 1) // 2
                    off = (dr + 1) * Wg + (dc + 1)
                    c = jnp.dot(w1_ref[t], x_ref[pa * 2 + pb, :, off:off + Ly],
                                preferred_element_type=jnp.float32)
                    acc = c if acc is None else acc + c
            v = _leaky(acc + b1) * mask_ref[2 * a + b]
            acts[2 * a + b][...] = v.astype(cdt)

    # ---- stage 2: leaky( BN(conv3x3_s2(act)) + BN(conv3x3_s2(x)) ).  Each
    #      tap of the stride-2 conv reads ONE parity plane at a contiguous
    #      lane offset, so only the kept outputs are ever computed.
    acc2 = None
    for dy in range(3):
        for dx in range(3):
            t = dy * 3 + dx
            pa, dr = (dy - 1) % 2, (dy - 1) // 2
            pb, dc = (dx - 1) % 2, (dx - 1) // 2
            plane = pa * 2 + pb
            yoff = (dr + 1) * Wg + (dc + 1)
            xoff = (dr + 2) * Wg + (dc + 2)
            c = jnp.dot(w2_ref[t], acts[plane][:, yoff:yoff + Lout],
                        preferred_element_type=jnp.float32)
            c = c + jnp.dot(w3_ref[t], x_ref[plane, :, xoff:xoff + Lout],
                            preferred_element_type=jnp.float32)
            acc2 = c if acc2 is None else acc2 + c
    out_ref[...] = _leaky(acc2 + bo_ref[...])


# ---------------------------------------------------------------------------
# Weight folding (eval-mode BN + branch composition) -- run ONCE per model.
# ---------------------------------------------------------------------------
def _fold_bn(p):
    gamma, beta, mean, var = p
    sc = gamma / jnp.sqrt(var + BN_EPS)
    sh = beta - mean * sc
    return sc, sh


def fold_basic_conv_params(params, compute_dtype=jnp.float32):
    cin = params["conv_left_w"].shape[0]
    cout = params["conv_res_w"].shape[0]

    sc_l, sh_l = _fold_bn(params["norm_left"])
    sc_c, sh_c = _fold_bn(params["norm_center"])
    sc_r, sh_r = _fold_bn(params["norm_right"])
    sc_cn, sh_cn = _fold_bn(params["norm_center_next"])
    sc_rs, sh_rs = _fold_bn(params["norm_res"])

    pw = params["pw_w"][:, :, 0, 0]          # (cin, cin) pointwise
    dw = params["dw_w"][:, 0, :, :]          # (cin, 3, 3) depthwise
    wl = params["conv_left_w"][:, :, 0, 0]   # (cin, cin) 1x1 left

    # depthwise∘pointwise composed into one dense 3x3, BN_center folded in;
    # conv_left(+BN_left) and identity(+BN_right) folded into the centre tap.
    w1 = sc_c[:, None, None, None] * (pw[:, :, None, None] * dw[None, :, :, :])
    w1 = w1.at[:, :, 1, 1].add(sc_l[:, None] * wl + jnp.diag(sc_r))
    b1 = (sc_c * (pw @ params["dw_b"] + params["pw_b"]) + sh_c
          + sc_l * params["conv_left_b"] + sh_l + sh_r)

    w2 = sc_cn[:, None, None, None] * params["conv_center_next_w"]
    w3 = sc_rs[:, None, None, None] * params["conv_res_w"]
    b_out = (sc_cn * params["conv_center_next_b"] + sh_cn
             + sc_rs * params["conv_res_b"] + sh_rs)

    def to_taps(w):  # (O, I, 3, 3) -> (9, O, I), tap index t = dy*3 + dx
        return jnp.transpose(w, (2, 3, 0, 1)).reshape(9, w.shape[0], w.shape[1])

    return {
        "w1": to_taps(w1).astype(compute_dtype),
        "w2": to_taps(w2).astype(compute_dtype),
        "w3": to_taps(w3).astype(compute_dtype),
        "b1": b1.reshape(cin, 1).astype(jnp.float32),
        "bo": b_out.reshape(cout, 1).astype(jnp.float32),
    }


# ---------------------------------------------------------------------------
# Forward wrapper: space-to-depth plane construction + pallas_call + crop.
# ---------------------------------------------------------------------------
def _build_masks(H, W, Wg, Ly):
    q = np.arange(Ly)
    i, j = q // Wg, q % Wg
    m = np.zeros((4, 1, Ly), np.float32)
    for a in range(2):
        for b in range(2):
            nr, nc = (H - a + 1) // 2, (W - b + 1) // 2
            m[2 * a + b, 0] = ((i >= 1) & (i < 1 + nr) & (j >= 1) & (j < 1 + nc))
    return jnp.asarray(m)


def basic_conv_apply(x_nchw, folded, *, cout_split=1):
    n, cin, H, W = x_nchw.shape
    cout = folded["w2"].shape[1]
    cdt = folded["w1"].dtype

    Ho, Wo = (H + 1) // 2, (W + 1) // 2      # stride-2 output spatial dims
    Wg = Wo + 2                              # parity-plane grid width (1-ring)
    Lout = _round_up(Ho * Wg, 128)
    Ly = _round_up(Lout + Wg + 1, 128)
    Lx = _round_up(Ly + 2 * Wg + 2, 128)

    # 2x2 space-to-depth: x -> 4 zero-ring-padded parity planes, spatial
    # flattened onto lanes (all lane lengths multiples of 128).
    xq = jnp.pad(x_nchw.astype(cdt), ((0, 0), (0, 0), (2, 4), (2, 4)))
    planes = []
    for a in range(2):
        for b in range(2):
            p = xq[:, :, a::2, b::2][:, :, :Ho + 2, :Wg]
            p = p.reshape(n, cin, (Ho + 2) * Wg)
            p = jnp.pad(p, ((0, 0), (0, 0),
                            (Wg + 1, Lx - (Ho + 2) * Wg - (Wg + 1))))
            planes.append(p)
    xplanes = jnp.stack(planes, axis=1)      # (n, 4, cin, Lx)

    masks = _build_masks(H, W, Wg, Ly)

    S = int(cout_split)
    if cout % S != 0 or (S > 1 and (cout // S) % 8 != 0):
        S = 1                                # fall back: keep blocks sublane-aligned
    co_blk = cout // S

    kernel = functools.partial(_basic_conv_kernel, Wg=Wg, Ly=Ly, Lout=Lout,
                               cdt=cdt)

    out = pl.pallas_call(
        kernel,
        out_shape=jax.ShapeDtypeStruct((n, cout, Lout), jnp.float32),
        grid=(n, S),
        in_specs=[
            pl.BlockSpec((None, 4, cin, Lx), lambda i, j: (i, 0, 0, 0)),
            pl.BlockSpec((9, cin, cin), lambda i, j: (0, 0, 0)),
            pl.BlockSpec((cin, 1), lambda i, j: (0, 0)),
            pl.BlockSpec((9, co_blk, cin), lambda i, j: (0, j, 0)),
            pl.BlockSpec((9, co_blk, cin), lambda i, j: (0, j, 0)),
            pl.BlockSpec((co_blk, 1), lambda i, j: (j, 0)),
            pl.BlockSpec((4, 1, Ly), lambda i, j: (0, 0, 0)),
        ],
        out_specs=pl.BlockSpec((None, co_blk, Lout), lambda i, j: (i, j, 0)),
        scratch_shapes=[pltpu.VMEM((cin, Ly), cdt) for _ in range(4)],
        compiler_params=pltpu.CompilerParams(
            dimension_semantics=("parallel", "parallel"),
            vmem_limit_bytes=_vmem_limit_bytes()),
    )(xplanes, folded["w1"], folded["b1"], folded["w2"], folded["w3"],
      folded["bo"], masks)

    # crop the 128-padding and the junk grid columns -> NCHW
    out = out[:, :, :Ho * Wg].reshape(n, cout, Ho, Wg)[:, :, :, :Wo]
    return out


@functools.partial(jax.jit, static_argnames=("cout_split",))
def basic_conv_forward(x_nchw, folded, cout_split=1):
    return basic_conv_apply(x_nchw, folded, cout_split=cout_split)


@functools.partial(jax.jit, static_argnames=("cout_split",))
def img_encoder_forward(x_nchw, folded_stages, cout_split=1):
    """img_encoder.forward = 5 chained basic_conv blocks, one jit."""
    x = x_nchw
    for f in folded_stages:
        x = basic_conv_apply(x, f, cout_split=cout_split)
    return x


# ---------------------------------------------------------------------------
# Deterministic parameter init (shapes follow the PyTorch module __init__)
# ---------------------------------------------------------------------------
def init_params(key, cin, cout):
    keys = jax.random.split(key, 16)

    def rnd(k, shape, scale=0.1):
        return scale * jax.random.normal(k, shape, jnp.float32)

    def bn(k, c):
        k1, k2, k3, k4 = jax.random.split(k, 4)
        gamma = 1.0 + 0.1 * jax.random.normal(k1, (c,), jnp.float32)
        beta = 0.1 * jax.random.normal(k2, (c,), jnp.float32)
        mean = 0.1 * jax.random.normal(k3, (c,), jnp.float32)
        var = 1.0 + 0.1 * jax.random.uniform(k4, (c,), jnp.float32)
        return (gamma, beta, mean, var)

    return {
        "conv_left_w": rnd(keys[0], (cin, cin, 1, 1)),
        "conv_left_b": rnd(keys[1], (cin,)),
        "dw_w": rnd(keys[2], (cin, 1, 3, 3)),        # depthwise, groups=cin
        "dw_b": rnd(keys[3], (cin,)),
        "pw_w": rnd(keys[4], (cin, cin, 1, 1)),      # pointwise
        "pw_b": rnd(keys[5], (cin,)),
        "conv_center_next_w": rnd(keys[6], (cout, cin, 3, 3)),
        "conv_center_next_b": rnd(keys[7], (cout,)),
        "conv_res_w": rnd(keys[8], (cout, cin, 3, 3)),
        "conv_res_b": rnd(keys[9], (cout,)),
        "norm_left": bn(keys[10], cin),
        "norm_center": bn(keys[11], cin),
        "norm_right": bn(keys[12], cin),
        "norm_center_next": bn(keys[13], cout),
        "norm_res": bn(keys[14], cout),
    }


# ---------------------------------------------------------------------------
# Pure-JAX reference (lax convs) for validation
# ---------------------------------------------------------------------------
def reference_basic_conv(x_nchw, params):
    x = jnp.transpose(x_nchw, (0, 2, 3, 1)).astype(jnp.float32)
    dn = ("NHWC", "HWIO", "NHWC")

    def conv(t, w_oihw, b, stride, pad, groups=1):
        wio = jnp.transpose(w_oihw, (2, 3, 1, 0))
        y = jax.lax.conv_general_dilated(
            t, wio, (stride, stride), [(pad, pad), (pad, pad)],
            dimension_numbers=dn, feature_group_count=groups)
        return y + b

    def bn(t, p):
        gamma, beta, mean, var = p
        return (t - mean) / jnp.sqrt(var + BN_EPS) * gamma + beta

    lrelu = lambda t: jnp.where(t > 0, t, LEAKY_SLOPE * t)
    cin = x.shape[-1]

    x_left = bn(conv(x, params["conv_left_w"], params["conv_left_b"], 1, 0),
                params["norm_left"])
    xc = conv(x, params["dw_w"], params["dw_b"], 1, 1, groups=cin)
    xc = conv(xc, params["pw_w"], params["pw_b"], 1, 0)
    xc = bn(xc, params["norm_center"])
    x_right = bn(x, params["norm_right"])
    xc = lrelu(x_left + xc + x_right)
    xc = bn(conv(xc, params["conv_center_next_w"],
                 params["conv_center_next_b"], 2, 1),
            params["norm_center_next"])
    x_res = bn(conv(x, params["conv_res_w"], params["conv_res_b"], 2, 1),
               params["norm_res"])
    out = lrelu(xc + x_res)
    return jnp.transpose(out, (0, 3, 1, 2))


def reference_img_encoder(x_nchw, stage_params):
    x = x_nchw
    for p in stage_params:
        x = reference_basic_conv(x, p)
    return x


if __name__ == "__main__":
    key = jax.random.PRNGKey(0)
    k_x, k_p, k_e = jax.random.split(key, 3)

    # ---- single basic_conv block, f32 (tight check) ----
    N, CIN, H, W = 2, 4, 16, 16
    COUT = 16
    x = jax.random.normal(k_x, (N, CIN, H, W), jnp.float32)
    params = init_params(k_p, CIN, COUT)
    folded_f32 = fold_basic_conv_params(params, jnp.float32)

    ref = jax.block_until_ready(reference_basic_conv(x, params))
    out = jax.block_until_ready(basic_conv_forward(x, folded_f32))
    assert out.shape == (N, COUT, H // 2, W // 2), out.shape
    err1 = float(jnp.max(jnp.abs(out - ref)))

    # same block with output channels split over a second parallel grid axis
    # (both TensorCores on v7x when N == 1); still exact f32.
    out_s = jax.block_until_ready(basic_conv_forward(x, folded_f32, cout_split=2))
    err1s = float(jnp.max(jnp.abs(out_s - ref)))

    # same block with bf16 MXU operands (v6e/v7x path), f32 accumulate/epilogue
    folded_bf16 = fold_basic_conv_params(params, jnp.bfloat16)
    out_b = jax.block_until_ready(basic_conv_forward(x, folded_bf16))
    err1b = float(jnp.max(jnp.abs(out_b - ref)))
    tol1b = 5e-2 * (float(jnp.max(jnp.abs(ref))) + 1.0)

    # ---- full img_encoder: 5 chained stages, in_channels=3, 16x16 input ----
    xe = jax.random.normal(k_e, (1, 3, 16, 16), jnp.float32)
    stage_keys = jax.random.split(k_p, 5)
    cins = (3,) + IMG_ENCODER_CHANNELS[:-1]
    enc_params = [init_params(stage_keys[i], cins[i], IMG_ENCODER_CHANNELS[i])
                  for i in range(5)]
    enc_folded = [fold_basic_conv_params(p, jnp.float32) for p in enc_params]
    enc_out = jax.block_until_ready(img_encoder_forward(xe, enc_folded))
    enc_ref = jax.block_until_ready(reference_img_encoder(xe, enc_params))
    assert enc_out.shape == (1, 512, 1, 1), enc_out.shape
    err2 = float(jnp.max(jnp.abs(enc_out - enc_ref)))
    tol2 = 1e-3 * (float(jnp.max(jnp.abs(enc_ref))) + 1.0)

    ok = (err1 < 1e-3) and (err1s < 1e-3) and (err1b < tol1b) and (err2 < tol2)
    if ok:
        print("KERNEL_OK")
    else:
        print(f"MISMATCH f32={err1} split={err1s} bf16={err1b}/{tol1b} "
              f"encoder={err2}/{tol2}")
</pallas_src>

<mosaic_0001>
module attributes {stable_mosaic.version = 11 : i64} {
  func.func @_basic_conv_kernel(%arg0: i32, %arg1: i32, %arg2: memref<1x4x4x384xf32, #tpu.memory_space<vmem>>, %arg3: memref<9x4x4xf32, #tpu.memory_space<vmem>>, %arg4: memref<4x1xf32, #tpu.memory_space<vmem>>, %arg5: memref<9x16x4xf32, #tpu.memory_space<vmem>>, %arg6: memref<9x16x4xf32, #tpu.memory_space<vmem>>, %arg7: memref<16x1xf32, #tpu.memory_space<vmem>>, %arg8: memref<4x1x256xf32, #tpu.memory_space<vmem>>, %arg9: memref<1x16x128xf32, #tpu.memory_space<vmem>>, %arg10: memref<4x256xf32, #tpu.memory_space<vmem>>, %arg11: memref<4x256xf32, #tpu.memory_space<vmem>>, %arg12: memref<4x256xf32, #tpu.memory_space<vmem>>, %arg13: memref<4x256xf32, #tpu.memory_space<vmem>>) attributes {dimension_semantics = [#tpu.dimension_semantics<parallel>, #tpu.dimension_semantics<parallel>], iteration_bounds = array<i64: 2, 1>, scalar_prefetch = 0 : i64, scratch_operands = 4 : i64, tpu.core_type = #tpu.core_type<tc>, window_params = [{transform_indices = @transform_0, window_bounds = array<i64: 1, 4, 4, 384>}, {pipeline_mode = #tpu.pipeline_mode<synchronous>, transform_indices = @transform_1, window_bounds = array<i64: 9, 4, 4>}, {pipeline_mode = #tpu.pipeline_mode<synchronous>, transform_indices = @transform_2, window_bounds = array<i64: 4, 1>}, {transform_indices = @transform_3, window_bounds = array<i64: 9, 16, 4>}, {transform_indices = @transform_4, window_bounds = array<i64: 9, 16, 4>}, {transform_indices = @transform_5, window_bounds = array<i64: 16, 1>}, {pipeline_mode = #tpu.pipeline_mode<synchronous>, transform_indices = @transform_6, window_bounds = array<i64: 4, 1, 256>}, {transform_indices = @transform_7, window_bounds = array<i64: 1, 16, 128>}]} {
    %c0 = arith.constant 0 : index
    %c0_0 = arith.constant 0 : index
    %0 = vector.load %arg4[%c0, %c0_0] : memref<4x1xf32, #tpu.memory_space<vmem>>, vector<4x1xf32>
    %c0_1 = arith.constant 0 : index
    %c0_2 = arith.constant 0 : index
    %c0_3 = arith.constant 0 : index
    %1 = vector.load %arg3[%c0_1, %c0_2, %c0_3] : memref<9x4x4xf32, #tpu.memory_space<vmem>>, vector<1x4x4xf32>
    %2 = vector.shape_cast %1 : vector<1x4x4xf32> to vector<4x4xf32>
    %c0_4 = arith.constant 0 : index
    %c3 = arith.constant 3 : index
    %c0_5 = arith.constant 0 : index
    %c0_6 = arith.constant 0 : index
    %3 = vector.load %arg2[%c0_4, %c3, %c0_5, %c0_6] : memref<1x4x4x384xf32, #tpu.memory_space<vmem>>, vector<1x1x4x256xf32>
    %4 = vector.shape_cast %3 : vector<1x1x4x256xf32> to vector<4x256xf32>
    %cst = arith.constant dense<0.000000e+00> : vector<4x256xf32>
    %5 = tpu.matmul %2, %4, %cst {dimension_numbers = #tpu.dot_dimension_numbers<[1], [0], [0], [1], [0, 0, 1, 1], [], []>} : vector<4x4xf32>, vector<4x256xf32>, vector<4x256xf32> -> vector<4x256xf32>
    %c1 = arith.constant 1 : index
    %c0_7 = arith.constant 0 : index
    %c0_8 = arith.constant 0 : index
    %6 = vector.load %arg3[%c1, %c0_7, %c0_8] : memref<9x4x4xf32, #tpu.memory_space<vmem>>, vector<1x4x4xf32>
    %7 = vector.shape_cast %6 : vector<1x4x4xf32> to vector<4x4xf32>
    %c0_9 = arith.constant 0 : index
    %c2 = arith.constant 2 : index
    %c0_10 = arith.constant 0 : index
    %c1_11 = arith.constant 1 : index
    %8 = vector.load %arg2[%c0_9, %c2, %c0_10, %c1_11] : memref<1x4x4x384xf32, #tpu.memory_space<vmem>>, vector<1x1x4x256xf32>
    %9 = vector.shape_cast %8 : vector<1x1x4x256xf32> to vector<4x256xf32>
    %cst_12 = arith.constant dense<0.000000e+00> : vector<4x256xf32>
    %10 = tpu.matmul %7, %9, %cst_12 {dimension_numbers = #tpu.dot_dimension_numbers<[1], [0], [0], [1], [0, 0, 1, 1], [], []>} : vector<4x4xf32>, vector<4x256xf32>, vector<4x256xf32> -> vector<4x256xf32>
    %11 = arith.addf %5, %10 : vector<4x256xf32>
    %c2_13 = arith.constant 2 : index
    %c0_14 = arith.constant 0 : index
    %c0_15 = arith.constant 0 : index
    %12 = vector.load %arg3[%c2_13, %c0_14, %c0_15] : memref<9x4x4xf32, #tpu.memory_space<vmem>>, vector<1x4x4xf32>
    %13 = vector.shape_cast %12 : vector<1x4x4xf32> to vector<4x4xf32>
    %c0_16 = arith.constant 0 : index
    %c3_17 = arith.constant 3 : index
    %c0_18 = arith.constant 0 : index
    %c1_19 = arith.constant 1 : index
    %14 = vector.load %arg2[%c0_16, %c3_17, %c0_18, %c1_19] : memref<1x4x4x384xf32, #tpu.memory_space<vmem>>, vector<1x1x4x256xf32>
    %15 = vector.shape_cast %14 : vector<1x1x4x256xf32> to vector<4x256xf32>
    %cst_20 = arith.constant dense<0.000000e+00> : vector<4x256xf32>
    %16 = tpu.matmul %13, %15, %cst_20 {dimension_numbers = #tpu.dot_dimension_numbers<[1], [0], [0], [1], [0, 0, 1, 1], [], []>} : vector<4x4xf32>, vector<4x256xf32>, vector<4x256xf32> -> vector<4x256xf32>
    %17 = arith.addf %11, %16 : vector<4x256xf32>
    %c3_21 = arith.constant 3 : index
    %c0_22 = arith.constant 0 : index
    %c0_23 = arith.constant 0 : index
    %18 = vector.load %arg3[%c3_21, %c0_22, %c0_23] : memref<9x4x4xf32, #tpu.memory_space<vmem>>, vector<1x4x4xf32>
    %19 = vector.shape_cast %18 : vector<1x4x4xf32> to vector<4x4xf32>
    %c0_24 = arith.constant 0 : index
    %c1_25 = arith.constant 1 : index
    %c0_26 = arith.constant 0 : index
    %c10 = arith.constant 10 : index
    %20 = vector.load %arg2[%c0_24, %c1_25, %c0_26, %c10] : memref<1x4x4x384xf32, #tpu.memory_space<vmem>>, vector<1x1x4x256xf32>
    %21 = vector.shape_cast %20 : vector<1x1x4x256xf32> to vector<4x256xf32>
    %cst_27 = arith.constant dense<0.000000e+00> : vector<4x256xf32>
    %22 = tpu.matmul %19, %21, %cst_27 {dimension_numbers = #tpu.dot_dimension_numbers<[1], [0], [0], [1], [0, 0, 1, 1], [], []>} : vector<4x4xf32>, vector<4x256xf32>, vector<4x256xf32> -> vector<4x256xf32>
    %23 = arith.addf %17, %22 : vector<4x256xf32>
    %c4 = arith.constant 4 : index
    %c0_28 = arith.constant 0 : index
    %c0_29 = arith.constant 0 : index
    %24 = vector.load %arg3[%c4, %c0_28, %c0_29] : memref<9x4x4xf32, #tpu.memory_space<vmem>>, vector<1x4x4xf32>
    %25 = vector.shape_cast %24 : vector<1x4x4xf32> to vector<4x4xf32>
    %c0_30 = arith.constant 0 : index
    %c0_31 = arith.constant 0 : index
    %c0_32 = arith.constant 0 : index
    %c11 = arith.constant 11 : index
    %26 = vector.load %arg2[%c0_30, %c0_31, %c0_32, %c11] : memref<1x4x4x384xf32, #tpu.memory_space<vmem>>, vector<1x1x4x256xf32>
    %27 = vector.shape_cast %26 : vector<1x1x4x256xf32> to vector<4x256xf32>
    %cst_33 = arith.constant dense<0.000000e+00> : vector<4x256xf32>
    %28 = tpu.matmul %25, %27, %cst_33 {dimension_numbers = #tpu.dot_dimension_numbers<[1], [0], [0], [1], [0, 0, 1, 1], [], []>} : vector<4x4xf32>, vector<4x256xf32>, vector<4x256xf32> -> vector<4x256xf32>
    %29 = arith.addf %23, %28 : vector<4x256xf32>
    %c5 = arith.constant 5 : index
    %c0_34 = arith.constant 0 : index
    %c0_35 = arith.constant 0 : index
    %30 = vector.load %arg3[%c5, %c0_34, %c0_35] : memref<9x4x4xf32, #tpu.memory_space<vmem>>, vector<1x4x4xf32>
    %31 = vector.shape_cast %30 : vector<1x4x4xf32> to vector<4x4xf32>
    %c0_36 = arith.constant 0 : index
    %c1_37 = arith.constant 1 : index
    %c0_38 = arith.constant 0 : index
    %c11_39 = arith.constant 11 : index
    %32 = vector.load %arg2[%c0_36, %c1_37, %c0_38, %c11_39] : memref<1x4x4x384xf32, #tpu.memory_space<vmem>>, vector<1x1x4x256xf32>
    %33 = vector.shape_cast %32 : vector<1x1x4x256xf32> to vector<4x256xf32>
    %cst_40 = arith.constant dense<0.000000e+00> : vector<4x256xf32>
    %34 = tpu.matmul %31, %33, %cst_40 {dimension_numbers = #tpu.dot_dimension_numbers<[1], [0], [0], [1], [0, 0, 1, 1], [], []>} : vector<4x4xf32>, vector<4x256xf32>, vector<4x256xf32> -> vector<4x256xf32>
    %35 = arith.addf %29, %34 : vector<4x256xf32>
    %c6 = arith.constant 6 : index
    %c0_41 = arith.constant 0 : index
    %c0_42 = arith.constant 0 : index
    %36 = vector.load %arg3[%c6, %c0_41, %c0_42] : memref<9x4x4xf32, #tpu.memory_space<vmem>>, vector<1x4x4xf32>
    %37 = vector.shape_cast %36 : vector<1x4x4xf32> to vector<4x4xf32>
    %c0_43 = arith.constant 0 : index
    %c3_44 = arith.constant 3 : index
    %c0_45 = arith.constant 0 : index
    %c10_46 = arith.constant 10 : index
    %38 = vector.load %arg2[%c0_43, %c3_44, %c0_45, %c10_46] : memref<1x4x4x384xf32, #tpu.memory_space<vmem>>, vector<1x1x4x256xf32>
    %39 = vector.shape_cast %38 : vector<1x1x4x256xf32> to vector<4x256xf32>
    %cst_47 = arith.constant dense<0.000000e+00> : vector<4x256xf32>
    %40 = tpu.matmul %37, %39, %cst_47 {dimension_numbers = #tpu.dot_dimension_numbers<[1], [0], [0], [1], [0, 0, 1, 1], [], []>} : vector<4x4xf32>, vector<4x256xf32>, vector<4x256xf32> -> vector<4x256xf32>
    %41 = arith.addf %35, %40 : vector<4x256xf32>
    %c7 = arith.constant 7 : index
    %c0_48 = arith.constant 0 : index
    %c0_49 = arith.constant 0 : index
    %42 = vector.load %arg3[%c7, %c0_48, %c0_49] : memref<9x4x4xf32, #tpu.memory_space<vmem>>, vector<1x4x4xf32>
    %43 = vector.shape_cast %42 : vector<1x4x4xf32> to vector<4x4xf32>
    %c0_50 = arith.constant 0 : index
    %c2_51 = arith.constant 2 : index
    %c0_52 = arith.constant 0 : index
    %c11_53 = arith.constant 11 : index
    %44 = vector.load %arg2[%c0_50, %c2_51, %c0_52, %c11_53] : memref<1x4x4x384xf32, #tpu.memory_space<vmem>>, vector<1x1x4x256xf32>
    %45 = vector.shape_cast %44 : vector<1x1x4x256xf32> to vector<4x256xf32>
    %cst_54 = arith.constant dense<0.000000e+00> : vector<4x256xf32>
    %46 = tpu.matmul %43, %45, %cst_54 {dimension_numbers = #tpu.dot_dimension_numbers<[1], [0], [0], [1], [0, 0, 1, 1], [], []>} : vector<4x4xf32>, vector<4x256xf32>, vector<4x256xf32> -> vector<4x256xf32>
    %47 = arith.addf %41, %46 : vector<4x256xf32>
    %c8 = arith.constant 8 : index
    %c0_55 = arith.constant 0 : index
    %c0_56 = arith.constant 0 : index
    %48 = vector.load %arg3[%c8, %c0_55, %c0_56] : memref<9x4x4xf32, #tpu.memory_space<vmem>>, vector<1x4x4xf32>
    %49 = vector.shape_cast %48 : vector<1x4x4xf32> to vector<4x4xf32>
    %c0_57 = arith.constant 0 : index
    %c3_58 = arith.constant 3 : index
    %c0_59 = arith.constant 0 : index
    %c11_60 = arith.constant 11 : index
    %50 = vector.load %arg2[%c0_57, %c3_58, %c0_59, %c11_60] : memref<1x4x4x384xf32, #tpu.memory_space<vmem>>, vector<1x1x4x256xf32>
    %51 = vector.shape_cast %50 : vector<1x1x4x256xf32> to vector<4x256xf32>
    %cst_61 = arith.constant dense<0.000000e+00> : vector<4x256xf32>
    %52 = tpu.matmul %49, %51, %cst_61 {dimension_numbers = #tpu.dot_dimension_numbers<[1], [0], [0], [1], [0, 0, 1, 1], [], []>} : vector<4x4xf32>, vector<4x256xf32>, vector<4x256xf32> -> vector<4x256xf32>
    %53 = arith.addf %47, %52 : vector<4x256xf32>
    %54 = vector.broadcast %0 : vector<4x1xf32> to vector<4x256xf32>
    %55 = arith.addf %53, %54 : vector<4x256xf32>
    %cst_62 = arith.constant 0.000000e+00 : f32
    %56 = vector.broadcast %cst_62 : f32 to vector<4x256xf32>
    %57 = arith.cmpf ogt, %55, %56 : vector<4x256xf32>
    %cst_63 = arith.constant 0.00999999977 : f32
    %58 = vector.broadcast %cst_63 : f32 to vector<4x256xf32>
    %59 = arith.mulf %58, %55 : vector<4x256xf32>
    %60 = arith.select %57, %55, %59 : vector<4x256xi1>, vector<4x256xf32>
    %c0_64 = arith.constant 0 : index
    %c0_65 = arith.constant 0 : index
    %c0_66 = arith.constant 0 : index
    %61 = vector.load %arg8[%c0_64, %c0_65, %c0_66] : memref<4x1x256xf32, #tpu.memory_space<vmem>>, vector<1x1x256xf32>
    %62 = vector.shape_cast %61 : vector<1x1x256xf32> to vector<1x256xf32>
    %63 = vector.broadcast %62 : vector<1x256xf32> to vector<4x256xf32>
    %64 = arith.mulf %60, %63 : vector<4x256xf32>
    %c0_67 = arith.constant 0 : index
    %c0_68 = arith.constant 0 : index
    %65 = vector.load %arg10[%c0_67, %c0_68] : memref<4x256xf32, #tpu.memory_space<vmem>>, vector<4x256xf32>
    tpu.vector_store %arg10[%c0_67, %c0_68], %64 {strides = array<i32>} : memref<4x256xf32, #tpu.memory_space<vmem>>, vector<4x256xf32>,
    %c0_69 = arith.constant 0 : index
    %c0_70 = arith.constant 0 : index
    %c0_71 = arith.constant 0 : index
    %66 = vector.load %arg3[%c0_69, %c0_70, %c0_71] : memref<9x4x4xf32, #tpu.memory_space<vmem>>, vector<1x4x4xf32>
    %67 = vector.shape_cast %66 : vector<1x4x4xf32> to vector<4x4xf32>
    %c0_72 = arith.constant 0 : index
    %c2_73 = arith.constant 2 : index
    %c0_74 = arith.constant 0 : index
    %c1_75 = arith.constant 1 : index
    %68 = vector.load %arg2[%c0_72, %c2_73, %c0_74, %c1_75] : memref<1x4x4x384xf32, #tpu.memory_space<vmem>>, vector<1x1x4x256xf32>
    %69 = vector.shape_cast %68 : vector<1x1x4x256xf32> to vector<4x256xf32>
    %cst_76 = arith.constant dense<0.000000e+00> : vector<4x256xf32>
    %70 = tpu.matmul %67, %69, %cst_76 {dimension_numbers = #tpu.dot_dimension_numbers<[1], [0], [0], [1], [0, 0, 1, 1], [], []>} : vector<4x4xf32>, vector<4x256xf32>, vector<4x256xf32> -> vector<4x256xf32>
    %c1_77 = arith.constant 1 : index
    %c0_78 = arith.constant 0 : index
    %c0_79 = arith.constant 0 : index
    %71 = vector.load %arg3[%c1_77, %c0_78, %c0_79] : memref<9x4x4xf32, #tpu.memory_space<vmem>>, vector<1x4x4xf32>
    %72 = vector.shape_cast %71 : vector<1x4x4xf32> to vector<4x4xf32>
    %c0_80 = arith.constant 0 : index
    %c3_81 = arith.constant 3 : index
    %c0_82 = arith.constant 0 : index
    %c1_83 = arith.constant 1 : index
    %73 = vector.load %arg2[%c0_80, %c3_81, %c0_82, %c1_83] : memref<1x4x4x384xf32, #tpu.memory_space<vmem>>, vector<1x1x4x256xf32>
    %74 = vector.shape_cast %73 : vector<1x1x4x256xf32> to vector<4x256xf32>
    %cst_84 = arith.constant dense<0.000000e+00> : vector<4x256xf32>
    %75 = tpu.matmul %72, %74, %cst_84 {dimension_numbers = #tpu.dot_dimension_numbers<[1], [0], [0], [1], [0, 0, 1, 1], [], []>} : vector<4x4xf32>, vector<4x256xf32>, vector<4x256xf32> -> vector<4x256xf32>
    %76 = arith.addf %70, %75 : vector<4x256xf32>
    %c2_85 = arith.constant 2 : index
    %c0_86 = arith.constant 0 : index
    %c0_87 = arith.constant 0 : index
    %77 = vector.load %arg3[%c2_85, %c0_86, %c0_87] : memref<9x4x4xf32, #tpu.memory_space<vmem>>, vector<1x4x4xf32>
    %78 = vector.shape_cast %77 : vector<1x4x4xf32> to vector<4x4xf32>
    %c0_88 = arith.constant 0 : index
    %c2_89 = arith.constant 2 : index
    %c0_90 = arith.constant 0 : index
    %c2_91 = arith.constant 2 : index
    %79 = vector.load %arg2[%c0_88, %c2_89, %c0_90, %c2_91] : memref<1x4x4x384xf32, #tpu.memory_space<vmem>>, vector<1x1x4x256xf32>
    %80 = vector.shape_cast %79 : vector<1x1x4x256xf32> to vector<4x256xf32>
    %cst_92 = arith.constant dense<0.000000e+00> : vector<4x256xf32>
    %81 = tpu.matmul %78, %80, %cst_92 {dimension_numbers = #tpu.dot_dimension_numbers<[1], [0], [0], [1], [0, 0, 1, 1], [], []>} : vector<4x4xf32>, vector<4x256xf32>, vector<4x256xf32> -> vector<4x256xf32>
    %82 = arith.addf %76, %81 : vector<4x256xf32>
    %c3_93 = arith.constant 3 : index
    %c0_94 = arith.constant 0 : index
    %c0_95 = arith.constant 0 : index
    %83 = vector.load %arg3[%c3_93, %c0_94, %c0_95] : memref<9x4x4xf32, #tpu.memory_space<vmem>>, vector<1x4x4xf32>
    %84 = vector.shape_cast %83 : vector<1x4x4xf32> to vector<4x4xf32>
    %c0_96 = arith.constant 0 : index
    %c0_97 = arith.constant 0 : index
    %c0_98 = arith.constant 0 : index
    %c11_99 = arith.constant 11 : index
    %85 = vector.load %arg2[%c0_96, %c0_97, %c0_98, %c11_99] : memref<1x4x4x384xf32, #tpu.memory_space<vmem>>, vector<1x1x4x256xf32>
    %86 = vector.shape_cast %85 : vector<1x1x4x256xf32> to vector<4x256xf32>
    %cst_100 = arith.constant dense<0.000000e+00> : vector<4x256xf32>
    %87 = tpu.matmul %84, %86, %cst_100 {dimension_numbers = #tpu.dot_dimension_numbers<[1], [0], [0], [1], [0, 0, 1, 1], [], []>} : vector<4x4xf32>, vector<4x256xf32>, vector<4x256xf32> -> vector<4x256xf32>
    %88 = arith.addf %82, %87 : vector<4x256xf32>
    %c4_101 = arith.constant 4 : index
    %c0_102 = arith.constant 0 : index
    %c0_103 = arith.constant 0 : index
    %89 = vector.load %arg3[%c4_101, %c0_102, %c0_103] : memref<9x4x4xf32, #tpu.memory_space<vmem>>, vector<1x4x4xf32>
    %90 = vector.shape_cast %89 : vector<1x4x4xf32> to vector<4x4xf32>
    %c0_104 = arith.constant 0 : index
    %c1_105 = arith.constant 1 : index
    %c0_106 = arith.constant 0 : index
    %c11_107 = arith.constant 11 : index
    %91 = vector.load %arg2[%c0_104, %c1_105, %c0_106, %c11_107] : memref<1x4x4x384xf32, #tpu.memory_space<vmem>>, vector<1x1x4x256xf32>
    %92 = vector.shape_cast %91 : vector<1x1x4x256xf32> to vector<4x256xf32>
    %cst_108 = arith.constant dense<0.000000e+00> : vector<4x256xf32>
    %93 = tpu.matmul %90, %92, %cst_108 {dimension_numbers = #tpu.dot_dimension_numbers<[1], [0], [0], [1], [0, 0, 1, 1], [], []>} : vector<4x4xf32>, vector<4x256xf32>, vector<4x256xf32> -> vector<4x256xf32>
    %94 = arith.addf %88, %93 : vector<4x256xf32>
    %c5_109 = arith.constant 5 : index
    %c0_110 = arith.constant 0 : index
    %c0_111 = arith.constant 0 : index
    %95 = vector.load %arg3[%c5_109, %c0_110, %c0_111] : memref<9x4x4xf32, #tpu.memory_space<vmem>>, vector<1x4x4xf32>
    %96 = vector.shape_cast %95 : vector<1x4x4xf32> to vector<4x4xf32>
    %c0_112 = arith.constant 0 : index
    %c0_113 = arith.constant 0 : index
    %c0_114 = arith.constant 0 : index
    %c12 = arith.constant 12 : index
    %97 = vector.load %arg2[%c0_112, %c0_113, %c0_114, %c12] : memref<1x4x4x384xf32, #tpu.memory_space<vmem>>, vector<1x1x4x256xf32>
    %98 = vector.shape_cast %97 : vector<1x1x4x256xf32> to vector<4x256xf32>
    %cst_115 = arith.constant dense<0.000000e+00> : vector<4x256xf32>
    %99 = tpu.matmul %96, %98, %cst_115 {dimension_numbers = #tpu.dot_dimension_numbers<[1], [0], [0], [1], [0, 0, 1, 1], [], []>} : vector<4x4xf32>, vector<4x256xf32>, vector<4x256xf32> -> vector<4x256xf32>
    %100 = arith.addf %94, %99 : vector<4x256xf32>
    %c6_116 = arith.constant 6 : index
    %c0_117 = arith.constant 0 : index
    %c0_118 = arith.constant 0 : index
    %101 = vector.load %arg3[%c6_116, %c0_117, %c0_118] : memref<9x4x4xf32, #tpu.memory_space<vmem>>, vector<1x4x4xf32>
    %102 = vector.shape_cast %101 : vector<1x4x4xf32> to vector<4x4xf32>
    %c0_119 = arith.constant 0 : index
    %c2_120 = arith.constant 2 : index
    %c0_121 = arith.constant 0 : index
    %c11_122 = arith.constant 11 : index
    %103 = vector.load %arg2[%c0_119, %c2_120, %c0_121, %c11_122] : memref<1x4x4x384xf32, #tpu.memory_space<vmem>>, vector<1x1x4x256xf32>
    %104 = vector.shape_cast %103 : vector<1x1x4x256xf32> to vector<4x256xf32>
    %cst_123 = arith.constant dense<0.000000e+00> : vector<4x256xf32>
    %105 = tpu.matmul %102, %104, %cst_123 {dimension_numbers = #tpu.dot_dimension_numbers<[1], [0], [0], [1], [0, 0, 1, 1], [], []>} : vector<4x4xf32>, vector<4x256xf32>, vector<4x256xf32> -> vector<4x256xf32>
    %106 = arith.addf %100, %105 : vector<4x256xf32>
    %c7_124 = arith.constant 7 : index
    %c0_125 = arith.constant 0 : index
    %c0_126 = arith.constant 0 : index
    %107 = vector.load %arg3[%c7_124, %c0_125, %c0_126] : memref<9x4x4xf32, #tpu.memory_space<vmem>>, vector<1x4x4xf32>
    %108 = vector.shape_cast %107 : vector<1x4x4xf32> to vector<4x4xf32>
    %c0_127 = arith.constant 0 : index
    %c3_128 = arith.constant 3 : index
    %c0_129 = arith.constant 0 : index
    %c11_130 = arith.constant 11 : index
    %109 = vector.load %arg2[%c0_127, %c3_128, %c0_129, %c11_130] : memref<1x4x4x384xf32, #tpu.memory_space<vmem>>, vector<1x1x4x256xf32>
    %110 = vector.shape_cast %109 : vector<1x1x4x256xf32> to vector<4x256xf32>
    %cst_131 = arith.constant dense<0.000000e+00> : vector<4x256xf32>
    %111 = tpu.matmul %108, %110, %cst_131 {dimension_numbers = #tpu.dot_dimension_numbers<[1], [0], [0], [1], [0, 0, 1, 1], [], []>} : vector<4x4xf32>, vector<4x256xf32>, vector<4x256xf32> -> vector<4x256xf32>
    %112 = arith.addf %106, %111 : vector<4x256xf32>
    %c8_132 = arith.constant 8 : index
    %c0_133 = arith.constant 0 : index
    %c0_134 = arith.constant 0 : index
    %113 = vector.load %arg3[%c8_132, %c0_133, %c0_134] : memref<9x4x4xf32, #tpu.memory_space<vmem>>, vector<1x4x4xf32>
    %114 = vector.shape_cast %113 : vector<1x4x4xf32> to vector<4x4xf32>
    %c0_135 = arith.constant 0 : index
    %c2_136 = arith.constant 2 : index
    %c0_137 = arith.constant 0 : index
    %c12_138 = arith.constant 12 : index
    %115 = vector.load %arg2[%c0_135, %c2_136, %c0_137, %c12_138] : memref<1x4x4x384xf32, #tpu.memory_space<vmem>>, vector<1x1x4x256xf32>
    %116 = vector.shape_cast %115 : vector<1x1x4x256xf32> to vector<4x256xf32>
    %cst_139 = arith.constant dense<0.000000e+00> : vector<4x256xf32>
    %117 = tpu.matmul %114, %116, %cst_139 {dimension_numbers = #tpu.dot_dimension_numbers<[1], [0], [0], [1], [0, 0, 1, 1], [], []>} : vector<4x4xf32>, vector<4x256xf32>, vector<4x256xf32> -> vector<4x256xf32>
    %118 = arith.addf %112, %117 : vector<4x256xf32>
    %119 = vector.broadcast %0 : vector<4x1xf32> to vector<4x256xf32>
    %120 = arith.addf %118, %119 : vector<4x256xf32>
    %cst_140 = arith.constant 0.000000e+00 : f32
    %121 = vector.broadcast %cst_140 : f32 to vector<4x256xf32>
    %122 = arith.cmpf ogt, %120, %121 : vector<4x256xf32>
    %cst_141 = arith.constant 0.00999999977 : f32
    %123 = vector.broadcast %cst_141 : f32 to vector<4x256xf32>
    %124 = arith.mulf %123, %120 : vector<4x256xf32>
    %125 = arith.select %122, %120, %124 : vector<4x256xi1>, vector<4x256xf32>
    %c1_142 = arith.constant 1 : index
    %c0_143 = arith.constant 0 : index
    %c0_144 = arith.constant 0 : index
    %126 = vector.load %arg8[%c1_142, %c0_143, %c0_144] : memref<4x1x256xf32, #tpu.memory_space<vmem>>, vector<1x1x256xf32>
    %127 = vector.shape_cast %126 : vector<1x1x256xf32> to vector<1x256xf32>
    %128 = vector.broadcast %127 : vector<1x256xf32> to vector<4x256xf32>
    %129 = arith.mulf %125, %128 : vector<4x256xf32>
    %c0_145 = arith.constant 0 : index
    %c0_146 = arith.constant 0 : index
    %130 = vector.load %arg11[%c0_145, %c0_146] : memref<4x256xf32, #tpu.memory_space<vmem>>, vector<4x256xf32>
    tpu.vector_store %arg11[%c0_145, %c0_146], %129 {strides = array<i32>} : memref<4x256xf32, #tpu.memory_space<vmem>>, vector<4x256xf32>,
    %c0_147 = arith.constant 0 : index
    %c0_148 = arith.constant 0 : index
    %c0_149 = arith.constant 0 : index
    %131 = vector.load %arg3[%c0_147, %c0_148, %c0_149] : memref<9x4x4xf32, #tpu.memory_space<vmem>>, vector<1x4x4xf32>
    %132 = vector.shape_cast %131 : vector<1x4x4xf32> to vector<4x4xf32>
    %c0_150 = arith.constant 0 : index
    %c1_151 = arith.constant 1 : index
    %c0_152 = arith.constant 0 : index
    %c10_153 = arith.constant 10 : index
    %133 = vector.load %arg2[%c0_150, %c1_151, %c0_152, %c10_153] : memref<1x4x4x384xf32, #tpu.memory_space<vmem>>, vector<1x1x4x256xf32>
    %134 = vector.shape_cast %133 : vector<1x1x4x256xf32> to vector<4x256xf32>
    %cst_154 = arith.constant dense<0.000000e+00> : vector<4x256xf32>
    %135 = tpu.matmul %132, %134, %cst_154 {dimension_numbers = #tpu.dot_dimension_numbers<[1], [0], [0], [1], [0, 0, 1, 1], [], []>} : vector<4x4xf32>, vector<4x256xf32>, vector<4x256xf32> -> vector<4x256xf32>
    %c1_155 = arith.constant 1 : index
    %c0_156 = arith.constant 0 : index
    %c0_157 = arith.constant 0 : index
    %136 = vector.load %arg3[%c1_155, %c0_156, %c0_157] : memref<9x4x4xf32, #tpu.memory_space<vmem>>, vector<1x4x4xf32>
    %137 = vector.shape_cast %136 : vector<1x4x4xf32> to vector<4x4xf32>
    %c0_158 = arith.constant 0 : index
    %c0_159 = arith.constant 0 : index
    %c0_160 = arith.constant 0 : index
    %c11_161 = arith.constant 11 : index
    %138 = vector.load %arg2[%c0_158, %c0_159, %c0_160, %c11_161] : memref<1x4x4x384xf32, #tpu.memory_space<vmem>>, vector<1x1x4x256xf32>
    %139 = vector.shape_cast %138 : vector<1x1x4x256xf32> to vector<4x256xf32>
    %cst_162 = arith.constant dense<0.000000e+00> : vector<4x256xf32>
    %140 = tpu.matmul %137, %139, %cst_162 {dimension_numbers = #tpu.dot_dimension_numbers<[1], [0], [0], [1], [0, 0, 1, 1], [], []>} : vector<4x4xf32>, vector<4x256xf32>, vector<4x256xf32> -> vector<4x256xf32>
    %141 = arith.addf %135, %140 : vector<4x256xf32>
    %c2_163 = arith.constant 2 : index
    %c0_164 = arith.constant 0 : index
    %c0_165 = arith.constant 0 : index
    %142 = vector.load %arg3[%c2_163, %c0_164, %c0_165] : memref<9x4x4xf32, #tpu.memory_space<vmem>>, vector<1x4x4xf32>
    %143 = vector.shape_cast %142 : vector<1x4x4xf32> to vector<4x4xf32>
    %c0_166 = arith.constant 0 : index
    %c1_167 = arith.constant 1 : index
    %c0_168 = arith.constant 0 : index
    %c11_169 = arith.constant 11 : index
    %144 = vector.load %arg2[%c0_166, %c1_167, %c0_168, %c11_169] : memref<1x4x4x384xf32, #tpu.memory_space<vmem>>, vector<1x1x4x256xf32>
    %145 = vector.shape_cast %144 : vector<1x1x4x256xf32> to vector<4x256xf32>
    %cst_170 = arith.constant dense<0.000000e+00> : vector<4x256xf32>
    %146 = tpu.matmul %143, %145, %cst_170 {dimension_numbers = #tpu.dot_dimension_numbers<[1], [0], [0], [1], [0, 0, 1, 1], [], []>} : vector<4x4xf32>, vector<4x256xf32>, vector<4x256xf32> -> vector<4x256xf32>
    %147 = arith.addf %141, %146 : vector<4x256xf32>
    %c3_171 = arith.constant 3 : index
    %c0_172 = arith.constant 0 : index
    %c0_173 = arith.constant 0 : index
    %148 = vector.load %arg3[%c3_171, %c0_172, %c0_173] : memref<9x4x4xf32, #tpu.memory_space<vmem>>, vector<1x4x4xf32>
    %149 = vector.shape_cast %148 : vector<1x4x4xf32> to vector<4x4xf32>
    %c0_174 = arith.constant 0 : index
    %c3_175 = arith.constant 3 : index
    %c0_176 = arith.constant 0 : index
    %c10_177 = arith.constant 10 : index
    %150 = vector.load %arg2[%c0_174, %c3_175, %c0_176, %c10_177] : memref<1x4x4x384xf32, #tpu.memory_space<vmem>>, vector<1x1x4x256xf32>
    %151 = vector.shape_cast %150 : vector<1x1x4x256xf32> to vector<4x256xf32>
    %cst_178 = arith.constant dense<0.000000e+00> : vector<4x256xf32>
    %152 = tpu.matmul %149, %151, %cst_178 {dimension_numbers = #tpu.dot_dimension_numbers<[1], [0], [0], [1], [0, 0, 1, 1], [], []>} : vector<4x4xf32>, vector<4x256xf32>, vector<4x256xf32> -> vector<4x256xf32>
    %153 = arith.addf %147, %152 : vector<4x256xf32>
    %c4_179 = arith.constant 4 : index
    %c0_180 = arith.constant 0 : index
    %c0_181 = arith.constant 0 : index
    %154 = vector.load %arg3[%c4_179, %c0_180, %c0_181] : memref<9x4x4xf32, #tpu.memory_space<vmem>>, vector<1x4x4xf32>
    %155 = vector.shape_cast %154 : vector<1x4x4xf32> to vector<4x4xf32>
    %c0_182 = arith.constant 0 : index
    %c2_183 = arith.constant 2 : index
    %c0_184 = arith.constant 0 : index
    %c11_185 = arith.constant 11 : index
    %156 = vector.load %arg2[%c0_182, %c2_183, %c0_184, %c11_185] : memref<1x4x4x384xf32, #tpu.memory_space<vmem>>, vector<1x1x4x256xf32>
    %157 = vector.shape_cast %156 : vector<1x1x4x256xf32> to vector<4x256xf32>
    %cst_186 = arith.constant dense<0.000000e+00> : vector<4x256xf32>
    %158 = tpu.matmul %155, %157, %cst_186 {dimension_numbers = #tpu.dot_dimension_numbers<[1], [0], [0], [1], [0, 0, 1, 1], [], []>} : vector<4x4xf32>, vector<4x256xf32>, vector<4x256xf32> -> vector<4x256xf32>
    %159 = arith.addf %153, %158 : vector<4x256xf32>
    %c5_187 = arith.constant 5 : index
    %c0_188 = arith.constant 0 : index
    %c0_189 = arith.constant 0 : index
    %160 = vector.load %arg3[%c5_187, %c0_188, %c0_189] : memref<9x4x4xf32, #tpu.memory_space<vmem>>, vector<1x4x4xf32>
    %161 = vector.shape_cast %160 : vector<1x4x4xf32> to vector<4x4xf32>
    %c0_190 = arith.constant 0 : index
    %c3_191 = arith.constant 3 : index
    %c0_192 = arith.constant 0 : index
    %c11_193 = arith.constant 11 : index
    %162 = vector.load %arg2[%c0_190, %c3_191, %c0_192, %c11_193] : memref<1x4x4x384xf32, #tpu.memory_space<vmem>>, vector<1x1x4x256xf32>
    %163 = vector.shape_cast %162 : vector<1x1x4x256xf32> to vector<4x256xf32>
    %cst_194 = arith.constant dense<0.000000e+00> : vector<4x256xf32>
    %164 = tpu.matmul %161, %163, %cst_194 {dimension_numbers = #tpu.dot_dimension_numbers<[1], [0], [0], [1], [0, 0, 1, 1], [], []>} : vector<4x4xf32>, vector<4x256xf32>, vector<4x256xf32> -> vector<4x256xf32>
    %165 = arith.addf %159, %164 : vector<4x256xf32>
    %c6_195 = arith.constant 6 : index
    %c0_196 = arith.constant 0 : index
    %c0_197 = arith.constant 0 : index
    %166 = vector.load %arg3[%c6_195, %c0_196, %c0_197] : memref<9x4x4xf32, #tpu.memory_space<vmem>>, vector<1x4x4xf32>
    %167 = vector.shape_cast %166 : vector<1x4x4xf32> to vector<4x4xf32>
    %c0_198 = arith.constant 0 : index
    %c1_199 = arith.constant 1 : index
    %c0_200 = arith.constant 0 : index
    %c20 = arith.constant 20 : index
    %168 = vector.load %arg2[%c0_198, %c1_199, %c0_200, %c20] : memref<1x4x4x384xf32, #tpu.memory_space<vmem>>, vector<1x1x4x256xf32>
    %169 = vector.shape_cast %168 : vector<1x1x4x256xf32> to vector<4x256xf32>
    %cst_201 = arith.constant dense<0.000000e+00> : vector<4x256xf32>
    %170 = tpu.matmul %167, %169, %cst_201 {dimension_numbers = #tpu.dot_dimension_numbers<[1], [0], [0], [1], [0, 0, 1, 1], [], []>} : vector<4x4xf32>, vector<4x256xf32>, vector<4x256xf32> -> vector<4x256xf32>
    %171 = arith.addf %165, %170 : vector<4x256xf32>
    %c7_202 = arith.constant 7 : index
    %c0_203 = arith.constant 0 : index
    %c0_204 = arith.constant 0 : index
    %172 = vector.load %arg3[%c7_202, %c0_203, %c0_204] : memref<9x4x4xf32, #tpu.memory_space<vmem>>, vector<1x4x4xf32>
    %173 = vector.shape_cast %172 : vector<1x4x4xf32> to vector<4x4xf32>
    %c0_205 = arith.constant 0 : index
    %c0_206 = arith.constant 0 : index
    %c0_207 = arith.constant 0 : index
    %c21 = arith.constant 21 : index
    %174 = vector.load %arg2[%c0_205, %c0_206, %c0_207, %c21] : memref<1x4x4x384xf32, #tpu.memory_space<vmem>>, vector<1x1x4x256xf32>
    %175 = vector.shape_cast %174 : vector<1x1x4x256xf32> to vector<4x256xf32>
    %cst_208 = arith.constant dense<0.000000e+00> : vector<4x256xf32>
    %176 = tpu.matmul %173, %175, %cst_208 {dimension_numbers = #tpu.dot_dimension_numbers<[1], [0], [0], [1], [0, 0, 1, 1], [], []>} : vector<4x4xf32>, vector<4x256xf32>, vector<4x256xf32> -> vector<4x256xf32>
    %177 = arith.addf %171, %176 : vector<4x256xf32>
    %c8_209 = arith.constant 8 : index
    %c0_210 = arith.constant 0 : index
    %c0_211 = arith.constant 0 : index
    %178 = vector.load %arg3[%c8_209, %c0_210, %c0_211] : memref<9x4x4xf32, #tpu.memory_space<vmem>>, vector<1x4x4xf32>
    %179 = vector.shape_cast %178 : vector<1x4x4xf32> to vector<4x4xf32>
    %c0_212 = arith.constant 0 : index
    %c1_213 = arith.constant 1 : index
    %c0_214 = arith.constant 0 : index
    %c21_215 = arith.constant 21 : index
    %180 = vector.load %arg2[%c0_212, %c1_213, %c0_214, %c21_215] : memref<1x4x4x384xf32, #tpu.memory_space<vmem>>, vector<1x1x4x256xf32>
    %181 = vector.shape_cast %180 : vector<1x1x4x256xf32> to vector<4x256xf32>
    %cst_216 = arith.constant dense<0.000000e+00> : vector<4x256xf32>
    %182 = tpu.matmul %179, %181, %cst_216 {dimension_numbers = #tpu.dot_dimension_numbers<[1], [0], [0], [1], [0, 0, 1, 1], [], []>} : vector<4x4xf32>, vector<4x256xf32>, vector<4x256xf32> -> vector<4x256xf32>
    %183 = arith.addf %177, %182 : vector<4x256xf32>
    %184 = vector.broadcast %0 : vector<4x1xf32> to vector<4x256xf32>
    %185 = arith.addf %183, %184 : vector<4x256xf32>
    %cst_217 = arith.constant 0.000000e+00 : f32
    %186 = vector.broadcast %cst_217 : f32 to vector<4x256xf32>
    %187 = arith.cmpf ogt, %185, %186 : vector<4x256xf32>
    %cst_218 = arith.constant 0.00999999977 : f32
    %188 = vector.broadcast %cst_218 : f32 to vector<4x256xf32>
    %189 = arith.mulf %188, %185 : vector<4x256xf32>
    %190 = arith.select %187, %185, %189 : vector<4x256xi1>, vector<4x256xf32>
    %c2_219 = arith.constant 2 : index
    %c0_220 = arith.constant 0 : index
    %c0_221 = arith.constant 0 : index
    %191 = vector.load %arg8[%c2_219, %c0_220, %c0_221] : memref<4x1x256xf32, #tpu.memory_space<vmem>>, vector<1x1x256xf32>
    %192 = vector.shape_cast %191 : vector<1x1x256xf32> to vector<1x256xf32>
    %193 = vector.broadcast %192 : vector<1x256xf32> to vector<4x256xf32>
    %194 = arith.mulf %190, %193 : vector<4x256xf32>
    %c0_222 = arith.constant 0 : index
    %c0_223 = arith.constant 0 : index
    %195 = vector.load %arg12[%c0_222, %c0_223] : memref<4x256xf32, #tpu.memory_space<vmem>>, vector<4x256xf32>
    tpu.vector_store %arg12[%c0_222, %c0_223], %194 {strides = array<i32>} : memref<4x256xf32, #tpu.memory_space<vmem>>, vector<4x256xf32>,
    %c0_224 = arith.constant 0 : index
    %c0_225 = arith.constant 0 : index
    %c0_226 = arith.constant 0 : index
    %196 = vector.load %arg3[%c0_224, %c0_225, %c0_226] : memref<9x4x4xf32, #tpu.memory_space<vmem>>, vector<1x4x4xf32>
    %197 = vector.shape_cast %196 : vector<1x4x4xf32> to vector<4x4xf32>
    %c0_227 = arith.constant 0 : index
    %c0_228 = arith.constant 0 : index
    %c0_229 = arith.constant 0 : index
    %c11_230 = arith.constant 11 : index
    %198 = vector.load %arg2[%c0_227, %c0_228, %c0_229, %c11_230] : memref<1x4x4x384xf32, #tpu.memory_space<vmem>>, vector<1x1x4x256xf32>
    %199 = vector.shape_cast %198 : vector<1x1x4x256xf32> to vector<4x256xf32>
    %cst_231 = arith.constant dense<0.000000e+00> : vector<4x256xf32>
    %200 = tpu.matmul %197, %199, %cst_231 {dimension_numbers = #tpu.dot_dimension_numbers<[1], [0], [0], [1], [0, 0, 1, 1], [], []>} : vector<4x4xf32>, vector<4x256xf32>, vector<4x256xf32> -> vector<4x256xf32>
    %c1_232 = arith.constant 1 : index
    %c0_233 = arith.constant 0 : index
    %c0_234 = arith.constant 0 : index
    %201 = vector.load %arg3[%c1_232, %c0_233, %c0_234] : memref<9x4x4xf32, #tpu.memory_space<vmem>>, vector<1x4x4xf32>
    %202 = vector.shape_cast %201 : vector<1x4x4xf32> to vector<4x4xf32>
    %c0_235 = arith.constant 0 : index
    %c1_236 = arith.constant 1 : index
    %c0_237 = arith.constant 0 : index
    %c11_238 = arith.constant 11 : index
    %203 = vector.load %arg2[%c0_235, %c1_236, %c0_237, %c11_238] : memref<1x4x4x384xf32, #tpu.memory_space<vmem>>, vector<1x1x4x256xf32>
    %204 = vector.shape_cast %203 : vector<1x1x4x256xf32> to vector<4x256xf32>
    %cst_239 = arith.constant dense<0.000000e+00> : vector<4x256xf32>
    %205 = tpu.matmul %202, %204, %cst_239 {dimension_numbers = #tpu.dot_dimension_numbers<[1], [0], [0], [1], [0, 0, 1, 1], [], []>} : vector<4x4xf32>, vector<4x256xf32>, vector<4x256xf32> -> vector<4x256xf32>
    %206 = arith.addf %200, %205 : vector<4x256xf32>
    %c2_240 = arith.constant 2 : index
    %c0_241 = arith.constant 0 : index
    %c0_242 = arith.constant 0 : index
    %207 = vector.load %arg3[%c2_240, %c0_241, %c0_242] : memref<9x4x4xf32, #tpu.memory_space<vmem>>, vector<1x4x4xf32>
    %208 = vector.shape_cast %207 : vector<1x4x4xf32> to vector<4x4xf32>
    %c0_243 = arith.constant 0 : index
    %c0_244 = arith.constant 0 : index
    %c0_245 = arith.constant 0 : index
    %c12_246 = arith.constant 12 : index
    %209 = vector.load %arg2[%c0_243, %c0_244, %c0_245, %c12_246] : memref<1x4x4x384xf32, #tpu.memory_space<vmem>>, vector<1x1x4x256xf32>
    %210 = vector.shape_cast %209 : vector<1x1x4x256xf32> to vector<4x256xf32>
    %cst_247 = arith.constant dense<0.000000e+00> : vector<4x256xf32>
    %211 = tpu.matmul %208, %210, %cst_247 {dimension_numbers = #tpu.dot_dimension_numbers<[1], [0], [0], [1], [0, 0, 1, 1], [], []>} : vector<4x4xf32>, vector<4x256xf32>, vector<4x256xf32> -> vector<4x256xf32>
    %212 = arith.addf %206, %211 : vector<4x256xf32>
    %c3_248 = arith.constant 3 : index
    %c0_249 = arith.constant 0 : index
    %c0_250 = arith.constant 0 : index
    %213 = vector.load %arg3[%c3_248, %c0_249, %c0_250] : memref<9x4x4xf32, #tpu.memory_space<vmem>>, vector<1x4x4xf32>
    %214 = vector.shape_cast %213 : vector<1x4x4xf32> to vector<4x4xf32>
    %c0_251 = arith.constant 0 : index
    %c2_252 = arith.constant 2 : index
    %c0_253 = arith.constant 0 : index
    %c11_254 = arith.constant 11 : index
    %215 = vector.load %arg2[%c0_251, %c2_252, %c0_253, %c11_254] : memref<1x4x4x384xf32, #tpu.memory_space<vmem>>, vector<1x1x4x256xf32>
    %216 = vector.shape_cast %215 : vector<1x1x4x256xf32> to vector<4x256xf32>
    %cst_255 = arith.constant dense<0.000000e+00> : vector<4x256xf32>
    %217 = tpu.matmul %214, %216, %cst_255 {dimension_numbers = #tpu.dot_dimension_numbers<[1], [0], [0], [1], [0, 0, 1, 1], [], []>} : vector<4x4xf32>, vector<4x256xf32>, vector<4x256xf32> -> vector<4x256xf32>
    %218 = arith.addf %212, %217 : vector<4x256xf32>
    %c4_256 = arith.constant 4 : index
    %c0_257 = arith.constant 0 : index
    %c0_258 = arith.constant 0 : index
    %219 = vector.load %arg3[%c4_256, %c0_257, %c0_258] : memref<9x4x4xf32, #tpu.memory_space<vmem>>, vector<1x4x4xf32>
    %220 = vector.shape_cast %219 : vector<1x4x4xf32> to vector<4x4xf32>
    %c0_259 = arith.constant 0 : index
    %c3_260 = arith.constant 3 : index
    %c0_261 = arith.constant 0 : index
    %c11_262 = arith.constant 11 : index
    %221 = vector.load %arg2[%c0_259, %c3_260, %c0_261, %c11_262] : memref<1x4x4x384xf32, #tpu.memory_space<vmem>>, vector<1x1x4x256xf32>
    %222 = vector.shape_cast %221 : vector<1x1x4x256xf32> to vector<4x256xf32>
    %cst_263 = arith.constant dense<0.000000e+00> : vector<4x256xf32>
    %223 = tpu.matmul %220, %222, %cst_263 {dimension_numbers = #tpu.dot_dimension_numbers<[1], [0], [0], [1], [0, 0, 1, 1], [], []>} : vector<4x4xf32>, vector<4x256xf32>, vector<4x256xf32> -> vector<4x256xf32>
    %224 = arith.addf %218, %223 : vector<4x256xf32>
    %c5_264 = arith.constant 5 : index
    %c0_265 = arith.constant 0 : index
    %c0_266 = arith.constant 0 : index
    %225 = vector.load %arg3[%c5_264, %c0_265, %c0_266] : memref<9x4x4xf32, #tpu.memory_space<vmem>>, vector<1x4x4xf32>
    %226 = vector.shape_cast %225 : vector<1x4x4xf32> to vector<4x4xf32>
    %c0_267 = arith.constant 0 : index
    %c2_268 = arith.constant 2 : index
    %c0_269 = arith.constant 0 : index
    %c12_270 = arith.constant 12 : index
    %227 = vector.load %arg2[%c0_267, %c2_268, %c0_269, %c12_270] : memref<1x4x4x384xf32, #tpu.memory_space<vmem>>, vector<1x1x4x256xf32>
    %228 = vector.shape_cast %227 : vector<1x1x4x256xf32> to vector<4x256xf32>
    %cst_271 = arith.constant dense<0.000000e+00> : vector<4x256xf32>
    %229 = tpu.matmul %226, %228, %cst_271 {dimension_numbers = #tpu.dot_dimension_numbers<[1], [0], [0], [1], [0, 0, 1, 1], [], []>} : vector<4x4xf32>, vector<4x256xf32>, vector<4x256xf32> -> vector<4x256xf32>
    %230 = arith.addf %224, %229 : vector<4x256xf32>
    %c6_272 = arith.constant 6 : index
    %c0_273 = arith.constant 0 : index
    %c0_274 = arith.constant 0 : index
    %231 = vector.load %arg3[%c6_272, %c0_273, %c0_274] : memref<9x4x4xf32, #tpu.memory_space<vmem>>, vector<1x4x4xf32>
    %232 = vector.shape_cast %231 : vector<1x4x4xf32> to vector<4x4xf32>
    %c0_275 = arith.constant 0 : index
    %c0_276 = arith.constant 0 : index
    %c0_277 = arith.constant 0 : index
    %c21_278 = arith.constant 21 : index
    %233 = vector.load %arg2[%c0_275, %c0_276, %c0_277, %c21_278] : memref<1x4x4x384xf32, #tpu.memory_space<vmem>>, vector<1x1x4x256xf32>
    %234 = vector.shape_cast %233 : vector<1x1x4x256xf32> to vector<4x256xf32>
    %cst_279 = arith.constant dense<0.000000e+00> : vector<4x256xf32>
    %235 = tpu.matmul %232, %234, %cst_279 {dimension_numbers = #tpu.dot_dimension_numbers<[1], [0], [0], [1], [0, 0, 1, 1], [], []>} : vector<4x4xf32>, vector<4x256xf32>, vector<4x256xf32> -> vector<4x256xf32>
    %236 = arith.addf %230, %235 : vector<4x256xf32>
    %c7_280 = arith.constant 7 : index
    %c0_281 = arith.constant 0 : index
    %c0_282 = arith.constant 0 : index
    %237 = vector.load %arg3[%c7_280, %c0_281, %c0_282] : memref<9x4x4xf32, #tpu.memory_space<vmem>>, vector<1x4x4xf32>
    %238 = vector.shape_cast %237 : vector<1x4x4xf32> to vector<4x4xf32>
    %c0_283 = arith.constant 0 : index
    %c1_284 = arith.constant 1 : index
    %c0_285 = arith.constant 0 : index
    %c21_286 = arith.constant 21 : index
    %239 = vector.load %arg2[%c0_283, %c1_284, %c0_285, %c21_286] : memref<1x4x4x384xf32, #tpu.memory_space<vmem>>, vector<1x1x4x256xf32>
    %240 = vector.shape_cast %239 : vector<1x1x4x256xf32> to vector<4x256xf32>
    %cst_287 = arith.constant dense<0.000000e+00> : vector<4x256xf32>
    %241 = tpu.matmul %238, %240, %cst_287 {dimension_numbers = #tpu.dot_dimension_numbers<[1], [0], [0], [1], [0, 0, 1, 1], [], []>} : vector<4x4xf32>, vector<4x256xf32>, vector<4x256xf32> -> vector<4x256xf32>
    %242 = arith.addf %236, %241 : vector<4x256xf32>
    %c8_288 = arith.constant 8 : index
    %c0_289 = arith.constant 0 : index
    %c0_290 = arith.constant 0 : index
    %243 = vector.load %arg3[%c8_288, %c0_289, %c0_290] : memref<9x4x4xf32, #tpu.memory_space<vmem>>, vector<1x4x4xf32>
    %244 = vector.shape_cast %243 : vector<1x4x4xf32> to vector<4x4xf32>
    %c0_291 = arith.constant 0 : index
    %c0_292 = arith.constant 0 : index
    %c0_293 = arith.constant 0 : index
    %c22 = arith.constant 22 : index
    %245 = vector.load %arg2[%c0_291, %c0_292, %c0_293, %c22] : memref<1x4x4x384xf32, #tpu.memory_space<vmem>>, vector<1x1x4x256xf32>
    %246 = vector.shape_cast %245 : vector<1x1x4x256xf32> to vector<4x256xf32>
    %cst_294 = arith.constant dense<0.000000e+00> : vector<4x256xf32>
    %247 = tpu.matmul %244, %246, %cst_294 {dimension_numbers = #tpu.dot_dimension_numbers<[1], [0], [0], [1], [0, 0, 1, 1], [], []>} : vector<4x4xf32>, vector<4x256xf32>, vector<4x256xf32> -> vector<4x256xf32>
    %248 = arith.addf %242, %247 : vector<4x256xf32>
    %249 = vector.broadcast %0 : vector<4x1xf32> to vector<4x256xf32>
    %250 = arith.addf %248, %249 : vector<4x256xf32>
    %cst_295 = arith.constant 0.000000e+00 : f32
    %251 = vector.broadcast %cst_295 : f32 to vector<4x256xf32>
    %252 = arith.cmpf ogt, %250, %251 : vector<4x256xf32>
    %cst_296 = arith.constant 0.00999999977 : f32
    %253 = vector.broadcast %cst_296 : f32 to vector<4x256xf32>
    %254 = arith.mulf %253, %250 : vector<4x256xf32>
    %255 = arith.select %252, %250, %254 : vector<4x256xi1>, vector<4x256xf32>
    %c3_297 = arith.constant 3 : index
    %c0_298 = arith.constant 0 : index
    %c0_299 = arith.constant 0 : index
    %256 = vector.load %arg8[%c3_297, %c0_298, %c0_299] : memref<4x1x256xf32, #tpu.memory_space<vmem>>, vector<1x1x256xf32>
    %257 = vector.shape_cast %256 : vector<1x1x256xf32> to vector<1x256xf32>
    %258 = vector.broadcast %257 : vector<1x256xf32> to vector<4x256xf32>
    %259 = arith.mulf %255, %258 : vector<4x256xf32>
    %c0_300 = arith.constant 0 : index
    %c0_301 = arith.constant 0 : index
    %260 = vector.load %arg13[%c0_300, %c0_301] : memref<4x256xf32, #tpu.memory_space<vmem>>, vector<4x256xf32>
    tpu.vector_store %arg13[%c0_300, %c0_301], %259 {strides = array<i32>} : memref<4x256xf32, #tpu.memory_space<vmem>>, vector<4x256xf32>,
    %c0_302 = arith.constant 0 : index
    %c0_303 = arith.constant 0 : index
    %c0_304 = arith.constant 0 : index
    %261 = vector.load %arg5[%c0_302, %c0_303, %c0_304] : memref<9x16x4xf32, #tpu.memory_space<vmem>>, vector<1x16x4xf32>
    %262 = vector.shape_cast %261 : vector<1x16x4xf32> to vector<16x4xf32>
    %c0_305 = arith.constant 0 : index
    %c0_306 = arith.constant 0 : index
    %263 = vector.load %arg13[%c0_305, %c0_306] : memref<4x256xf32, #tpu.memory_space<vmem>>, vector<4x128xf32>
    %cst_307 = arith.constant dense<0.000000e+00> : vector<16x128xf32>
    %264 = tpu.matmul %262, %263, %cst_307 {dimension_numbers = #tpu.dot_dimension_numbers<[1], [0], [0], [1], [0, 0, 1, 1], [], []>} : vector<16x4xf32>, vector<4x128xf32>, vector<16x128xf32> -> vector<16x128xf32>
    %c0_308 = arith.constant 0 : index
    %c0_309 = arith.constant 0 : index
    %c0_310 = arith.constant 0 : index
    %265 = vector.load %arg6[%c0_308, %c0_309, %c0_310] : memref<9x16x4xf32, #tpu.memory_space<vmem>>, vector<1x16x4xf32>
    %266 = vector.shape_cast %265 : vector<1x16x4xf32> to vector<16x4xf32>
    %c0_311 = arith.constant 0 : index
    %c3_312 = arith.constant 3 : index
    %c0_313 = arith.constant 0 : index
    %c11_314 = arith.constant 11 : index
    %267 = vector.load %arg2[%c0_311, %c3_312, %c0_313, %c11_314] : memref<1x4x4x384xf32, #tpu.memory_space<vmem>>, vector<1x1x4x128xf32>
    %268 = vector.shape_cast %267 : vector<1x1x4x128xf32> to vector<4x128xf32>
    %cst_315 = arith.constant dense<0.000000e+00> : vector<16x128xf32>
    %269 = tpu.matmul %266, %268, %cst_315 {dimension_numbers = #tpu.dot_dimension_numbers<[1], [0], [0], [1], [0, 0, 1, 1], [], []>} : vector<16x4xf32>, vector<4x128xf32>, vector<16x128xf32> -> vector<16x128xf32>
    %270 = arith.addf %264, %269 : vector<16x128xf32>
    %c1_316 = arith.constant 1 : index
    %c0_317 = arith.constant 0 : index
    %c0_318 = arith.constant 0 : index
    %271 = vector.load %arg5[%c1_316, %c0_317, %c0_318] : memref<9x16x4xf32, #tpu.memory_space<vmem>>, vector<1x16x4xf32>
    %272 = vector.shape_cast %271 : vector<1x16x4xf32> to vector<16x4xf32>
    %c0_319 = arith.constant 0 : index
    %c1_320 = arith.constant 1 : index
    %273 = vector.load %arg12[%c0_319, %c1_320] : memref<4x256xf32, #tpu.memory_space<vmem>>, vector<4x128xf32>
    %cst_321 = arith.constant dense<0.000000e+00> : vector<16x128xf32>
    %274 = tpu.matmul %272, %273, %cst_321 {dimension_numbers = #tpu.dot_dimension_numbers<[1], [0], [0], [1], [0, 0, 1, 1], [], []>} : vector<16x4xf32>, vector<4x128xf32>, vector<16x128xf32> -> vector<16x128xf32>
    %c1_322 = arith.constant 1 : index
    %c0_323 = arith.constant 0 : index
    %c0_324 = arith.constant 0 : index
    %275 = vector.load %arg6[%c1_322, %c0_323, %c0_324] : memref<9x16x4xf32, #tpu.memory_space<vmem>>, vector<1x16x4xf32>
    %276 = vector.shape_cast %275 : vector<1x16x4xf32> to vector<16x4xf32>
    %c0_325 = arith.constant 0 : index
    %c2_326 = arith.constant 2 : index
    %c0_327 = arith.constant 0 : index
    %c12_328 = arith.constant 12 : index
    %277 = vector.load %arg2[%c0_325, %c2_326, %c0_327, %c12_328] : memref<1x4x4x384xf32, #tpu.memory_space<vmem>>, vector<1x1x4x128xf32>
    %278 = vector.shape_cast %277 : vector<1x1x4x128xf32> to vector<4x128xf32>
    %cst_329 = arith.constant dense<0.000000e+00> : vector<16x128xf32>
    %279 = tpu.matmul %276, %278, %cst_329 {dimension_numbers = #tpu.dot_dimension_numbers<[1], [0], [0], [1], [0, 0, 1, 1], [], []>} : vector<16x4xf32>, vector<4x128xf32>, vector<16x128xf32> -> vector<16x128xf32>
    %280 = arith.addf %274, %279 : vector<16x128xf32>
    %281 = arith.addf %270, %280 : vector<16x128xf32>
    %c2_330 = arith.constant 2 : index
    %c0_331 = arith.constant 0 : index
    %c0_332 = arith.constant 0 : index
    %282 = vector.load %arg5[%c2_330, %c0_331, %c0_332] : memref<9x16x4xf32, #tpu.memory_space<vmem>>, vector<1x16x4xf32>
    %283 = vector.shape_cast %282 : vector<1x16x4xf32> to vector<16x4xf32>
    %c0_333 = arith.constant 0 : index
    %c1_334 = arith.constant 1 : index
    %284 = vector.load %arg13[%c0_333, %c1_334] : memref<4x256xf32, #tpu.memory_space<vmem>>, vector<4x128xf32>
    %cst_335 = arith.constant dense<0.000000e+00> : vector<16x128xf32>
    %285 = tpu.matmul %283, %284, %cst_335 {dimension_numbers = #tpu.dot_dimension_numbers<[1], [0], [0], [1], [0, 0, 1, 1], [], []>} : vector<16x4xf32>, vector<4x128xf32>, vector<16x128xf32> -> vector<16x128xf32>
    %c2_336 = arith.constant 2 : index
    %c0_337 = arith.constant 0 : index
    %c0_338 = arith.constant 0 : index
    %286 = vector.load %arg6[%c2_336, %c0_337, %c0_338] : memref<9x16x4xf32, #tpu.memory_space<vmem>>, vector<1x16x4xf32>
    %287 = vector.shape_cast %286 : vector<1x16x4xf32> to vector<16x4xf32>
    %c0_339 = arith.constant 0 : index
    %c3_340 = arith.constant 3 : index
    %c0_341 = arith.constant 0 : index
    %c12_342 = arith.constant 12 : index
    %288 = vector.load %arg2[%c0_339, %c3_340, %c0_341, %c12_342] : memref<1x4x4x384xf32, #tpu.memory_space<vmem>>, vector<1x1x4x128xf32>
    %289 = vector.shape_cast %288 : vector<1x1x4x128xf32> to vector<4x128xf32>
    %cst_343 = arith.constant dense<0.000000e+00> : vector<16x128xf32>
    %290 = tpu.matmul %287, %289, %cst_343 {dimension_numbers = #tpu.dot_dimension_numbers<[1], [0], [0], [1], [0, 0, 1, 1], [], []>} : vector<16x4xf32>, vector<4x128xf32>, vector<16x128xf32> -> vector<16x128xf32>
    %291 = arith.addf %285, %290 : vector<16x128xf32>
    %292 = arith.addf %281, %291 : vector<16x128xf32>
    %c3_344 = arith.constant 3 : index
    %c0_345 = arith.constant 0 : index
    %c0_346 = arith.constant 0 : index
    %293 = vector.load %arg5[%c3_344, %c0_345, %c0_346] : memref<9x16x4xf32, #tpu.memory_space<vmem>>, vector<1x16x4xf32>
    %294 = vector.shape_cast %293 : vector<1x16x4xf32> to vector<16x4xf32>
    %c0_347 = arith.constant 0 : index
    %c10_348 = arith.constant 10 : index
    %295 = vector.load %arg11[%c0_347, %c10_348] : memref<4x256xf32, #tpu.memory_space<vmem>>, vector<4x128xf32>
    %cst_349 = arith.constant dense<0.000000e+00> : vector<16x128xf32>
    %296 = tpu.matmul %294, %295, %cst_349 {dimension_numbers = #tpu.dot_dimension_numbers<[1], [0], [0], [1], [0, 0, 1, 1], [], []>} : vector<16x4xf32>, vector<4x128xf32>, vector<16x128xf32> -> vector<16x128xf32>
    %c3_350 = arith.constant 3 : index
    %c0_351 = arith.constant 0 : index
    %c0_352 = arith.constant 0 : index
    %297 = vector.load %arg6[%c3_350, %c0_351, %c0_352] : memref<9x16x4xf32, #tpu.memory_space<vmem>>, vector<1x16x4xf32>
    %298 = vector.shape_cast %297 : vector<1x16x4xf32> to vector<16x4xf32>
    %c0_353 = arith.constant 0 : index
    %c1_354 = arith.constant 1 : index
    %c0_355 = arith.constant 0 : index
    %c21_356 = arith.constant 21 : index
    %299 = vector.load %arg2[%c0_353, %c1_354, %c0_355, %c21_356] : memref<1x4x4x384xf32, #tpu.memory_space<vmem>>, vector<1x1x4x128xf32>
    %300 = vector.shape_cast %299 : vector<1x1x4x128xf32> to vector<4x128xf32>
    %cst_357 = arith.constant dense<0.000000e+00> : vector<16x128xf32>
    %301 = tpu.matmul %298, %300, %cst_357 {dimension_numbers = #tpu.dot_dimension_numbers<[1], [0], [0], [1], [0, 0, 1, 1], [], []>} : vector<16x4xf32>, vector<4x128xf32>, vector<16x128xf32> -> vector<16x128xf32>
    %302 = arith.addf %296, %301 : vector<16x128xf32>
    %303 = arith.addf %292, %302 : vector<16x128xf32>
    %c4_358 = arith.constant 4 : index
    %c0_359 = arith.constant 0 : index
    %c0_360 = arith.constant 0 : index
    %304 = vector.load %arg5[%c4_358, %c0_359, %c0_360] : memref<9x16x4xf32, #tpu.memory_space<vmem>>, vector<1x16x4xf32>
    %305 = vector.shape_cast %304 : vector<1x16x4xf32> to vector<16x4xf32>
    %c0_361 = arith.constant 0 : index
    %c11_362 = arith.constant 11 : index
    %306 = vector.load %arg10[%c0_361, %c11_362] : memref<4x256xf32, #tpu.memory_space<vmem>>, vector<4x128xf32>
    %cst_363 = arith.constant dense<0.000000e+00> : vector<16x128xf32>
    %307 = tpu.matmul %305, %306, %cst_363 {dimension_numbers = #tpu.dot_dimension_numbers<[1], [0], [0], [1], [0, 0, 1, 1], [], []>} : vector<16x4xf32>, vector<4x128xf32>, vector<16x128xf32> -> vector<16x128xf32>
    %c4_364 = arith.constant 4 : index
    %c0_365 = arith.constant 0 : index
    %c0_366 = arith.constant 0 : index
    %308 = vector.load %arg6[%c4_364, %c0_365, %c0_366] : memref<9x16x4xf32, #tpu.memory_space<vmem>>, vector<1x16x4xf32>
    %309 = vector.shape_cast %308 : vector<1x16x4xf32> to vector<16x4xf32>
    %c0_367 = arith.constant 0 : index
    %c0_368 = arith.constant 0 : index
    %c0_369 = arith.constant 0 : index
    %c22_370 = arith.constant 22 : index
    %310 = vector.load %arg2[%c0_367, %c0_368, %c0_369, %c22_370] : memref<1x4x4x384xf32, #tpu.memory_space<vmem>>, vector<1x1x4x128xf32>
    %311 = vector.shape_cast %310 : vector<1x1x4x128xf32> to vector<4x128xf32>
    %cst_371 = arith.constant dense<0.000000e+00> : vector<16x128xf32>
    %312 = tpu.matmul %309, %311, %cst_371 {dimension_numbers = #tpu.dot_dimension_numbers<[1], [0], [0], [1], [0, 0, 1, 1], [], []>} : vector<16x4xf32>, vector<4x128xf32>, vector<16x128xf32> -> vector<16x128xf32>
    %313 = arith.addf %307, %312 : vector<16x128xf32>
    %314 = arith.addf %303, %313 : vector<16x128xf32>
    %c5_372 = arith.constant 5 : index
    %c0_373 = arith.constant 0 : index
    %c0_374 = arith.constant 0 : index
    %315 = vector.load %arg5[%c5_372, %c0_373, %c0_374] : memref<9x16x4xf32, #tpu.memory_space<vmem>>, vector<1x16x4xf32>
    %316 = vector.shape_cast %315 : vector<1x16x4xf32> to vector<16x4xf32>
    %c0_375 = arith.constant 0 : index
    %c11_376 = arith.constant 11 : index
    %317 = vector.load %arg11[%c0_375, %c11_376] : memref<4x256xf32, #tpu.memory_space<vmem>>, vector<4x128xf32>
    %cst_377 = arith.constant dense<0.000000e+00> : vector<16x128xf32>
    %318 = tpu.matmul %316, %317, %cst_377 {dimension_numbers = #tpu.dot_dimension_numbers<[1], [0], [0], [1], [0, 0, 1, 1], [], []>} : vector<16x4xf32>, vector<4x128xf32>, vector<16x128xf32> -> vector<16x128xf32>
    %c5_378 = arith.constant 5 : index
    %c0_379 = arith.constant 0 : index
    %c0_380 = arith.constant 0 : index
    %319 = vector.load %arg6[%c5_378, %c0_379, %c0_380] : memref<9x16x4xf32, #tpu.memory_space<vmem>>, vector<1x16x4xf32>
    %320 = vector.shape_cast %319 : vector<1x16x4xf32> to vector<16x4xf32>
    %c0_381 = arith.constant 0 : index
    %c1_382 = arith.constant 1 : index
    %c0_383 = arith.constant 0 : index
    %c22_384 = arith.constant 22 : index
    %321 = vector.load %arg2[%c0_381, %c1_382, %c0_383, %c22_384] : memref<1x4x4x384xf32, #tpu.memory_space<vmem>>, vector<1x1x4x128xf32>
    %322 = vector.shape_cast %321 : vector<1x1x4x128xf32> to vector<4x128xf32>
    %cst_385 = arith.constant dense<0.000000e+00> : vector<16x128xf32>
    %323 = tpu.matmul %320, %322, %cst_385 {dimension_numbers = #tpu.dot_dimension_numbers<[1], [0], [0], [1], [0, 0, 1, 1], [], []>} : vector<16x4xf32>, vector<4x128xf32>, vector<16x128xf32> -> vector<16x128xf32>
    %324 = arith.addf %318, %323 : vector<16x128xf32>
    %325 = arith.addf %314, %324 : vector<16x128xf32>
    %c6_386 = arith.constant 6 : index
    %c0_387 = arith.constant 0 : index
    %c0_388 = arith.constant 0 : index
    %326 = vector.load %arg5[%c6_386, %c0_387, %c0_388] : memref<9x16x4xf32, #tpu.memory_space<vmem>>, vector<1x16x4xf32>
    %327 = vector.shape_cast %326 : vector<1x16x4xf32> to vector<16x4xf32>
    %c0_389 = arith.constant 0 : index
    %c10_390 = arith.constant 10 : index
    %328 = vector.load %arg13[%c0_389, %c10_390] : memref<4x256xf32, #tpu.memory_space<vmem>>, vector<4x128xf32>
    %cst_391 = arith.constant dense<0.000000e+00> : vector<16x128xf32>
    %329 = tpu.matmul %327, %328, %cst_391 {dimension_numbers = #tpu.dot_dimension_numbers<[1], [0], [0], [1], [0, 0, 1, 1], [], []>} : vector<16x4xf32>, vector<4x128xf32>, vector<16x128xf32> -> vector<16x128xf32>
    %c6_392 = arith.constant 6 : index
    %c0_393 = arith.constant 0 : index
    %c0_394 = arith.constant 0 : index
    %330 = vector.load %arg6[%c6_392, %c0_393, %c0_394] : memref<9x16x4xf32, #tpu.memory_space<vmem>>, vector<1x16x4xf32>
    %331 = vector.shape_cast %330 : vector<1x16x4xf32> to vector<16x4xf32>
    %c0_395 = arith.constant 0 : index
    %c3_396 = arith.constant 3 : index
    %c0_397 = arith.constant 0 : index
    %c21_398 = arith.constant 21 : index
    %332 = vector.load %arg2[%c0_395, %c3_396, %c0_397, %c21_398] : memref<1x4x4x384xf32, #tpu.memory_space<vmem>>, vector<1x1x4x128xf32>
    %333 = vector.shape_cast %332 : vector<1x1x4x128xf32> to vector<4x128xf32>
    %cst_399 = arith.constant dense<0.000000e+00> : vector<16x128xf32>
    %334 = tpu.matmul %331, %333, %cst_399 {dimension_numbers = #tpu.dot_dimension_numbers<[1], [0], [0], [1], [0, 0, 1, 1], [], []>} : vector<16x4xf32>, vector<4x128xf32>, vector<16x128xf32> -> vector<16x128xf32>
    %335 = arith.addf %329, %334 : vector<16x128xf32>
    %336 = arith.addf %325, %335 : vector<16x128xf32>
    %c7_400 = arith.constant 7 : index
    %c0_401 = arith.constant 0 : index
    %c0_402 = arith.constant 0 : index
    %337 = vector.load %arg5[%c7_400, %c0_401, %c0_402] : memref<9x16x4xf32, #tpu.memory_space<vmem>>, vector<1x16x4xf32>
    %338 = vector.shape_cast %337 : vector<1x16x4xf32> to vector<16x4xf32>
    %c0_403 = arith.constant 0 : index
    %c11_404 = arith.constant 11 : index
    %339 = vector.load %arg12[%c0_403, %c11_404] : memref<4x256xf32, #tpu.memory_space<vmem>>, vector<4x128xf32>
    %cst_405 = arith.constant dense<0.000000e+00> : vector<16x128xf32>
    %340 = tpu.matmul %338, %339, %cst_405 {dimension_numbers = #tpu.dot_dimension_numbers<[1], [0], [0], [1], [0, 0, 1, 1], [], []>} : vector<16x4xf32>, vector<4x128xf32>, vector<16x128xf32> -> vector<16x128xf32>
    %c7_406 = arith.constant 7 : index
    %c0_407 = arith.constant 0 : index
    %c0_408 = arith.constant 0 : index
    %341 = vector.load %arg6[%c7_406, %c0_407, %c0_408] : memref<9x16x4xf32, #tpu.memory_space<vmem>>, vector<1x16x4xf32>
    %342 = vector.shape_cast %341 : vector<1x16x4xf32> to vector<16x4xf32>
    %c0_409 = arith.constant 0 : index
    %c2_410 = arith.constant 2 : index
    %c0_411 = arith.constant 0 : index
    %c22_412 = arith.constant 22 : index
    %343 = vector.load %arg2[%c0_409, %c2_410, %c0_411, %c22_412] : memref<1x4x4x384xf32, #tpu.memory_space<vmem>>, vector<1x1x4x128xf32>
    %344 = vector.shape_cast %343 : vector<1x1x4x128xf32> to vector<4x128xf32>
    %cst_413 = arith.constant dense<0.000000e+00> : vector<16x128xf32>
    %345 = tpu.matmul %342, %344, %cst_413 {dimension_numbers = #tpu.dot_dimension_numbers<[1], [0], [0], [1], [0, 0, 1, 1], [], []>} : vector<16x4xf32>, vector<4x128xf32>, vector<16x128xf32> -> vector<16x128xf32>
    %346 = arith.addf %340, %345 : vector<16x128xf32>
    %347 = arith.addf %336, %346 : vector<16x128xf32>
    %c8_414 = arith.constant 8 : index
    %c0_415 = arith.constant 0 : index
    %c0_416 = arith.constant 0 : index
    %348 = vector.load %arg5[%c8_414, %c0_415, %c0_416] : memref<9x16x4xf32, #tpu.memory_space<vmem>>, vector<1x16x4xf32>
    %349 = vector.shape_cast %348 : vector<1x16x4xf32> to vector<16x4xf32>
    %c0_417 = arith.constant 0 : index
    %c11_418 = arith.constant 11 : index
    %350 = vector.load %arg13[%c0_417, %c11_418] : memref<4x256xf32, #tpu.memory_space<vmem>>, vector<4x128xf32>
    %cst_419 = arith.constant dense<0.000000e+00> : vector<16x128xf32>
    %351 = tpu.matmul %349, %350, %cst_419 {dimension_numbers = #tpu.dot_dimension_numbers<[1], [0], [0], [1], [0, 0, 1, 1], [], []>} : vector<16x4xf32>, vector<4x128xf32>, vector<16x128xf32> -> vector<16x128xf32>
    %c8_420 = arith.constant 8 : index
    %c0_421 = arith.constant 0 : index
    %c0_422 = arith.constant 0 : index
    %352 = vector.load %arg6[%c8_420, %c0_421, %c0_422] : memref<9x16x4xf32, #tpu.memory_space<vmem>>, vector<1x16x4xf32>
    %353 = vector.shape_cast %352 : vector<1x16x4xf32> to vector<16x4xf32>
    %c0_423 = arith.constant 0 : index
    %c3_424 = arith.constant 3 : index
    %c0_425 = arith.constant 0 : index
    %c22_426 = arith.constant 22 : index
    %354 = vector.load %arg2[%c0_423, %c3_424, %c0_425, %c22_426] : memref<1x4x4x384xf32, #tpu.memory_space<vmem>>, vector<1x1x4x128xf32>
    %355 = vector.shape_cast %354 : vector<1x1x4x128xf32> to vector<4x128xf32>
    %cst_427 = arith.constant dense<0.000000e+00> : vector<16x128xf32>
    %356 = tpu.matmul %353, %355, %cst_427 {dimension_numbers = #tpu.dot_dimension_numbers<[1], [0], [0], [1], [0, 0, 1, 1], [], []>} : vector<16x4xf32>, vector<4x128xf32>, vector<16x128xf32> -> vector<16x128xf32>
    %357 = arith.addf %351, %356 : vector<16x128xf32>
    %358 = arith.addf %347, %357 : vector<16x128xf32>
    %c0_428 = arith.constant 0 : index
    %c0_429 = arith.constant 0 : index
    %359 = vector.load %arg7[%c0_428, %c0_429] : memref<16x1xf32, #tpu.memory_space<vmem>>, vector<16x1xf32>
    %360 = vector.broadcast %359 : vector<16x1xf32> to vector<16x128xf32>
    %361 = arith.addf %358, %360 : vector<16x128xf32>
    %cst_430 = arith.constant 0.000000e+00 : f32
    %362 = vector.broadcast %cst_430 : f32 to vector<16x128xf32>
    %363 = arith.cmpf ogt, %361, %362 : vector<16x128xf32>
    %cst_431 = arith.constant 0.00999999977 : f32
    %364 = vector.broadcast %cst_431 : f32 to vector<16x128xf32>
    %365 = arith.mulf %364, %361 : vector<16x128xf32>
    %366 = arith.select %363, %361, %365 : vector<16x128xi1>, vector<16x128xf32>
    %c0_432 = arith.constant 0 : index
    %c0_433 = arith.constant 0 : index
    %c0_434 = arith.constant 0 : index
    %367 = vector.load %arg9[%c0_432, %c0_433, %c0_434] : memref<1x16x128xf32, #tpu.memory_space<vmem>>, vector<1x16x128xf32>
    %368 = vector.shape_cast %367 : vector<1x16x128xf32> to vector<16x128xf32>
    %369 = vector.shape_cast %366 : vector<16x128xf32> to vector<1x16x128xf32>
    tpu.vector_store %arg9[%c0_432, %c0_433, %c0_434], %369 {strides = array<i32>} : memref<1x16x128xf32, #tpu.memory_space<vmem>>, vector<1x16x128xf32>,
    return
  }
  func.func @transform_0(%arg0: i32, %arg1: i32) -> (i32, i32, i32, i32) {
    %c0_i32 = arith.constant 0 : i32
    %c0_i32_0 = arith.constant 0 : i32
    %c0_i32_1 = arith.constant 0 : i32
    %c0_i32_2 = arith.constant 0 : i32
    return %arg0, %c0_i32, %c0_i32_0, %c0_i32_1 : i32, i32, i32, i32
  }
  func.func @transform_1(%arg0: i32, %arg1: i32) -> (i32, i32, i32) {
    %c0_i32 = arith.constant 0 : i32
    %c0_i32_0 = arith.constant 0 : i32
    %c0_i32_1 = arith.constant 0 : i32
    %c0_i32_2 = arith.constant 0 : i32
    return %c0_i32, %c0_i32_0, %c0_i32_1 : i32, i32, i32
  }
  func.func @transform_2(%arg0: i32, %arg1: i32) -> (i32, i32) {
    %c0_i32 = arith.constant 0 : i32
    %c0_i32_0 = arith.constant 0 : i32
    %c0_i32_1 = arith.constant 0 : i32
    return %c0_i32, %c0_i32_0 : i32, i32
  }
  func.func @transform_3(%arg0: i32, %arg1: i32) -> (i32, i32, i32) {
    %c0_i32 = arith.constant 0 : i32
    %c0_i32_0 = arith.constant 0 : i32
    %c0_i32_1 = arith.constant 0 : i32
    return %c0_i32, %arg1, %c0_i32_0 : i32, i32, i32
  }
  func.func @transform_4(%arg0: i32, %arg1: i32) -> (i32, i32, i32) {
    %c0_i32 = arith.constant 0 : i32
    %c0_i32_0 = arith.constant 0 : i32
    %c0_i32_1 = arith.constant 0 : i32
    return %c0_i32, %arg1, %c0_i32_0 : i32, i32, i32
  }
  func.func @transform_5(%arg0: i32, %arg1: i32) -> (i32, i32) {
    %c0_i32 = arith.constant 0 : i32
    %c0_i32_0 = arith.constant 0 : i32
    return %arg1, %c0_i32 : i32, i32
  }
  func.func @transform_6(%arg0: i32, %arg1: i32) -> (i32, i32, i32) {
    %c0_i32 = arith.constant 0 : i32
    %c0_i32_0 = arith.constant 0 : i32
    %c0_i32_1 = arith.constant 0 : i32
    %c0_i32_2 = arith.constant 0 : i32
    return %c0_i32, %c0_i32_0, %c0_i32_1 : i32, i32, i32
  }
  func.func @transform_7(%arg0: i32, %arg1: i32) -> (i32, i32, i32) {
    %c0_i32 = arith.constant 0 : i32
    %c0_i32_0 = arith.constant 0 : i32
    return %arg0, %arg1, %c0_i32 : i32, i32, i32
  }
}

</mosaic_0001>

<bundles_post_ra>
// kernel: basic_conv_forward.1
= control target key start
LH: loop header
LB: loop body
LE: loop exit
PB: predicated region body
PF: predicated region fallthrough
CT: control target
= control target key end

     0   :  { %s4300_s24 = smov 0   ;;  %s4302_s25 = smov 0   ;;  %s5133_s0 = inlined_call_operand.vmem [shape: f32[2,4,4,384], index: 0, kind: input, shape index: {}]   ;;  %s5134_s1 = inlined_call_operand.vmem [shape: f32[9,4,4], index: 1, kind: input, shape index: {}]   ;;  %s5135_s2 = inlined_call_operand.vmem [shape: f32[4,1], index: 2, kind: input, shape index: {}]   ;;  %s5136_s3 = inlined_call_operand.vmem [shape: f32[9,16,4], index: 3, kind: input, shape index: {}]   ;;  %s5137_s4 = inlined_call_operand.vmem [shape: f32[9,16,4], index: 4, kind: input, shape index: {}]   ;;  %s5138_s5 = inlined_call_operand.vmem [shape: f32[16,1], index: 5, kind: input, shape index: {}]   ;;  %s5139_s6 = inlined_call_operand.vmem [shape: f32[4,1,256], index: 6, kind: input, shape index: {}]   ;;  %s5140_s7 = inlined_call_operand.vmem [shape: f32[2,16,128], index: 7, kind: output, shape index: {}]  }
   0x1   :  { %s4304_s26 = smov 0  }
   0x2 LB: > { %s29_s27 = sadd.s32 1, %s4245_s25  ;;  %p3858_p0 = scmp.ge.s32.totalorder %s4249_s26, 1  ;;  %s4249_s26 = sphi %s4304_s26, %s17_s26   ;;  %s4245_s25 = sphi %s4302_s25, %s5142_s25   ;;  %s4241_s24 = sphi %s4300_s24, %s5141_s24  }
   0x3   : > { %p31_p1 = scmp.ge.s32.totalorder %s29_s27, 2  ;;  %p284_p2 = scmp.lt.s32.totalorder %s4249_s26, 3 }
   0x5   : > { %s5144_s27 = smov (%p31_p1, %s29_s27), 0  ;;  %p285_p3 = pnand %p3858_p0, %p284_p2 }
   0x6   : > { %p335_p4 = scmp.lt.s32.totalorder (!%p285_p3), %s4241_s24, 1  ;;  %s4251_s9 = smov (!%p285_p3), 127  }
   0x7   : > { %288 = sbr.rel (%p285_p3) target bundleno = 937 (0x3a9), region = 48  ;;  %s4252_s10 = smov (!%p285_p3), 118  }
   0x8   : > { %s4253_s11 = smov (!%p285_p3), 117   ;;  %s4254_s12 = smov (!%p285_p3), 126  }
   0x9   : > { %s4255_s13 = smov (!%p285_p3), 116   ;;  %s4256_s18 = smov (!%p285_p3), 108  }
   0xa   : > { %s4257_s21 = smov (!%p285_p3), 107  }
   0xc   : > { %s5146_s24 = smov (!%p335_p4, %s4241_s24), 1  ;;  %vm391_vm0 = vcmask 1039360   ;;  %vm398_vm1 = vcmask 1043456   ;;  %vm394_vm2 = vcmask 31744   ;;  %vm582_vm3 = vcmask 965632  }
   0xd   : > { %s4191_s28 = smul.u32 48, %s5146_s24  ;;  %vm652_vm4 = vcmask 957440   ;;  %vm1156_vm5 = vcmask 1031168   ;;  %vm1361_vm6 = vcmask 949248   ;;  %vm2061_vm7 = vcmask 883712  }
   0xe   : > { %vm2130_vm8 = vcmask 875520   ;;  %vm2830_vm9 = vcmask 867328  }
   0xf   : > { %s4324_s8 = scalar_lea.vmem %s5133_s0, %s4191_s28 }
  0x10   : > { %v4327_v0 = vld [vmem:[%s4324_s8 + $0x18] sm:$0xff]  ;;  %v3865_v1 = vld [vmem:[%s4324_s8 + $0x20] sm:$0xf]  ;;  %v4332_v2 = vld [vmem:[%s4324_s8 + $0x24] sm:$0xff] }
  0x11   : > { %379 = vst [vmem:[#allocation1] ss:$2 sm:$0xff] %v4327_v0  ;;  %v3876_v3 = vld [vmem:[%s4324_s8 + $0x2c] sm:$0xf]  ;;  %v3883_v7 = vld [vmem:[%s4324_s8 + $0x14] sm:$0xf] }
  0x12   : > { %381 = vst [vmem:[#allocation1 + $0x10] ss:$2 sm:$0xff] %v3865_v1  ;;  %v4347_v11 = vld [vmem:[%s4324_s8 + $0xc] sm:$0xff]  ;;  %v637_v12 = vld [vmem:[%s4324_s8 + $0x8] sm:$0xf]  ;;  %v4354_v16 = vld [vmem:[%s4324_s8] sm:$0xff] }
  0x13   : > { %v3895_v17 = vld [vmem:[%s4324_s8 + $0x14] sm:$0xf]  ;;  %v3902_v21 = vld [vmem:[%s4324_s8 + $0x2c] sm:$0xf]  ;;  %v3909_v25 = vld [vmem:[%s4324_s8 + $0x20] sm:$0xf] }
  0x14   : > { %v3916_v29 = vld [vmem:[%s4324_s8 + $0x2c] sm:$0xf]  ;;  %v3922_v37 = vld [vmem:[%s4324_s8 + $0x20] sm:$0xf]  ;;  %v1210_v45 = vld [vmem:[%s4324_s8 + $0x8] sm:$0xf] }
  0x15   : > { %v3925_v33 = vld [vmem:[%s4324_s8 + $0x2c] sm:$0xf]  ;;  %v3936_v41 = vld [vmem:[%s4324_s8 + $0x20] sm:$0xf]  ;;  %v3948_v49 = vld [vmem:[%s4324_s8 + $0x14] sm:$0xf] }
  0x16   : > { %v1346_v53 = vld [vmem:[%s4324_s8 + $0x8] sm:$0xf]  ;;  %v3960_v57 = vld [vmem:[%s4324_s8 + $0x20] sm:$0xf]  ;;  %v3967_v62 = vld [vmem:[%s4324_s8 + $0x2c] sm:$0xf] }
  0x18   : > { %v383_v4 = vld.sshfl [vmem:[#allocation1 + $0x8] sm:$0xff pattern:$0x75316420]  ;;  %v382_v5 = vld.sshfl [vmem:[#allocation1] sm:$0xff pattern:$0x75316420] }
  0x19   : > { %387 = vrot.lane.b32.xlu0 %v383_v4, %s4251_s9  ;;  %385 = vrot.lane.b32.xlu1 %v382_v5, %s4251_s9  ;;  %v384_v6 = vld.sshfl [vmem:[#allocation1 + $0x10] sm:$0xff pattern:$0x75316420]  ;;  %444 = vst [vmem:[#allocation1] ss:$2 sm:$0xff] %v4332_v2 }
  0x1a   : > { %502 = vst [vmem:[#allocation1 + $0x10] ss:$2 sm:$0xff] %v3876_v3 }
  0x20   : > { %v4339_v8 = vld.sshfl [vmem:[#allocation1] sm:$0xff pattern:$0x75316420]  ;;  %v4341_v9 = vld.sshfl [vmem:[#allocation1 + $0x8] sm:$0xff pattern:$0x75316420] }
  0x21   : > { %389 = vrot.lane.b32.xlu0 %v384_v6, %s4251_s9  ;;  %v505_v10 = vld.sshfl [vmem:[#allocation1 + $0x10] sm:$0xff pattern:$0x75316420]  ;;  %500 = vst [vmem:[#allocation1] ss:$2 sm:$0xff] %v4332_v2 }
  0x22   : > { %510 = vrot.lane.b32.xlu1 %v505_v10, %s4251_s9  ;;  %572 = vst [vmem:[#allocation1 + $0x10] ss:$2 sm:$0xff] %v3883_v7  ;;  %v3863_v10 = vld [vmem:[%s5134_s1 + $0x4] sm:$0xf] }
  0x28   : > { %v504_v13 = vld.sshfl [vmem:[#allocation1 + $0x8] sm:$0xff pattern:$0x75316420]  ;;  %v503_v14 = vld.sshfl [vmem:[#allocation1] sm:$0xff pattern:$0x75316420] }
  0x29   : > { %508 = vrot.lane.b32.xlu0 %v504_v13, %s4251_s9  ;;  %570 = vst [vmem:[#allocation1] ss:$2 sm:$0xff] %v4347_v11  ;;  %v575_v15 = vld.sshfl [vmem:[#allocation1 + $0x10] sm:$0xff pattern:$0x75316420] }
  0x2a   : > { %580 = vrot.lane.b32.xlu2 %v575_v15, %s4252_s10  ;;  %642 = vst [vmem:[#allocation1 + $0x10] ss:$2 sm:$0xff] %v637_v12  ;;  %v3974_v12 = vld [vmem:[%s4324_s8 + $0x20] sm:$0xf] }
  0x30   : > { %v574_v18 = vld.sshfl [vmem:[#allocation1 + $0x8] sm:$0xff pattern:$0x75316420]  ;;  %v573_v19 = vld.sshfl [vmem:[#allocation1] sm:$0xff pattern:$0x75316420] }
  0x31   : > { %578 = vrot.lane.b32.xlu1 %v574_v18, %s4252_s10  ;;  %v645_v20 = vld.sshfl [vmem:[#allocation1 + $0x10] sm:$0xff pattern:$0x75316420]  ;;  %640 = vst [vmem:[#allocation1] ss:$2 sm:$0xff] %v4354_v16 }
  0x32   : > { %506 = vrot.lane.b32.xlu2 %v503_v14, %s4251_s9  ;;  %712 = vst [vmem:[#allocation1 + $0x10] ss:$2 sm:$0xff] %v3895_v17 }
  0x38   : > { %v644_v22 = vld.sshfl [vmem:[#allocation1 + $0x8] sm:$0xff pattern:$0x75316420]  ;;  %v643_v23 = vld.sshfl [vmem:[#allocation1] sm:$0xff pattern:$0x75316420] }
  0x39   : > { %650 = vrot.lane.b32.xlu1 %v645_v20, %s4253_s11  ;;  %648 = vrot.lane.b32.xlu0 %v644_v22, %s4253_s11  ;;  %v715_v24 = vld.sshfl [vmem:[#allocation1 + $0x10] sm:$0xff pattern:$0x75316420]  ;;  %710 = vst [vmem:[#allocation1] ss:$2 sm:$0xff] %v4347_v11 }
  0x3a   : > { %781 = vst [vmem:[#allocation1 + $0x10] ss:$2 sm:$0xff] %v3902_v21  ;;  %576 = vrot.lane.b32.xlu2 %v573_v19, %s4252_s10  ;;  %v1645_v19 = vld [vmem:[%s4324_s8 + $0x8] sm:$0xf] }
  0x40   : > { %v714_v26 = vld.sshfl [vmem:[#allocation1 + $0x8] sm:$0xff pattern:$0x75316420]  ;;  %v713_v27 = vld.sshfl [vmem:[#allocation1] sm:$0xff pattern:$0x75316420] }
  0x41   : > { %720 = vrot.lane.b32.xlu1 %v715_v24, %s4253_s11  ;;  %718 = vrot.lane.b32.xlu0 %v714_v26, %s4253_s11  ;;  %v784_v28 = vld.sshfl [vmem:[#allocation1 + $0x10] sm:$0xff pattern:$0x75316420]  ;;  %779 = vst [vmem:[#allocation1] ss:$2 sm:$0xff] %v4332_v2 }
  0x42   : > { %850 = vst [vmem:[#allocation1 + $0x10] ss:$2 sm:$0xff] %v3909_v25  ;;  %646 = vrot.lane.b32.xlu2 %v643_v23, %s4253_s11 }
  0x48   : > { %v783_v30 = vld.sshfl [vmem:[#allocation1 + $0x8] sm:$0xff pattern:$0x75316420]  ;;  %v782_v31 = vld.sshfl [vmem:[#allocation1] sm:$0xff pattern:$0x75316420] }
  0x49   : > { %789 = vrot.lane.b32.xlu1 %v784_v28, %s4252_s10  ;;  %787 = vrot.lane.b32.xlu0 %v783_v30, %s4252_s10  ;;  %v853_v32 = vld.sshfl [vmem:[#allocation1 + $0x10] sm:$0xff pattern:$0x75316420]  ;;  %848 = vst [vmem:[#allocation1] ss:$2 sm:$0xff] %v4327_v0 }
  0x4a   : > { %919 = vst [vmem:[#allocation1 + $0x10] ss:$2 sm:$0xff] %v3916_v29  ;;  %716 = vrot.lane.b32.xlu2 %v713_v27, %s4253_s11  ;;  %v369_v27 = vld [vmem:[%s5134_s1] sm:$0xf]  ;;  %v3981_v28 = vld [vmem:[%s4324_s8 + $0x14] sm:$0xf] }
  0x50   : > { %v852_v34 = vld.sshfl [vmem:[#allocation1 + $0x8] sm:$0xff pattern:$0x75316420]  ;;  %v851_v35 = vld.sshfl [vmem:[#allocation1] sm:$0xff pattern:$0x75316420] }
  0x51   : > { %858 = vrot.lane.b32.xlu1 %v853_v32, %s4253_s11  ;;  %856 = vrot.lane.b32.xlu0 %v852_v34, %s4253_s11  ;;  %v922_v36 = vld.sshfl [vmem:[#allocation1 + $0x10] sm:$0xff pattern:$0x75316420]  ;;  %917 = vst [vmem:[#allocation1] ss:$2 sm:$0xff] %v4332_v2 }
  0x52   : > { %1017 = vst [vmem:[#allocation1 + $0x10] ss:$2 sm:$0xff] %v3925_v33  ;;  %785 = vrot.lane.b32.xlu2 %v782_v31, %s4252_s10 }
  0x58   : > { %v921_v38 = vld.sshfl [vmem:[#allocation1 + $0x8] sm:$0xff pattern:$0x75316420]  ;;  %v920_v39 = vld.sshfl [vmem:[#allocation1] sm:$0xff pattern:$0x75316420] }
  0x59   : > { %927 = vrot.lane.b32.xlu1 %v922_v36, %s4253_s11  ;;  %925 = vrot.lane.b32.xlu0 %v921_v38, %s4253_s11  ;;  %v1020_v40 = vld.sshfl [vmem:[#allocation1 + $0x10] sm:$0xff pattern:$0x75316420]  ;;  %1015 = vst [vmem:[#allocation1] ss:$2 sm:$0xff] %v4332_v2 }
  0x5a   : > { %1080 = vst [vmem:[#allocation1 + $0x10] ss:$2 sm:$0xff] %v3922_v37  ;;  %854 = vrot.lane.b32.xlu2 %v851_v35, %s4253_s11  ;;  %v3874_v36 = vld [vmem:[%s5134_s1 + $0x8] sm:$0xf]  ;;  %v3993_v37 = vld [vmem:[%s4324_s8 + $0x14] sm:$0xf] }
  0x60   : > { %v1019_v42 = vld.sshfl [vmem:[#allocation1 + $0x8] sm:$0xff pattern:$0x75316420]  ;;  %v1018_v43 = vld.sshfl [vmem:[#allocation1] sm:$0xff pattern:$0x75316420] }
  0x61   : > { %1025 = vrot.lane.b32.xlu1 %v1020_v40, %s4251_s9  ;;  %1023 = vrot.lane.b32.xlu0 %v1019_v42, %s4251_s9  ;;  %v1083_v44 = vld.sshfl [vmem:[#allocation1 + $0x10] sm:$0xff pattern:$0x75316420]  ;;  %1078 = vst [vmem:[#allocation1] ss:$2 sm:$0xff] %v4327_v0 }
  0x62   : > { %1146 = vst [vmem:[#allocation1 + $0x10] ss:$2 sm:$0xff] %v3936_v41  ;;  %923 = vrot.lane.b32.xlu2 %v920_v39, %s4253_s11 }
  0x68   : > { %v1082_v46 = vld.sshfl [vmem:[#allocation1 + $0x8] sm:$0xff pattern:$0x75316420]  ;;  %v1081_v47 = vld.sshfl [vmem:[#allocation1] sm:$0xff pattern:$0x75316420] }
  0x69   : > { %1088 = vrot.lane.b32.xlu1 %v1083_v44, %s4251_s9  ;;  %1086 = vrot.lane.b32.xlu0 %v1082_v46, %s4251_s9  ;;  %v1149_v48 = vld.sshfl [vmem:[#allocation1 + $0x10] sm:$0xff pattern:$0x75316420]  ;;  %1144 = vst [vmem:[#allocation1] ss:$2 sm:$0xff] %v4327_v0 }
  0x6a   : > { %1215 = vst [vmem:[#allocation1 + $0x10] ss:$2 sm:$0xff] %v1210_v45  ;;  %1021 = vrot.lane.b32.xlu2 %v1018_v43, %s4251_s9  ;;  %v3881_v46 = vld [vmem:[%s5134_s1 + $0xc] sm:$0xf] }
  0x70   : > { %v1148_v50 = vld.sshfl [vmem:[#allocation1 + $0x8] sm:$0xff pattern:$0x75316420]  ;;  %v1147_v51 = vld.sshfl [vmem:[#allocation1] sm:$0xff pattern:$0x75316420] }
  0x71   : > { %1154 = vrot.lane.b32.xlu1 %v1149_v48, %s4254_s12  ;;  %1152 = vrot.lane.b32.xlu0 %v1148_v50, %s4254_s12  ;;  %v1218_v52 = vld.sshfl [vmem:[#allocation1 + $0x10] sm:$0xff pattern:$0x75316420]  ;;  %1213 = vst [vmem:[#allocation1] ss:$2 sm:$0xff] %v4354_v16 }
  0x72   : > { %1283 = vst [vmem:[#allocation1 + $0x10] ss:$2 sm:$0xff] %v3948_v49  ;;  %1084 = vrot.lane.b32.xlu2 %v1081_v47, %s4251_s9  ;;  %v4000_v47 = vld [vmem:[%s4324_s8 + $0x2c] sm:$0xf] }
  0x78   : > { %v1217_v54 = vld.sshfl [vmem:[#allocation1 + $0x8] sm:$0xff pattern:$0x75316420]  ;;  %v1216_v55 = vld.sshfl [vmem:[#allocation1] sm:$0xff pattern:$0x75316420] }
  0x79   : > { %1223 = vrot.lane.b32.xlu1 %v1218_v52, %s4253_s11  ;;  %1221 = vrot.lane.b32.xlu0 %v1217_v54, %s4253_s11  ;;  %v1286_v56 = vld.sshfl [vmem:[#allocation1 + $0x10] sm:$0xff pattern:$0x75316420]  ;;  %1281 = vst [vmem:[#allocation1] ss:$2 sm:$0xff] %v4347_v11 }
  0x7a   : > { %1351 = vst [vmem:[#allocation1 + $0x10] ss:$2 sm:$0xff] %v1346_v53  ;;  %1150 = vrot.lane.b32.xlu2 %v1147_v51, %s4254_s12  ;;  %s4259_s12 = smov 106  }
  0x80   : > { %v1285_v58 = vld.sshfl [vmem:[#allocation1 + $0x8] sm:$0xff pattern:$0x75316420]  ;;  %v1284_v59 = vld.sshfl [vmem:[#allocation1] sm:$0xff pattern:$0x75316420] }
  0x81   : > { %1291 = vrot.lane.b32.xlu1 %v1286_v56, %s4253_s11  ;;  %1289 = vrot.lane.b32.xlu0 %v1285_v58, %s4253_s11  ;;  %v1354_v60 = vld.sshfl [vmem:[#allocation1 + $0x10] sm:$0xff pattern:$0x75316420]  ;;  %1349 = vst [vmem:[#allocation1] ss:$2 sm:$0xff] %v4354_v16 }
  0x82   : > { %1420 = vst [vmem:[#allocation1 + $0x10] ss:$2 sm:$0xff] %v3960_v57  ;;  %1219 = vrot.lane.b32.xlu2 %v1216_v55, %s4253_s11  ;;  %v3888_v56 = vld [vmem:[%s5134_s1 + $0x10] sm:$0xf]  ;;  %v4007_v57 = vld [vmem:[%s4324_s8 + $0x20] sm:$0xf] }
  0x84   : > { %v4407_v61 = vpop.permute.xlu2 %580 }
  0x88   : > { %v1353_v63 = vld.sshfl [vmem:[#allocation1 + $0x8] sm:$0xff pattern:$0x75316420]  ;;  %v1352_v1 = vld.sshfl [vmem:[#allocation1] sm:$0xff pattern:$0x75316420] }
  0x89   : > { %1359 = vrot.lane.b32.xlu1 %v1354_v60, %s4255_s13  ;;  %1357 = vrot.lane.b32.xlu0 %v1353_v63, %s4255_s13  ;;  %v1423_v3 = vld.sshfl [vmem:[#allocation1 + $0x10] sm:$0xff pattern:$0x75316420]  ;;  %1418 = vst [vmem:[#allocation1] ss:$2 sm:$0xff] %v4327_v0 }
  0x8a   : > { %1488 = vst [vmem:[#allocation1 + $0x10] ss:$2 sm:$0xff] %v3967_v62  ;;  %1287 = vrot.lane.b32.xlu2 %v1284_v59, %s4253_s11 }
  0x8b   : > { %v388_v4 = vpop.permute.xlu0 %387  ;;  %v386_v5 = vpop.permute.xlu1 %385 }
  0x8c   : > { %v507_v6 = vpop.permute.xlu2 %506  ;;  %v392_v7 = vsel %vm391_vm0, %v386_v5, %v388_v4  ;;  %v4014_v5 = vld [vmem:[%s4324_s8 + $0x2c] sm:$0xf] }
  0x8d   : > { %3866 = vmatpush.msk.msra.mxu2 %vm398_vm1, %v392_v7 }
  0x8e   : > { %3867 = vmatmul.msk.f32.vlgmr.msra.gmra.mxu2 %vm394_vm2, %v3863_v10 }
  0x8f   : > { %3870 = vmatpush.msk.msrb.mxu2 %vm398_vm1, %v4339_v8 }
  0x90   : > { %v1422_v13 = vld.sshfl [vmem:[#allocation1 + $0x8] sm:$0xff pattern:$0x75316420]  ;;  %v1421_v14 = vld.sshfl [vmem:[#allocation1] sm:$0xff pattern:$0x75316420] }
  0x91   : > { %1428 = vrot.lane.b32.xlu1 %v1423_v3, %s4253_s11  ;;  %1426 = vrot.lane.b32.xlu0 %v1422_v13, %s4253_s11  ;;  %v1491_v15 = vld.sshfl [vmem:[#allocation1 + $0x10] sm:$0xff pattern:$0x75316420]  ;;  %1486 = vst [vmem:[#allocation1] ss:$2 sm:$0xff] %v4332_v2 }
  0x92   : > { %1556 = vst [vmem:[#allocation1 + $0x10] ss:$2 sm:$0xff] %v3974_v12  ;;  %1355 = vrot.lane.b32.xlu2 %v1352_v1, %s4255_s13 }
  0x93   : > { %v390_v17 = vpop.permute.xlu0 %389 }
  0x94   : > { %v393_v18 = vsel %vm391_vm0, %v388_v4, %v390_v17  ;;  %v577_v8 = vpop.permute.xlu2 %576  ;;  %v511_v22 = vpop.permute.xlu1 %510  ;;  %v3893_v4 = vld [vmem:[%s5134_s1 + $0x14] sm:$0xf] }
  0x95   : > { %3868 = vmatpush.msk.msra.mxu3 %vm398_vm1, %v393_v18  ;;  %v3900_v18 = vld [vmem:[%s5134_s1 + $0x18] sm:$0xf] }
  0x96   : > { %3869 = vmatmul.msk.f32.vlgmr.msra.gmra.mxu3 %vm394_vm2, %v3863_v10  ;;  %3871 = vmatmul.msk.f32.vlgmr.msrb.gmra.mxu2 %vm394_vm2, %v369_v27 }
  0x97   : > { %3872 = vmatpush.msk.msrb.mxu3 %vm398_vm1, %v4341_v9 }
  0x98   : > { %v1490_v20 = vld.sshfl [vmem:[#allocation1 + $0x8] sm:$0xff pattern:$0x75316420]  ;;  %v1489_v21 = vld.sshfl [vmem:[#allocation1] sm:$0xff pattern:$0x75316420] }
  0x99   : > { %1496 = vrot.lane.b32.xlu1 %v1491_v15, %s4253_s11  ;;  %1494 = vrot.lane.b32.xlu0 %v1490_v20, %s4253_s11  ;;  %v1559_v23 = vld.sshfl [vmem:[#allocation1 + $0x10] sm:$0xff pattern:$0x75316420]  ;;  %1554 = vst [vmem:[#allocation1] ss:$2 sm:$0xff] %v4327_v0 }
  0x9a   : > { %1650 = vst [vmem:[#allocation1 + $0x10] ss:$2 sm:$0xff] %v1645_v19  ;;  %1424 = vrot.lane.b32.xlu2 %v1421_v14, %s4253_s11 }
  0x9b   : > { %v509_v24 = vpop.permute.xlu0 %508 }
  0x9c   : > { %v513_v9 = vsel %vm391_vm0, %v509_v24, %v511_v22  ;;  %v512_v25 = vsel %vm391_vm0, %v507_v6, %v509_v24  ;;  %v647_v26 = vpop.permute.xlu2 %646 }
  0x9d   : > { %3879 = vmatpush.msk.msra.mxu1 %vm398_vm1, %v513_v9  ;;  %3877 = vmatpush.msk.msra.mxu0 %vm398_vm1, %v512_v25 }
  0x9e   : > { %3873 = vmatmul.msk.f32.vlgmr.msrb.gmra.mxu3 %vm394_vm2, %v369_v27  ;;  %3878 = vmatmul.msk.f32.vlgmr.msra.gmra.mxu0 %vm394_vm2, %v3874_v36  ;;  %v2115_v27 = vld [vmem:[%s4324_s8 + $0x8] sm:$0xf] }
  0x9f   : > { %3880 = vmatmul.msk.f32.vlgmr.msra.gmra.mxu1 %vm394_vm2, %v3874_v36  ;;  %v3914_v36 = vld [vmem:[%s5134_s1 + $0x20] sm:$0xf] }
  0xa0   : > { %v1558_v29 = vld.sshfl [vmem:[#allocation1 + $0x8] sm:$0xff pattern:$0x75316420]  ;;  %v1557_v30 = vld.sshfl [vmem:[#allocation1] sm:$0xff pattern:$0x75316420] }
  0xa1   : > { %1564 = vrot.lane.b32.xlu1 %v1559_v23, %s4255_s13  ;;  %1562 = vrot.lane.b32.xlu0 %v1558_v29, %s4255_s13  ;;  %v1653_v31 = vld.sshfl [vmem:[#allocation1 + $0x10] sm:$0xff pattern:$0x75316420]  ;;  %1648 = vst [vmem:[#allocation1] ss:$2 sm:$0xff] %v4354_v16 }
  0xa2   : > { %1713 = vst [vmem:[#allocation1 + $0x10] ss:$2 sm:$0xff] %v3981_v28  ;;  %1492 = vrot.lane.b32.xlu2 %v1489_v21, %s4253_s11 }
  0xa3   : > { %v579_v32 = vpop.permute.xlu1 %578 }
  0xa4   : > { %v584_v33 = vsel %vm582_vm3, %v579_v32, %v4407_v61  ;;  %v583_v34 = vsel %vm582_vm3, %v577_v8, %v579_v32  ;;  %v717_v35 = vpop.permute.xlu2 %716  ;;  %v4021_v8 = vld [vmem:[%s4324_s8 + $0x14] sm:$0xf] }
  0xa5   : > { %3886 = vmatpush.msk.msra.mxu3 %vm398_vm1, %v584_v33  ;;  %3884 = vmatpush.msk.msra.mxu2 %vm398_vm1, %v583_v34 }
  0xa6   : > { %3885 = vmatmul.msk.f32.vlgmr.msra.gmra.mxu2 %vm394_vm2, %v3881_v46  ;;  %3887 = vmatmul.msk.f32.vlgmr.msra.gmra.mxu3 %vm394_vm2, %v3881_v46  ;;  %v3923_v46 = vld [vmem:[%s5134_s1 + $0x4] sm:$0xf] }
  0xa8   : > { %v1652_v38 = vld.sshfl [vmem:[#allocation1 + $0x8] sm:$0xff pattern:$0x75316420]  ;;  %v1651_v39 = vld.sshfl [vmem:[#allocation1] sm:$0xff pattern:$0x75316420] }
  0xa9   : > { %1658 = vrot.lane.b32.xlu1 %v1653_v31, %s4253_s11  ;;  %1656 = vrot.lane.b32.xlu0 %v1652_v38, %s4253_s11  ;;  %v1716_v40 = vld.sshfl [vmem:[#allocation1 + $0x10] sm:$0xff pattern:$0x75316420]  ;;  %1711 = vst [vmem:[#allocation1] ss:$2 sm:$0xff] %v4347_v11 }
  0xaa   : > { %1779 = vst [vmem:[#allocation1 + $0x10] ss:$2 sm:$0xff] %v3993_v37  ;;  %1560 = vrot.lane.b32.xlu2 %v1557_v30, %s4255_s13  ;;  %v4033_v37 = vld [vmem:[%s4324_s8 + $0x14] sm:$0xf] }
  0xab   : > { %v651_v41 = vpop.permute.xlu1 %650  ;;  %v649_v42 = vpop.permute.xlu0 %648 }
  0xac   : > { %v653_v43 = vsel %vm652_vm4, %v647_v26, %v649_v42  ;;  %v654_v44 = vsel %vm652_vm4, %v649_v42, %v651_v41  ;;  %v786_v45 = vpop.permute.xlu2 %785  ;;  %v3907_v26 = vld [vmem:[%s5134_s1 + $0x1c] sm:$0xf] }
  0xad   : > { %3889 = vmatpush.msk.msrb.mxu0 %vm398_vm1, %v653_v43  ;;  %3891 = vmatpush.msk.msrb.mxu1 %vm398_vm1, %v654_v44 }
  0xae   : > { %3890 = vmatmul.msk.f32.vlgmr.msrb.gmra.mxu0 %vm394_vm2, %v3888_v56  ;;  %3892 = vmatmul.msk.f32.vlgmr.msrb.gmra.mxu1 %vm394_vm2, %v3888_v56  ;;  %v1007_v56 = vld [vmem:[%s5134_s1] sm:$0xf] }
  0xb0   : > { %v1715_v48 = vld.sshfl [vmem:[#allocation1 + $0x8] sm:$0xff pattern:$0x75316420]  ;;  %v1714_v49 = vld.sshfl [vmem:[#allocation1] sm:$0xff pattern:$0x75316420] }
  0xb1   : > { %1721 = vrot.lane.b32.xlu1 %v1716_v40, %s4252_s10  ;;  %1719 = vrot.lane.b32.xlu0 %v1715_v48, %s4252_s10  ;;  %v1782_v50 = vld.sshfl [vmem:[#allocation1 + $0x10] sm:$0xff pattern:$0x75316420]  ;;  %1777 = vst [vmem:[#allocation1] ss:$2 sm:$0xff] %v4347_v11 }
  0xb2   : > { %1847 = vst [vmem:[#allocation1 + $0x10] ss:$2 sm:$0xff] %v4000_v47  ;;  %1654 = vrot.lane.b32.xlu2 %v1651_v39, %s4253_s11  ;;  %v4041_v47 = vld [vmem:[%s4324_s8 + $0x14] sm:$0xf] }
  0xb3   : > { %v721_v51 = vpop.permute.xlu1 %720  ;;  %v719_v52 = vpop.permute.xlu0 %718 }
  0xb4   : > { %v723_v53 = vsel %vm652_vm4, %v719_v52, %v721_v51  ;;  %v722_v54 = vsel %vm652_vm4, %v717_v35, %v719_v52  ;;  %v855_v55 = vpop.permute.xlu2 %854 }
  0xb5   : > { %3896 = vmatpush.msk.msrb.mxu2 %vm398_vm1, %v722_v54  ;;  %3898 = vmatpush.msk.msrb.mxu3 %vm398_vm1, %v723_v53 }
  0xb6   : > { %3897 = vmatmul.msk.f32.vlgmr.msrb.gmra.mxu2 %vm394_vm2, %v3893_v4  ;;  %3899 = vmatmul.msk.f32.vlgmr.msrb.gmra.mxu3 %vm394_vm2, %v3893_v4  ;;  %v3934_v4 = vld [vmem:[%s5134_s1 + $0x8] sm:$0xf] }
  0xb8   : > { %v1781_v58 = vld.sshfl [vmem:[#allocation1 + $0x8] sm:$0xff pattern:$0x75316420]  ;;  %v1780_v59 = vld.sshfl [vmem:[#allocation1] sm:$0xff pattern:$0x75316420] }
  0xb9   : > { %1787 = vrot.lane.b32.xlu1 %v1782_v50, %s4253_s11  ;;  %1785 = vrot.lane.b32.xlu0 %v1781_v58, %s4253_s11  ;;  %v1850_v60 = vld.sshfl [vmem:[#allocation1 + $0x10] sm:$0xff pattern:$0x75316420]  ;;  %1845 = vst [vmem:[#allocation1] ss:$2 sm:$0xff] %v4332_v2 }
  0xba   : > { %1915 = vst [vmem:[#allocation1 + $0x10] ss:$2 sm:$0xff] %v4007_v57  ;;  %1717 = vrot.lane.b32.xlu2 %v1714_v49, %s4252_s10  ;;  %v2275_v57 = vld [vmem:[%s4324_s8 + $0x8] sm:$0xf] }
  0xbb   : > { %v790_v61 = vpop.permute.xlu1 %789  ;;  %v788_v62 = vpop.permute.xlu0 %787 }
  0xbc   : > { %v792_v63 = vsel %vm582_vm3, %v788_v62, %v790_v61  ;;  %v791_v1 = vsel %vm582_vm3, %v786_v45, %v788_v62  ;;  %v924_v3 = vpop.permute.xlu2 %923 }
  0xbd   : > { %3903 = vmatpush.msk.msra.mxu0 %vm398_vm1, %v791_v1  ;;  %3905 = vmatpush.msk.msra.mxu1 %vm398_vm1, %v792_v63 }
  0xbe   : > { %3904 = vmatmul.msk.f32.vlgmr.msra.gmra.mxu0 %vm394_vm2, %v3900_v18  ;;  %3906 = vmatmul.msk.f32.vlgmr.msra.gmra.mxu1 %vm394_vm2, %v3900_v18  ;;  %v3941_v18 = vld [vmem:[%s5134_s1 + $0xc] sm:$0xf] }
  0xc0   : > { %v1849_v6 = vld.sshfl [vmem:[#allocation1 + $0x8] sm:$0xff pattern:$0x75316420]  ;;  %v1848_v7 = vld.sshfl [vmem:[#allocation1] sm:$0xff pattern:$0x75316420] }
  0xc1   : > { %1855 = vrot.lane.b32.xlu1 %v1850_v60, %s4252_s10  ;;  %1853 = vrot.lane.b32.xlu0 %v1849_v6, %s4252_s10  ;;  %v1918_v10 = vld.sshfl [vmem:[#allocation1 + $0x10] sm:$0xff pattern:$0x75316420]  ;;  %1913 = vst [vmem:[#allocation1] ss:$2 sm:$0xff] %v4327_v0 }
  0xc2   : > { %1983 = vst [vmem:[#allocation1 + $0x10] ss:$2 sm:$0xff] %v4014_v5  ;;  %1783 = vrot.lane.b32.xlu2 %v1780_v59, %s4253_s11  ;;  %v2407_v5 = vld [vmem:[%s4324_s8 + $0x8] sm:$0xf] }
  0xc3   : > { %v859_v12 = vpop.permute.xlu1 %858  ;;  %v857_v13 = vpop.permute.xlu0 %856 }
  0xc4   : > { %v861_v14 = vsel %vm652_vm4, %v857_v13, %v859_v12  ;;  %v860_v15 = vsel %vm652_vm4, %v855_v55, %v857_v13  ;;  %v1022_v17 = vpop.permute.xlu2 %1021 }
  0xc5   : > { %3910 = vmatpush.msk.msra.mxu2 %vm398_vm1, %v860_v15  ;;  %3912 = vmatpush.msk.msra.mxu3 %vm398_vm1, %v861_v14 }
  0xc6   : > { %3911 = vmatmul.msk.f32.vlgmr.msra.gmra.mxu2 %vm394_vm2, %v3907_v26  ;;  %3913 = vmatmul.msk.f32.vlgmr.msra.gmra.mxu3 %vm394_vm2, %v3907_v26  ;;  %v3946_v26 = vld [vmem:[%s5134_s1 + $0x10] sm:$0xf] }
  0xc8   : > { %v1917_v19 = vld.sshfl [vmem:[#allocation1 + $0x8] sm:$0xff pattern:$0x75316420]  ;;  %v1916_v20 = vld.sshfl [vmem:[#allocation1] sm:$0xff pattern:$0x75316420] }
  0xc9   : > { %1923 = vrot.lane.b32.xlu1 %v1918_v10, %s4253_s11  ;;  %1921 = vrot.lane.b32.xlu0 %v1917_v19, %s4253_s11  ;;  %v1986_v21 = vld.sshfl [vmem:[#allocation1 + $0x10] sm:$0xff pattern:$0x75316420]  ;;  %1981 = vst [vmem:[#allocation1] ss:$2 sm:$0xff] %v4332_v2 }
  0xca   : > { %2051 = vst [vmem:[#allocation1 + $0x10] ss:$2 sm:$0xff] %v4021_v8  ;;  %1851 = vrot.lane.b32.xlu2 %v1848_v7, %s4252_s10  ;;  %v4057_v8 = vld [vmem:[%s4324_s8 + $0x20] sm:$0xf] }
  0xcb   : > { %v928_v22 = vpop.permute.xlu1 %927  ;;  %v926_v23 = vpop.permute.xlu0 %925 }
  0xcc   : > { %v930_v24 = vsel %vm652_vm4, %v926_v23, %v928_v22  ;;  %v929_v9 = vsel %vm652_vm4, %v924_v3, %v926_v23  ;;  %v1085_v25 = vpop.permute.xlu2 %1084 }
  0xcd   : > { %3917 = vmatpush.msk.msrb.mxu0 %vm398_vm1, %v929_v9  ;;  %3919 = vmatpush.msk.msrb.mxu1 %vm398_vm1, %v930_v24 }
  0xce   : > { %3918 = vmatmul.msk.f32.vlgmr.msrb.gmra.mxu0 %vm394_vm2, %v3914_v36  ;;  %3920 = vmatmul.msk.f32.vlgmr.msrb.gmra.mxu1 %vm394_vm2, %v3914_v36  ;;  %v3953_v36 = vld [vmem:[%s5134_s1 + $0x14] sm:$0xf] }
  0xd0   : > { %v1985_v28 = vld.sshfl [vmem:[#allocation1 + $0x8] sm:$0xff pattern:$0x75316420]  ;;  %v1984_v29 = vld.sshfl [vmem:[#allocation1] sm:$0xff pattern:$0x75316420] }
  0xd1   : > { %1991 = vrot.lane.b32.xlu1 %v1986_v21, %s4253_s11  ;;  %1989 = vrot.lane.b32.xlu0 %v1985_v28, %s4253_s11  ;;  %v2054_v30 = vld.sshfl [vmem:[#allocation1 + $0x10] sm:$0xff pattern:$0x75316420]  ;;  %2049 = vst [vmem:[#allocation1] ss:$2 sm:$0xff] %v4347_v11 }
  0xd2   : > { %2120 = vst [vmem:[#allocation1 + $0x10] ss:$2 sm:$0xff] %v2115_v27  ;;  %1919 = vrot.lane.b32.xlu2 %v1916_v20, %s4253_s11  ;;  %v4064_v27 = vld [vmem:[%s4324_s8 + $0x2c] sm:$0xf] }
  0xd3   : > { %v1026_v31 = vpop.permute.xlu1 %1025  ;;  %v1024_v32 = vpop.permute.xlu0 %1023 }
  0xd4   : > { %v1028_v33 = vsel %vm391_vm0, %v1024_v32, %v1026_v31  ;;  %v1027_v34 = vsel %vm391_vm0, %v1022_v17, %v1024_v32  ;;  %v1151_v35 = vpop.permute.xlu2 %1150 }
  0xd5   : > { %3926 = vmatpush.msk.msrb.mxu2 %vm398_vm1, %v1027_v34  ;;  %3928 = vmatpush.msk.msrb.mxu3 %vm398_vm1, %v1028_v33 }
  0xd6   : > { %3927 = vmatmul.msk.f32.vlgmr.msrb.gmra.mxu2 %vm394_vm2, %v3923_v46  ;;  %3929 = vmatmul.msk.f32.vlgmr.msrb.gmra.mxu3 %vm394_vm2, %v3923_v46  ;;  %v3958_v46 = vld [vmem:[%s5134_s1 + $0x18] sm:$0xf] }
  0xd8   : > { %v2053_v38 = vld.sshfl [vmem:[#allocation1 + $0x8] sm:$0xff pattern:$0x75316420]  ;;  %v2052_v39 = vld.sshfl [vmem:[#allocation1] sm:$0xff pattern:$0x75316420] }
  0xd9   : > { %2059 = vrot.lane.b32.xlu1 %v2054_v30, %s4256_s18  ;;  %2057 = vrot.lane.b32.xlu0 %v2053_v38, %s4256_s18  ;;  %v2123_v40 = vld.sshfl [vmem:[#allocation1 + $0x10] sm:$0xff pattern:$0x75316420]  ;;  %2118 = vst [vmem:[#allocation1] ss:$2 sm:$0xff] %v4354_v16 }
  0xda   : > { %2189 = vst [vmem:[#allocation1 + $0x10] ss:$2 sm:$0xff] %v4033_v37  ;;  %1987 = vrot.lane.b32.xlu2 %v1984_v29, %s4253_s11  ;;  %v4071_v37 = vld [vmem:[%s4324_s8 + $0x20] sm:$0xf] }
  0xdb   : > { %v1089_v41 = vpop.permute.xlu1 %1088  ;;  %v1087_v42 = vpop.permute.xlu0 %1086 }
  0xdc   : > { %v1091_v43 = vsel %vm391_vm0, %v1087_v42, %v1089_v41  ;;  %v1090_v44 = vsel %vm391_vm0, %v1085_v25, %v1087_v42  ;;  %v1220_v45 = vpop.permute.xlu2 %1219 }
  0xdd   : > { %3930 = vmatpush.msk.msra.mxu0 %vm398_vm1, %v1090_v44  ;;  %3932 = vmatpush.msk.msra.mxu1 %vm398_vm1, %v1091_v43 }
  0xde   : > { %3931 = vmatmul.msk.f32.vlgmr.msra.gmra.mxu0 %vm394_vm2, %v1007_v56  ;;  %3933 = vmatmul.msk.f32.vlgmr.msra.gmra.mxu1 %vm394_vm2, %v1007_v56 }
  0xe0   : > { %v2122_v48 = vld.sshfl [vmem:[#allocation1 + $0x8] sm:$0xff pattern:$0x75316420]  ;;  %v2121_v49 = vld.sshfl [vmem:[#allocation1] sm:$0xff pattern:$0x75316420] }
  0xe1   : > { %2128 = vrot.lane.b32.xlu1 %v2123_v40, %s4257_s21  ;;  %2126 = vrot.lane.b32.xlu0 %v2122_v48, %s4257_s21  ;;  %v2192_v50 = vld.sshfl [vmem:[#allocation1 + $0x10] sm:$0xff pattern:$0x75316420]  ;;  %2187 = vst [vmem:[#allocation1] ss:$2 sm:$0xff] %v4347_v11 }
  0xe2   : > { %2283 = vst [vmem:[#allocation1 + $0x10] ss:$2 sm:$0xff] %v4041_v47  ;;  %2055 = vrot.lane.b32.xlu2 %v2052_v39, %s4256_s18 }
  0xe3   : > { %v1155_v51 = vpop.permute.xlu1 %1154  ;;  %v1153_v52 = vpop.permute.xlu0 %1152 }
  0xe4   : > { %v1158_v53 = vsel %vm1156_vm5, %v1153_v52, %v1155_v51  ;;  %v1157_v54 = vsel %vm1156_vm5, %v1151_v35, %v1153_v52  ;;  %v1288_v55 = vpop.permute.xlu2 %1287 }
  0xe5   : > { %3937 = vmatpush.msk.msra.mxu2 %vm398_vm1, %v1157_v54  ;;  %3939 = vmatpush.msk.msra.mxu3 %vm398_vm1, %v1158_v53 }
  0xe6   : > { %3938 = vmatmul.msk.f32.vlgmr.msra.gmra.mxu2 %vm394_vm2, %v3934_v4  ;;  %3940 = vmatmul.msk.f32.vlgmr.msra.gmra.mxu3 %vm394_vm2, %v3934_v4  ;;  %v4258_v4 = vmov 0  }
  0xe7   : > { %4225 = vset.pattern.permute.xlu0 %v4258_v4  ;;  %4226 = vset.pattern.permute.xlu1 %v4258_v4 }
  0xe8   : > { %v2191_v58 = vld.sshfl [vmem:[#allocation1 + $0x8] sm:$0xff pattern:$0x75316420]  ;;  %v2190_v59 = vld.sshfl [vmem:[#allocation1] sm:$0xff pattern:$0x75316420] }
  0xe9   : > { %2197 = vrot.lane.b32.xlu1 %v2192_v50, %s4257_s21  ;;  %2195 = vrot.lane.b32.xlu0 %v2191_v58, %s4257_s21  ;;  %v2286_v60 = vld.sshfl [vmem:[#allocation1 + $0x10] sm:$0xff pattern:$0x75316420]  ;;  %2281 = vst [vmem:[#allocation1] ss:$2 sm:$0xff] %v4347_v11 }
  0xea   : > { %2346 = vst [vmem:[#allocation1 + $0x10] ss:$2 sm:$0xff] %v2275_v57  ;;  %2124 = vrot.lane.b32.xlu2 %v2121_v49, %s4257_s21 }
  0xeb   : > { %v1224_v61 = vpop.permute.xlu1 %1223  ;;  %v1222_v62 = vpop.permute.xlu0 %1221 }
  0xec   : > { %v1226_v63 = vsel %vm652_vm4, %v1222_v62, %v1224_v61  ;;  %v1225_v1 = vsel %vm652_vm4, %v1220_v45, %v1222_v62  ;;  %v1356_v3 = vpop.permute.xlu2 %1355 }
  0xed   : > { %3942 = vmatpush.msk.msrb.mxu0 %vm398_vm1, %v1225_v1  ;;  %3944 = vmatpush.msk.msrb.mxu1 %vm398_vm1, %v1226_v63  ;;  %v3972_v1 = vld [vmem:[%s5134_s1 + $0x20] sm:$0xf] }
  0xee   : > { %3943 = vmatmul.msk.f32.vlgmr.msrb.gmra.mxu0 %vm394_vm2, %v3941_v18  ;;  %3945 = vmatmul.msk.f32.vlgmr.msrb.gmra.mxu1 %vm394_vm2, %v3941_v18 }
  0xf0   : > { %v2285_v6 = vld.sshfl [vmem:[#allocation1 + $0x8] sm:$0xff pattern:$0x75316420]  ;;  %v2284_v7 = vld.sshfl [vmem:[#allocation1] sm:$0xff pattern:$0x75316420] }
  0xf1   : > { %2291 = vrot.lane.b32.xlu1 %v2286_v60, %s4253_s11  ;;  %2289 = vrot.lane.b32.xlu0 %v2285_v6, %s4253_s11  ;;  %v2349_v10 = vld.sshfl [vmem:[#allocation1 + $0x10] sm:$0xff pattern:$0x75316420]  ;;  %2344 = vst [vmem:[#allocation1] ss:$2 sm:$0xff] %v4354_v16 }
  0xf2   : > { %2412 = vst [vmem:[#allocation1 + $0x10] ss:$2 sm:$0xff] %v2407_v5  ;;  %2193 = vrot.lane.b32.xlu2 %v2190_v59, %s4257_s21 }
  0xf3   : > { %v1292_v12 = vpop.permute.xlu1 %1291  ;;  %v1290_v13 = vpop.permute.xlu0 %1289 }
  0xf4   : > { %v1294_v14 = vsel %vm652_vm4, %v1290_v13, %v1292_v12  ;;  %v1293_v15 = vsel %vm652_vm4, %v1288_v55, %v1290_v13  ;;  %v1425_v17 = vpop.permute.xlu2 %1424  ;;  %v3965_v55 = vld [vmem:[%s5134_s1 + $0x1c] sm:$0xf] }
  0xf5   : > { %3949 = vmatpush.msk.msrb.mxu2 %vm398_vm1, %v1293_v15  ;;  %3951 = vmatpush.msk.msrb.mxu3 %vm398_vm1, %v1294_v14 }
  0xf6   : > { %3950 = vmatmul.msk.f32.vlgmr.msrb.gmra.mxu2 %vm394_vm2, %v3946_v26  ;;  %3952 = vmatmul.msk.f32.vlgmr.msrb.gmra.mxu3 %vm394_vm2, %v3946_v26 }
  0xf8   : > { %v2348_v19 = vld.sshfl [vmem:[#allocation1 + $0x8] sm:$0xff pattern:$0x75316420]  ;;  %v2347_v20 = vld.sshfl [vmem:[#allocation1] sm:$0xff pattern:$0x75316420] }
  0xf9   : > { %2354 = vrot.lane.b32.xlu1 %v2349_v10, %s4253_s11  ;;  %2352 = vrot.lane.b32.xlu0 %v2348_v19, %s4253_s11  ;;  %v2415_v21 = vld.sshfl [vmem:[#allocation1 + $0x10] sm:$0xff pattern:$0x75316420]  ;;  %2410 = vst [vmem:[#allocation1] ss:$2 sm:$0xff] %v4354_v16 }
  0xfa   : > { %2480 = vst [vmem:[#allocation1 + $0x10] ss:$2 sm:$0xff] %v4057_v8  ;;  %2287 = vrot.lane.b32.xlu2 %v2284_v7, %s4253_s11 }
  0xfb   : > { %v1360_v22 = vpop.permute.xlu1 %1359  ;;  %v1358_v23 = vpop.permute.xlu0 %1357 }
  0xfc   : > { %v1363_v24 = vsel %vm1361_vm6, %v1358_v23, %v1360_v22  ;;  %v1362_v9 = vsel %vm1361_vm6, %v1356_v3, %v1358_v23  ;;  %v1493_v25 = vpop.permute.xlu2 %1492  ;;  %v2815_v3 = vld [vmem:[%s4324_s8 + $0x8] sm:$0xf] }
  0xfd   : > { %3954 = vmatpush.msk.msra.mxu0 %vm398_vm1, %v1362_v9  ;;  %3956 = vmatpush.msk.msra.mxu1 %vm398_vm1, %v1363_v24  ;;  %v1640_v24 = vld [vmem:[%s5134_s1] sm:$0xf] }
  0xfe   : > { %3955 = vmatmul.msk.f32.vlgmr.msra.gmra.mxu0 %vm394_vm2, %v3953_v36  ;;  %3957 = vmatmul.msk.f32.vlgmr.msra.gmra.mxu1 %vm394_vm2, %v3953_v36  ;;  %v3998_v36 = vld [vmem:[%s5134_s1 + $0xc] sm:$0xf] }
 0x100   : > { %v2414_v28 = vld.sshfl [vmem:[#allocation1 + $0x8] sm:$0xff pattern:$0x75316420]  ;;  %v2413_v29 = vld.sshfl [vmem:[#allocation1] sm:$0xff pattern:$0x75316420] }
 0x101   : > { %2420 = vrot.lane.b32.xlu1 %v2415_v21, %s4255_s13  ;;  %2418 = vrot.lane.b32.xlu0 %v2414_v28, %s4255_s13  ;;  %v2483_v30 = vld.sshfl [vmem:[#allocation1 + $0x10] sm:$0xff pattern:$0x75316420]  ;;  %2478 = vst [vmem:[#allocation1] ss:$2 sm:$0xff] %v4327_v0 }
 0x102   : > { %2548 = vst [vmem:[#allocation1 + $0x10] ss:$2 sm:$0xff] %v4064_v27  ;;  %2350 = vrot.lane.b32.xlu2 %v2347_v20, %s4253_s11 }
 0x103   : > { %v1429_v31 = vpop.permute.xlu1 %1428  ;;  %v1427_v32 = vpop.permute.xlu0 %1426 }
 0x104   : > { %v1431_v33 = vsel %vm652_vm4, %v1427_v32, %v1429_v31  ;;  %v1430_v34 = vsel %vm652_vm4, %v1425_v17, %v1427_v32  ;;  %v1561_v35 = vpop.permute.xlu2 %1560  ;;  %v3982_v17 = vld [vmem:[%s5134_s1 + $0x4] sm:$0xf] }
 0x105   : > { %3961 = vmatpush.msk.msra.mxu2 %vm398_vm1, %v1430_v34  ;;  %3963 = vmatpush.msk.msra.mxu3 %vm398_vm1, %v1431_v33 }
 0x106   : > { %3962 = vmatmul.msk.f32.vlgmr.msra.gmra.mxu2 %vm394_vm2, %v3958_v46  ;;  %3964 = vmatmul.msk.f32.vlgmr.msra.gmra.mxu3 %vm394_vm2, %v3958_v46 }
 0x108   : > { %v2482_v38 = vld.sshfl [vmem:[#allocation1 + $0x8] sm:$0xff pattern:$0x75316420]  ;;  %v2481_v39 = vld.sshfl [vmem:[#allocation1] sm:$0xff pattern:$0x75316420] }
 0x109   : > { %2488 = vrot.lane.b32.xlu1 %v2483_v30, %s4253_s11  ;;  %2486 = vrot.lane.b32.xlu0 %v2482_v38, %s4253_s11  ;;  %v2551_v40 = vld.sshfl [vmem:[#allocation1 + $0x10] sm:$0xff pattern:$0x75316420]  ;;  %2546 = vst [vmem:[#allocation1] ss:$2 sm:$0xff] %v4332_v2 }
 0x10a   : > { %2616 = vst [vmem:[#allocation1 + $0x10] ss:$2 sm:$0xff] %v4071_v37  ;;  %2416 = vrot.lane.b32.xlu2 %v2413_v29, %s4255_s13  ;;  %v2679_v2 = vld [vmem:[%s4324_s8 + $0x8] sm:$0xf]  ;;  %v368_v37 = vld [vmem:[%s5135_s2] sm:$0xf] }
 0x10b   : > { %v1497_v41 = vpop.permute.xlu1 %1496  ;;  %v1495_v42 = vpop.permute.xlu0 %1494  ;;  %v3991_v30 = vld [vmem:[%s5134_s1 + $0x8] sm:$0xf] }
 0x10c   : > { %v1499_v43 = vsel %vm652_vm4, %v1495_v42, %v1497_v41  ;;  %v1498_v44 = vsel %vm652_vm4, %v1493_v25, %v1495_v42  ;;  %v1655_v45 = vpop.permute.xlu2 %1654 }
 0x10d   : > { %3968 = vmatpush.msk.msrb.mxu0 %vm398_vm1, %v1498_v44  ;;  %3970 = vmatpush.msk.msrb.mxu1 %vm398_vm1, %v1499_v43  ;;  %v4005_v43 = vld [vmem:[%s5134_s1 + $0x10] sm:$0xf]  ;;  %v4012_v44 = vld [vmem:[%s5134_s1 + $0x14] sm:$0xf] }
 0x10e   : > { %3969 = vmatmul.msk.f32.vlgmr.msrb.gmra.mxu0 %vm394_vm2, %v3965_v55  ;;  %3971 = vmatmul.msk.f32.vlgmr.msrb.gmra.mxu1 %vm394_vm2, %v3965_v55 }
 0x110   : > { %v2550_v47 = vld.sshfl [vmem:[#allocation1 + $0x8] sm:$0xff pattern:$0x75316420]  ;;  %v2549_v48 = vld.sshfl [vmem:[#allocation1] sm:$0xff pattern:$0x75316420] }
 0x111   : > { %2556 = vrot.lane.b32.xlu1 %v2551_v40, %s4253_s11  ;;  %2554 = vrot.lane.b32.xlu0 %v2550_v47, %s4253_s11  ;;  %v2619_v49 = vld.sshfl [vmem:[#allocation1 + $0x10] sm:$0xff pattern:$0x75316420]  ;;  %2614 = vst [vmem:[#allocation1] ss:$2 sm:$0xff] %v4327_v0 }
 0x112   : > { %2684 = vst [vmem:[#allocation1 + $0x10] ss:$2 sm:$0xff] %v2679_v2  ;;  %2484 = vrot.lane.b32.xlu2 %v2481_v39, %s4253_s11  ;;  %v4083_v0 = vld [vmem:[%s4324_s8 + $0x14] sm:$0xf] }
 0x113   : > { %v1565_v50 = vpop.permute.xlu1 %1564  ;;  %v1563_v51 = vpop.permute.xlu0 %1562 }
 0x114   : > { %v1567_v52 = vsel %vm1361_vm6, %v1563_v51, %v1565_v50  ;;  %v1566_v53 = vsel %vm1361_vm6, %v1561_v35, %v1563_v51  ;;  %v1718_v54 = vpop.permute.xlu2 %1717 }
 0x115   : > { %3975 = vmatpush.msk.msrb.mxu2 %vm398_vm1, %v1566_v53  ;;  %3977 = vmatpush.msk.msrb.mxu3 %vm398_vm1, %v1567_v52  ;;  %v4026_v52 = vld [vmem:[%s5134_s1 + $0x1c] sm:$0xf] }
 0x116   : > { %3976 = vmatmul.msk.f32.vlgmr.msrb.gmra.mxu2 %vm394_vm2, %v3972_v1  ;;  %3978 = vmatmul.msk.f32.vlgmr.msrb.gmra.mxu3 %vm394_vm2, %v3972_v1 }
 0x118   : > { %v2618_v56 = vld.sshfl [vmem:[#allocation1 + $0x8] sm:$0xff pattern:$0x75316420]  ;;  %v2617_v57 = vld.sshfl [vmem:[#allocation1] sm:$0xff pattern:$0x75316420] }
 0x119   : > { %2624 = vrot.lane.b32.xlu1 %v2619_v49, %s4255_s13  ;;  %2622 = vrot.lane.b32.xlu0 %v2618_v56, %s4255_s13  ;;  %v2687_v58 = vld.sshfl [vmem:[#allocation1 + $0x10] sm:$0xff pattern:$0x75316420]  ;;  %2682 = vst [vmem:[#allocation1] ss:$2 sm:$0xff] %v4354_v16  ;;  %v440_v4 = vpop.f32.mrf.mxu3 }
 0x11a   : > { %2752 = vst [vmem:[#allocation1 + $0x10] ss:$2 sm:$0xff] %v4083_v0  ;;  %2552 = vrot.lane.b32.xlu2 %v2549_v48, %s4253_s11  ;;  %v4019_v49 = vld [vmem:[%s5134_s1 + $0x18] sm:$0xf] }
 0x11b   : > { %v1659_v59 = vpop.permute.xlu1 %1658  ;;  %v1657_v60 = vpop.permute.xlu0 %1656 }
 0x11c   : > { %v1661_v61 = vsel %vm652_vm4, %v1657_v60, %v1659_v59  ;;  %v1660_v62 = vsel %vm652_vm4, %v1655_v45, %v1657_v60  ;;  %v1784_v63 = vpop.permute.xlu2 %1783 }
 0x11d   : > { %3983 = vmatpush.msk.msra.mxu0 %vm398_vm1, %v1660_v62  ;;  %3985 = vmatpush.msk.msra.mxu1 %vm398_vm1, %v1661_v61 }
 0x11e   : > { %3984 = vmatmul.msk.f32.vlgmr.msra.gmra.mxu0 %vm394_vm2, %v3982_v17  ;;  %3986 = vmatmul.msk.f32.vlgmr.msra.gmra.mxu1 %vm394_vm2, %v3982_v17  ;;  %v558_v17 = vpop.f32.mrf.mxu1 }
 0x120   : > { %v2686_v5 = vld.sshfl [vmem:[#allocation1 + $0x8] sm:$0xff pattern:$0x75316420]  ;;  %v2685_v6 = vld.sshfl [vmem:[#allocation1] sm:$0xff pattern:$0x75316420] }
 0x121   : > { %v2755_v7 = vld.sshfl [vmem:[#allocation1 + $0x10] sm:$0xff pattern:$0x75316420]  ;;  %2692 = vrot.lane.b32.xlu1 %v2687_v58, %s4257_s21  ;;  %2690 = vrot.lane.b32.xlu0 %v2686_v5, %s4257_s21  ;;  %2750 = vst [vmem:[#allocation1] ss:$2 sm:$0xff] %v4347_v11 }
 0x122   : > { %2820 = vst [vmem:[#allocation1 + $0x10] ss:$2 sm:$0xff] %v2815_v3  ;;  %2620 = vrot.lane.b32.xlu2 %v2617_v57, %s4255_s13  ;;  %v4031_v57 = vld [vmem:[%s5134_s1 + $0x20] sm:$0xf] }
 0x123   : > { %v1722_v10 = vpop.permute.xlu1 %1721  ;;  %v1720_v12 = vpop.permute.xlu0 %1719 }
 0x124   : > { %v1724_v13 = vsel %vm582_vm3, %v1720_v12, %v1722_v10  ;;  %v1723_v14 = vsel %vm582_vm3, %v1718_v54, %v1720_v12  ;;  %v1852_v15 = vpop.permute.xlu2 %1851  ;;  %v2273_v12 = vld [vmem:[%s5134_s1] sm:$0xf] }
 0x125   : > { %3987 = vmatpush.msk.msra.mxu2 %vm398_vm1, %v1723_v14  ;;  %3989 = vmatpush.msk.msra.mxu3 %vm398_vm1, %v1724_v13 }
 0x126   : > { %3988 = vmatmul.msk.f32.vlgmr.msra.gmra.mxu2 %vm394_vm2, %v1640_v24  ;;  %3990 = vmatmul.msk.f32.vlgmr.msra.gmra.mxu3 %vm394_vm2, %v1640_v24 }
 0x128   : > { %v2753_v11 = vld.sshfl [vmem:[#allocation1] sm:$0xff pattern:$0x75316420]  ;;  %v2754_v18 = vld.sshfl [vmem:[#allocation1 + $0x8] sm:$0xff pattern:$0x75316420] }
 0x129   : > { %v2823_v8 = vld.sshfl [vmem:[#allocation1 + $0x10] sm:$0xff pattern:$0x75316420]  ;;  %2818 = vst [vmem:[#allocation1] ss:$2 sm:$0xff] %v4354_v16 }
 0x12a   : > { %2828 = vrot.lane.b32.xlu1 %v2823_v8, %s4259_s12  ;;  %2688 = vrot.lane.b32.xlu2 %v2685_v6, %s4257_s21  ;;  %v420_v6 = vpop.f32.mrf.mxu2 }
 0x12b   : > { %v1788_v19 = vpop.permute.xlu1 %1787  ;;  %v1786_v20 = vpop.permute.xlu0 %1785 }
 0x12c   : > { %v1790_v21 = vsel %vm652_vm4, %v1786_v20, %v1788_v19  ;;  %v1789_v22 = vsel %vm652_vm4, %v1784_v63, %v1786_v20  ;;  %v1920_v23 = vpop.permute.xlu2 %1919  ;;  %v4039_v63 = vld [vmem:[%s5134_s1 + $0x4] sm:$0xf]  ;;  %v4050_v20 = vld [vmem:[%s5134_s1 + $0x8] sm:$0xf] }
 0x12d   : > { %3994 = vmatpush.msk.msrb.mxu0 %vm398_vm1, %v1789_v22  ;;  %3996 = vmatpush.msk.msrb.mxu1 %vm398_vm1, %v1790_v21 }
 0x12e   : > { %3995 = vmatmul.msk.f32.vlgmr.msrb.gmra.mxu0 %vm394_vm2, %v3991_v30  ;;  %3997 = vmatmul.msk.f32.vlgmr.msrb.gmra.mxu1 %vm394_vm2, %v3991_v30 }
 0x130   : > { %v2822_v16 = vld.sshfl [vmem:[#allocation1 + $0x8] sm:$0xff pattern:$0x75316420]  ;;  %v2821_v9 = vld.sshfl [vmem:[#allocation1] sm:$0xff pattern:$0x75316420] }
 0x131   : > { %2826 = vrot.lane.b32.xlu0 %v2822_v16, %s4259_s12 }
 0x132   : > { %2760 = vrot.lane.b32.xlu1 %v2755_v7, %s4257_s21  ;;  %2824 = vrot.lane.b32.xlu2 %v2821_v9, %s4259_s12  ;;  %v471_v24 = vpop.f32.mrf.mxu2  ;;  %v538_v9 = vpop.f32.mrf.mxu0 }
 0x133   : > { %v1856_v25 = vpop.permute.xlu1 %1855  ;;  %v1854_v26 = vpop.permute.xlu0 %1853  ;;  %v472_v16 = vadd.f32 %v471_v24, %v420_v6 }
 0x134   : > { %v1858_v27 = vsel %vm582_vm3, %v1854_v26, %v1856_v25  ;;  %v1857_v28 = vsel %vm582_vm3, %v1852_v15, %v1854_v26  ;;  %v1988_v29 = vpop.permute.xlu2 %1987  ;;  %v491_v15 = vpop.f32.mrf.mxu3 }
 0x135   : > { %4001 = vmatpush.msk.msrb.mxu2 %vm398_vm1, %v1857_v28  ;;  %4003 = vmatpush.msk.msrb.mxu3 %vm398_vm1, %v1858_v27  ;;  %v699_v26 = vpop.f32.mrf.mxu1  ;;  %v561_v28 = vadd.f32 %v538_v9, %v472_v16 }
 0x136   : > { %4002 = vmatmul.msk.f32.vlgmr.msrb.gmra.mxu2 %vm394_vm2, %v3998_v36  ;;  %4004 = vmatmul.msk.f32.vlgmr.msrb.gmra.mxu3 %vm394_vm2, %v3998_v36 }
 0x139   : > { %2758 = vrot.lane.b32.xlu0 %v2754_v18, %s4257_s21 }
 0x13a   : > { %2756 = vrot.lane.b32.xlu2 %v2753_v11, %s4257_s21  ;;  %v492_v11 = vadd.f32 %v491_v15, %v440_v4 }
 0x13b   : > { %v1924_v31 = vpop.permute.xlu1 %1923  ;;  %v1922_v32 = vpop.permute.xlu0 %1921 }
 0x13c   : > { %v1926_v33 = vsel %vm652_vm4, %v1922_v32, %v1924_v31  ;;  %v1925_v34 = vsel %vm652_vm4, %v1920_v23, %v1922_v32  ;;  %v2056_v35 = vpop.permute.xlu2 %2055  ;;  %v562_v21 = vadd.f32 %v558_v17, %v492_v11  ;;  %v629_v25 = vpop.f32.mrf.mxu3  ;;  %v4055_v31 = vld [vmem:[%s5134_s1 + $0xc] sm:$0xf] }
 0x13d   : > { %4008 = vmatpush.msk.msra.mxu0 %vm398_vm1, %v1925_v34  ;;  %4010 = vmatpush.msk.msra.mxu1 %vm398_vm1, %v1926_v33 }
 0x13e   : > { %4009 = vmatmul.msk.f32.vlgmr.msra.gmra.mxu0 %vm394_vm2, %v4005_v43  ;;  %4011 = vmatmul.msk.f32.vlgmr.msra.gmra.mxu1 %vm394_vm2, %v4005_v43  ;;  %v633_v27 = vadd.f32 %v629_v25, %v562_v21 }
 0x140   : > { %v703_v32 = vadd.f32 %v699_v26, %v633_v27  ;;  %v4088_v27 = vld [vmem:[%s5134_s1 + $0x20] sm:$0xf] }
 0x141   : > { %982 = vperm.xlu0 %4225, %v368_v37  }
 0x143   : > { %v1992_v38 = vpop.permute.xlu1 %1991  ;;  %v1990_v39 = vpop.permute.xlu0 %1989 }
 0x144   : > { %v1994_v40 = vsel %vm652_vm4, %v1990_v39, %v1992_v38  ;;  %v1993_v41 = vsel %vm652_vm4, %v1988_v29, %v1990_v39  ;;  %v2125_v42 = vpop.permute.xlu2 %2124  ;;  %v679_v38 = vpop.f32.mrf.mxu0 }
 0x145   : > { %4015 = vmatpush.msk.msra.mxu2 %vm398_vm1, %v1993_v41  ;;  %4017 = vmatpush.msk.msra.mxu3 %vm398_vm1, %v1994_v40  ;;  %v768_v39 = vpop.f32.mrf.mxu3  ;;  %v837_v40 = vpop.f32.mrf.mxu1 }
 0x146   : > { %4018 = vmatmul.msk.f32.vlgmr.msra.gmra.mxu3 %vm394_vm2, %v4012_v44  ;;  %4016 = vmatmul.msk.f32.vlgmr.msra.gmra.mxu2 %vm394_vm2, %v4012_v44  ;;  %v772_v41 = vadd.f32 %v768_v39, %v703_v32 }
 0x14b   : > { %v2060_v45 = vpop.permute.xlu1 %2059  ;;  %v2058_v46 = vpop.permute.xlu0 %2057 }
 0x14c   : > { %v2063_v2 = vsel %vm2061_vm7, %v2058_v46, %v2060_v45  ;;  %v2062_v47 = vsel %vm2061_vm7, %v2056_v35, %v2058_v46  ;;  %v2194_v48 = vpop.permute.xlu2 %2193  ;;  %v609_v35 = vpop.f32.mrf.mxu2  ;;  %v4062_v45 = vld [vmem:[%s5134_s1 + $0x10] sm:$0xf]  ;;  %v841_v46 = vadd.f32 %v837_v40, %v772_v41 }
 0x14d   : > { %4022 = vmatpush.msk.msrb.mxu0 %vm398_vm1, %v2062_v47  ;;  %4024 = vmatpush.msk.msrb.mxu1 %vm398_vm1, %v2063_v2  ;;  %v632_v37 = vadd.f32 %v609_v35, %v561_v28 }
 0x14e   : > { %4025 = vmatmul.msk.f32.vlgmr.msrb.gmra.mxu1 %vm394_vm2, %v4019_v49  ;;  %4023 = vmatmul.msk.f32.vlgmr.msrb.gmra.mxu0 %vm394_vm2, %v4019_v49 }
 0x153   : > { %v2129_v50 = vpop.permute.xlu1 %2128  ;;  %v2127_v51 = vpop.permute.xlu0 %2126 }
 0x154   : > { %v2132_v53 = vsel %vm2130_vm8, %v2127_v51, %v2129_v50  ;;  %v2131_v54 = vsel %vm2130_vm8, %v2125_v42, %v2127_v51  ;;  %v2288_v55 = vpop.permute.xlu2 %2287  ;;  %v702_v42 = vadd.f32 %v679_v38, %v632_v37  ;;  %v817_v50 = vpop.f32.mrf.mxu0 }
 0x155   : > { %4027 = vmatpush.msk.msrb.mxu2 %vm398_vm1, %v2131_v54  ;;  %4029 = vmatpush.msk.msrb.mxu3 %vm398_vm1, %v2132_v53  ;;  %v906_v51 = vpop.f32.mrf.mxu3 }
 0x156   : > { %4030 = vmatmul.msk.f32.vlgmr.msrb.gmra.mxu3 %vm394_vm2, %v4026_v52  ;;  %4028 = vmatmul.msk.f32.vlgmr.msrb.gmra.mxu2 %vm394_vm2, %v4026_v52  ;;  %v975_v52 = vpop.f32.mrf.mxu1  ;;  %v910_v54 = vadd.f32 %v906_v51, %v841_v46 }
 0x15b   : > { %v2198_v0 = vpop.permute.xlu1 %2197  ;;  %v2196_v56 = vpop.permute.xlu0 %2195 }
 0x15c   : > { %v2200_v58 = vsel %vm2130_vm8, %v2196_v56, %v2198_v0  ;;  %v2199_v59 = vsel %vm2130_vm8, %v2194_v48, %v2196_v56  ;;  %v2351_v60 = vpop.permute.xlu2 %2350  ;;  %v748_v48 = vpop.f32.mrf.mxu2  ;;  %v4802_v0 = vadd.f32 %v975_v52, %v910_v54 }
 0x15d   : > { %4034 = vmatpush.msk.msra.mxu0 %vm398_vm1, %v2199_v59  ;;  %4036 = vmatpush.msk.msra.mxu1 %vm398_vm1, %v2200_v58  ;;  %v771_v49 = vadd.f32 %v748_v48, %v702_v42  ;;  %v4069_v58 = vld [vmem:[%s5134_s1 + $0x14] sm:$0xf]  ;;  %v4081_v42 = vld [vmem:[%s5134_s1 + $0x1c] sm:$0xf] }
 0x15e   : > { %4037 = vmatmul.msk.f32.vlgmr.msra.gmra.mxu1 %vm394_vm2, %v4031_v57  ;;  %4035 = vmatmul.msk.f32.vlgmr.msra.gmra.mxu0 %vm394_vm2, %v4031_v57 }
 0x163   : > { %v2292_v61 = vpop.permute.xlu1 %2291  ;;  %v2290_v62 = vpop.permute.xlu0 %2289 }
 0x164   : > { %v2294_v1 = vsel %vm652_vm4, %v2290_v62, %v2292_v61  ;;  %v2293_v3 = vsel %vm652_vm4, %v2288_v55, %v2290_v62  ;;  %v2417_v5 = vpop.permute.xlu2 %2416  ;;  %v840_v55 = vadd.f32 %v817_v50, %v771_v49  ;;  %v886_v61 = vpop.f32.mrf.mxu2  ;;  %v993_v50 = vld [vmem:[%s5139_s6] sm:$0x3] }
 0x165   : > { %4042 = vmatpush.msk.msra.mxu2 %vm398_vm1, %v2293_v3  ;;  %4044 = vmatpush.msk.msra.mxu3 %vm398_vm1, %v2294_v1  ;;  %v1073_v3 = vpop.f32.mrf.mxu3 }
 0x166   : > { %4043 = vmatmul.msk.f32.vlgmr.msra.gmra.mxu2 %vm394_vm2, %v4039_v63  ;;  %4045 = vmatmul.msk.f32.vlgmr.msra.gmra.mxu3 %vm394_vm2, %v4039_v63  ;;  %v909_v62 = vadd.f32 %v886_v61, %v840_v55  ;;  %v955_v63 = vpop.f32.mrf.mxu0 }
 0x168   : > { %v4813_v1 = vadd.f32 %v955_v63, %v909_v62 }
 0x16b   : > { %v2355_v7 = vpop.permute.xlu1 %2354  ;;  %v2353_v10 = vpop.permute.xlu0 %2352 }
 0x16c   : > { %v2357_v13 = vsel %vm652_vm4, %v2353_v10, %v2355_v7  ;;  %v2356_v14 = vsel %vm652_vm4, %v2351_v60, %v2353_v10  ;;  %v2485_v18 = vpop.permute.xlu2 %2484  ;;  %v4076_v7 = vld [vmem:[%s5134_s1 + $0x18] sm:$0xf] }
 0x16d   : > { %4046 = vmatpush.msk.msrb.mxu0 %vm398_vm1, %v2356_v14  ;;  %4048 = vmatpush.msk.msrb.mxu1 %vm398_vm1, %v2357_v13  ;;  %v1053_v13 = vpop.f32.mrf.mxu2  ;;  %v1136_v14 = vpop.f32.mrf.mxu1 }
 0x16e   : > { %4049 = vmatmul.msk.f32.vlgmr.msrb.gmra.mxu1 %vm394_vm2, %v2273_v12  ;;  %4047 = vmatmul.msk.f32.vlgmr.msrb.gmra.mxu0 %vm394_vm2, %v2273_v12  ;;  %v1116_v15 = vpop.f32.mrf.mxu0  ;;  %v1203_v17 = vpop.f32.mrf.mxu3 }
 0x173   : > { %v2421_v8 = vpop.permute.xlu1 %2420  ;;  %v2419_v19 = vpop.permute.xlu0 %2418 }
 0x174   : > { %v2423_v22 = vsel %vm1361_vm6, %v2419_v19, %v2421_v8  ;;  %v2422_v23 = vsel %vm1361_vm6, %v2417_v5, %v2419_v19  ;;  %v2553_v36 = vpop.permute.xlu2 %2552  ;;  %v1117_v8 = vadd.f32 %v1116_v15, %v1053_v13 }
 0x175   : > { %4051 = vmatpush.msk.msrb.mxu2 %vm398_vm1, %v2422_v23  ;;  %4053 = vmatpush.msk.msrb.mxu3 %vm398_vm1, %v2423_v22  ;;  %v1183_v11 = vpop.f32.mrf.mxu2  ;;  %v1271_v23 = vpop.f32.mrf.mxu1 }
 0x176   : > { %4052 = vmatmul.msk.f32.vlgmr.msrb.gmra.mxu2 %vm394_vm2, %v4050_v20  ;;  %4054 = vmatmul.msk.f32.vlgmr.msrb.gmra.mxu3 %vm394_vm2, %v4050_v20  ;;  %v1206_v22 = vadd.f32 %v1183_v11, %v1117_v8  ;;  %v1251_v16 = vpop.f32.mrf.mxu0 }
 0x178   : > { %v1274_v25 = vadd.f32 %v1251_v16, %v1206_v22 }
 0x179   : > { %v1339_v9 = vpop.f32.mrf.mxu3 }
 0x17b   : > { %v2489_v29 = vpop.permute.xlu1 %2488  ;;  %v2487_v30 = vpop.permute.xlu0 %2486 }
 0x17c   : > { %v2491_v33 = vsel %vm652_vm4, %v2487_v30, %v2489_v29  ;;  %v2490_v34 = vsel %vm652_vm4, %v2485_v18, %v2487_v30  ;;  %v2621_v53 = vpop.permute.xlu2 %2620  ;;  %v1137_v18 = vadd.f32 %v1136_v14, %v1073_v3  ;;  %v995_v3 = vperm.slane %v993_v50, 0 }
 0x17d   : > { %4058 = vmatpush.msk.msra.mxu0 %vm398_vm1, %v2490_v34  ;;  %4060 = vmatpush.msk.msra.mxu1 %vm398_vm1, %v2491_v33  ;;  %v1408_v33 = vpop.f32.mrf.mxu1 }
 0x17e   : > { %4061 = vmatmul.msk.f32.vlgmr.msra.gmra.mxu1 %vm394_vm2, %v4055_v31  ;;  %4059 = vmatmul.msk.f32.vlgmr.msra.gmra.mxu0 %vm394_vm2, %v4055_v31  ;;  %v1207_v21 = vadd.f32 %v1203_v17, %v1137_v18  ;;  %v1319_v31 = vpop.f32.mrf.mxu2  ;;  %v1388_v37 = vpop.f32.mrf.mxu0 }
 0x17f   : > { %v1342_v32 = vadd.f32 %v1319_v31, %v1274_v25  ;;  %v4863_v31 = vld [vmem:[%s4324_s8 + $0x24] sm:$0xff] }
 0x180   : > { %v1275_v24 = vadd.f32 %v1271_v23, %v1207_v21  ;;  %2912 = vst [vmem:[#allocation1] ss:$2 sm:$0xff] %v4863_v31 }
 0x181   : > { %v1411_v39 = vadd.f32 %v1388_v37, %v1342_v32 }
 0x182   : > { %v1343_v28 = vadd.f32 %v1339_v9, %v1275_v24 }
 0x183   : > { %v2557_v43 = vpop.permute.xlu1 %2556  ;;  %v2555_v44 = vpop.permute.xlu0 %2554 }
 0x184   : > { %v2559_v2 = vsel %vm652_vm4, %v2555_v44, %v2557_v43  ;;  %v2558_v47 = vsel %vm652_vm4, %v2553_v36, %v2555_v44  ;;  %v2689_v4 = vpop.permute.xlu2 %2688  ;;  %v1412_v36 = vadd.f32 %v1408_v33, %v1343_v28 }
 0x185   : > { %4065 = vmatpush.msk.msra.mxu2 %vm398_vm1, %v2558_v47  ;;  %4067 = vmatpush.msk.msra.mxu3 %vm398_vm1, %v2559_v2 }
 0x186   : > { %4066 = vmatmul.msk.f32.vlgmr.msra.gmra.mxu2 %vm394_vm2, %v4062_v45  ;;  %4068 = vmatmul.msk.f32.vlgmr.msra.gmra.mxu3 %vm394_vm2, %v4062_v45 }
 0x189   : > { %v1476_v38 = vpop.f32.mrf.mxu3  ;;  %v1456_v45 = vpop.f32.mrf.mxu2 }
 0x18a   : > { %v1480_v40 = vadd.f32 %v1476_v38, %v1412_v36  ;;  %v1479_v46 = vadd.f32 %v1456_v45, %v1411_v39 }
 0x18b   : > { %v2625_v56 = vpop.permute.xlu1 %2624  ;;  %v2623_v57 = vpop.permute.xlu0 %2622 }
 0x18c   : > { %v2627_v59 = vsel %vm1361_vm6, %v2623_v57, %v2625_v56  ;;  %v2626_v60 = vsel %vm1361_vm6, %v2621_v53, %v2623_v57  ;;  %v2825_v20 = vpop.permute.xlu2 %2824  ;;  %v1544_v2 = vpop.f32.mrf.mxu1  ;;  %v3979_v53 = vld [vmem:[%s5139_s6 + $0x2] sm:$0x3] }
 0x18d   : > { %4072 = vmatpush.msk.msrb.mxu0 %vm398_vm1, %v2626_v60  ;;  %4074 = vmatpush.msk.msrb.mxu1 %vm398_vm1, %v2627_v59  ;;  %v1548_v47 = vadd.f32 %v1544_v2, %v1480_v40  ;;  %v1524_v48 = vpop.f32.mrf.mxu0  ;;  %v996_v59 = vperm.slane %v993_v50, 1  ;;  %v1629_v60 = vperm.slane %v3979_v53, 1  ;;  %v2913_v40 = vld.sshfl [vmem:[#allocation1] sm:$0xff pattern:$0x75316420] }
 0x18e   : > { %4075 = vmatmul.msk.f32.vlgmr.msrb.gmra.mxu1 %vm394_vm2, %v4069_v58  ;;  %4073 = vmatmul.msk.f32.vlgmr.msrb.gmra.mxu0 %vm394_vm2, %v4069_v58  ;;  %v1547_v51 = vadd.f32 %v1524_v48, %v1479_v46 }
 0x18f   : > { %2915 = vrot.lane.b32.xlu1 %v2913_v40, %s4253_s11 }
 0x193   : > { %v2693_v5 = vpop.permute.xlu1 %2692  ;;  %v2691_v6 = vpop.permute.xlu0 %2690 }
 0x194   : > { %v2695_v10 = vsel %vm2130_vm8, %v2691_v6, %v2693_v5  ;;  %v2694_v12 = vsel %vm2130_vm8, %v2689_v4, %v2691_v6  ;;  %v2757_v35 = vpop.permute.xlu2 %2756 }
 0x195   : > { %4077 = vmatpush.msk.msrb.mxu2 %vm398_vm1, %v2694_v12  ;;  %4079 = vmatpush.msk.msrb.mxu3 %vm398_vm1, %v2695_v10  ;;  %v1628_v12 = vperm.slane %v3979_v53, 0 }
 0x196   : > { %4078 = vmatmul.msk.f32.vlgmr.msrb.gmra.mxu2 %vm394_vm2, %v4076_v7  ;;  %4080 = vmatmul.msk.f32.vlgmr.msrb.gmra.mxu3 %vm394_vm2, %v4076_v7 }
 0x199   : > { %v1612_v49 = vpop.f32.mrf.mxu3  ;;  %v1592_v58 = vpop.f32.mrf.mxu2 }
 0x19a   : > { %v1616_v52 = vadd.f32 %v1612_v49, %v1548_v47  ;;  %v1615_v61 = vadd.f32 %v1592_v58, %v1547_v51 }
 0x19b   : > { %v1706_v6 = vpop.f32.mrf.mxu1  ;;  %v1686_v13 = vpop.f32.mrf.mxu0 }
 0x19c   : > { %v2829_v19 = vpop.permute.xlu1 %2828 }
 0x1a3   : > { %v2827_v26 = vpop.permute.xlu0 %2826 }
 0x1a4   : > { %v2832_v29 = vsel %vm2830_vm9, %v2827_v26, %v2829_v19  ;;  %v2831_v30 = vsel %vm2830_vm9, %v2825_v20, %v2827_v26  ;;  %v2761_v34 = vpop.permute.xlu1 %2760 }
 0x1a5   : > { %4089 = vmatpush.msk.msra.mxu2 %vm398_vm1, %v2831_v30  ;;  %4091 = vmatpush.msk.msra.mxu3 %vm398_vm1, %v2832_v29 }
 0x1a6   : > { %4090 = vmatmul.msk.f32.vlgmr.msra.gmra.mxu2 %vm394_vm2, %v4088_v27  ;;  %4092 = vmatmul.msk.f32.vlgmr.msra.gmra.mxu3 %vm394_vm2, %v4088_v27 }
 0x1a9   : > { %v1769_v18 = vpop.f32.mrf.mxu3  ;;  %v1749_v20 = vpop.f32.mrf.mxu2 }
 0x1aa   : > { %v1770_v9 = vadd.f32 %v1769_v18, %v1706_v6  ;;  %v1750_v25 = vadd.f32 %v1749_v20, %v1686_v13 }
 0x1ab   : > { %v2759_v41 = vpop.permute.xlu0 %2758  ;;  %v1835_v24 = vpop.f32.mrf.mxu1 }
 0x1ac   : > { %v2763_v43 = vsel %vm2130_vm8, %v2759_v41, %v2761_v34  ;;  %v2762_v44 = vsel %vm2130_vm8, %v2757_v35, %v2759_v41  ;;  %v1815_v16 = vpop.f32.mrf.mxu0  ;;  %v1839_v28 = vadd.f32 %v1835_v24, %v1770_v9  ;;  %v4867_v35 = vld [vmem:[%s4324_s8 + $0x18] sm:$0xff]  ;;  %v2914_v41 = vld.sshfl [vmem:[#allocation1 + $0x8] sm:$0xff pattern:$0x75316420] }
 0x1ad   : > { %4084 = vmatpush.msk.msra.mxu0 %vm398_vm1, %v2762_v44  ;;  %4086 = vmatpush.msk.msra.mxu1 %vm398_vm1, %v2763_v43  ;;  %v1838_v29 = vadd.f32 %v1815_v16, %v1750_v25  ;;  %2992 = vst [vmem:[#allocation1] ss:$2 sm:$0xff] %v4867_v35 }
 0x1ae   : > { %4085 = vmatmul.msk.f32.vlgmr.msra.gmra.mxu0 %vm394_vm2, %v4081_v42  ;;  %4087 = vmatmul.msk.f32.vlgmr.msra.gmra.mxu1 %vm394_vm2, %v4081_v42 }
 0x1af   : > { %2917 = vrot.lane.b32.xlu2 %v2914_v41, %s4253_s11 }
 0x1b3   : > { %v4848_v54 = vpop.permute.xlu0 %982 }
 0x1b4   : > { %v985_v55 = vadd.f32 %v4848_v54, %v4813_v1  ;;  %v986_v56 = vadd.f32 %v4848_v54, %v4802_v0  ;;  %v1618_v57 = vadd.f32 %v1616_v52, %v4848_v54  ;;  %v1617_v5 = vadd.f32 %v1615_v61, %v4848_v54  ;;  %v2993_v47 = vld.sshfl [vmem:[#allocation1] sm:$0xff pattern:$0x75316420]  ;;  %v2994_v48 = vld.sshfl [vmem:[#allocation1 + $0x8] sm:$0xff pattern:$0x75316420] }
 0x1b5   : > { %2995 = vrot.lane.b32.xlu1 %v2993_v47, %s4255_s13 }
 0x1b6   : > { %vm987_vm10 = vcmp.gt.f32.partialorder %v985_v55, 0.0  ;;  %vm988_vm11 = vcmp.gt.f32.partialorder %v986_v56, 0.0  ;;  %v989_v62 = vmul.f32 0.01, %v985_v55  ;;  %v990_v63 = vmul.f32 0.01, %v986_v56 }
 0x1b7   : > { %vm1620_vm12 = vcmp.gt.f32.partialorder %v1618_v57, 0.0  ;;  %v1622_v4 = vmul.f32 0.01, %v1618_v57  ;;  %vm1619_vm13 = vcmp.gt.f32.partialorder %v1617_v5, 0.0  ;;  %v1621_v15 = vmul.f32 0.01, %v1617_v5  ;;  %2997 = vrot.lane.b32.xlu2 %v2994_v48, %s4255_s13 }
 0x1b8   : > { %v991_v1 = vsel %vm987_vm10, %v985_v55, %v989_v62  ;;  %v992_v7 = vsel %vm988_vm11, %v986_v56, %v990_v63  ;;  %v4093_v48 = vld [vmem:[%s5139_s6 + $0x6] sm:$0x3] }
 0x1b9   : > { %v1000_v10 = vmul.f32 %v996_v59, %v992_v7  ;;  %v1624_v0 = vsel %vm1620_vm12, %v1618_v57, %v1622_v4  ;;  %v999_v17 = vmul.f32 %v995_v3, %v991_v1  ;;  %v1623_v19 = vsel %vm1619_vm13, %v1617_v5, %v1621_v15  ;;  %v1903_v26 = vpop.f32.mrf.mxu3  ;;  %v1883_v27 = vpop.f32.mrf.mxu2  ;;  %v4038_v57 = vld [vmem:[%s5139_s6 + $0x4] sm:$0x3] }
 0x1ba   : > { %v1633_v14 = vmul.f32 %v1629_v60, %v1624_v0  ;;  %v1632_v22 = vmul.f32 %v1628_v12, %v1623_v19  ;;  %v1907_v33 = vadd.f32 %v1903_v26, %v1839_v28  ;;  %v1906_v34 = vadd.f32 %v1883_v27, %v1838_v29 }
 0x1bb   : > { %v1003_v11 = vrot.slane %v1000_v10, 4  ;;  %v1971_v30 = vpop.f32.mrf.mxu1  ;;  %v1951_v32 = vpop.f32.mrf.mxu0  ;;  %v2262_v61 = vperm.slane %v4038_v57, 1  ;;  %v2261_v62 = vperm.slane %v4038_v57, 0 }
 0x1bc   : > { %v1636_v8 = vrot.slane %v1633_v14, 4  ;;  %v1975_v36 = vadd.f32 %v1971_v30, %v1907_v33  ;;  %v1974_v37 = vadd.f32 %v1951_v32, %v1906_v34 }
 0x1bd   : > { %v4857_v21 = vsel %vm398_vm1, %v999_v17, %v1003_v11 }
 0x1be   : > { %v4860_v23 = vsel %vm398_vm1, %v1632_v22, %v1636_v8 }
 0x1c9   : > { %v2039_v38 = vpop.f32.mrf.mxu3  ;;  %v2019_v39 = vpop.f32.mrf.mxu2 }
 0x1ca   : > { %v2043_v44 = vadd.f32 %v2039_v38, %v1975_v36  ;;  %v2042_v45 = vadd.f32 %v2019_v39, %v1974_v37 }
 0x1cb   : > { %v2108_v42 = vpop.f32.mrf.mxu1  ;;  %v2088_v43 = vpop.f32.mrf.mxu0 }
 0x1cc   : > { %v2112_v46 = vadd.f32 %v2108_v42, %v2043_v44  ;;  %v2111_v2 = vadd.f32 %v2088_v43, %v2042_v45 }
 0x1d9   : > { %v2177_v49 = vpop.f32.mrf.mxu3  ;;  %v2157_v50 = vpop.f32.mrf.mxu2 }
 0x1da   : > { %v2181_v51 = vadd.f32 %v2177_v49, %v2112_v46  ;;  %v2180_v52 = vadd.f32 %v2157_v50, %v2111_v2 }
 0x1db   : > { %v2245_v53 = vpop.f32.mrf.mxu1  ;;  %v2225_v55 = vpop.f32.mrf.mxu0 }
 0x1dc   : > { %v2249_v56 = vadd.f32 %v2245_v53, %v2181_v51  ;;  %v2248_v58 = vadd.f32 %v2225_v55, %v2180_v52  ;;  %v2894_v52 = vperm.slane %v4093_v48, 1 }
 0x1de   : > { %v2251_v59 = vadd.f32 %v2249_v56, %v4848_v54  ;;  %v2250_v60 = vadd.f32 %v2248_v58, %v4848_v54  ;;  %v2893_v56 = vperm.slane %v4093_v48, 0  ;;  %v4114_v48 = vld [vmem:[%s5137_s4 + $0x20] sm:$0xff] }
 0x1e0   : > { %vm2253_vm14 = vcmp.gt.f32.partialorder %v2251_v59, 0.0  ;;  %v2255_v63 = vmul.f32 0.01, %v2251_v59  ;;  %vm2252_vm15 = vcmp.gt.f32.partialorder %v2250_v60, 0.0  ;;  %v2254_v3 = vmul.f32 0.01, %v2250_v60 }
 0x1e2   : > { %v2257_v4 = vsel %vm2253_vm14, %v2251_v59, %v2255_v63  ;;  %v2256_v5 = vsel %vm2252_vm15, %v2250_v60, %v2254_v3 }
 0x1e3   : > { %v2266_v6 = vmul.f32 %v2262_v61, %v2257_v4  ;;  %v2265_v1 = vmul.f32 %v2261_v62, %v2256_v5 }
 0x1e5   : > { %v2269_v7 = vrot.slane %v2266_v6, 4 }
 0x1e7   : > { %v4880_v10 = vsel %vm398_vm1, %v2265_v1, %v2269_v7  ;;  %v3260_v7 = vld [vmem:[%s4324_s8] sm:$0xff] }
 0x1e8   : > { %3032 = vst [vmem:[#allocation1] ss:$2 sm:$0xff] %v4880_v10 }
 0x1e9   : > { %v2319_v13 = vpop.f32.mrf.mxu2  ;;  %v2339_v14 = vpop.f32.mrf.mxu3 }
 0x1eb   : > { %v2402_v11 = vpop.f32.mrf.mxu1  ;;  %v2382_v18 = vpop.f32.mrf.mxu0 }
 0x1ec   : > { %v2383_v8 = vadd.f32 %v2382_v18, %v2319_v13  ;;  %v2403_v19 = vadd.f32 %v2402_v11, %v2339_v14 }
 0x1ef   : > { %v3034_v0 = vld.sshfl [vmem:[#allocation1 + $0x8] sm:$0xff pattern:$0x75316420]  ;;  %v3033_v12 = vld.sshfl [vmem:[#allocation1] sm:$0xff pattern:$0x75316420] }
 0x1f0   : > { %3037 = vrot.lane.b32.xlu1 %v3034_v0, %s4251_s9  ;;  %3035 = vrot.lane.b32.xlu0 %v3033_v12, %s4251_s9  ;;  %3082 = vst [vmem:[#allocation1] ss:$2 sm:$0xff] %v4863_v31 }
 0x1f7   : > { %v3083_v9 = vld.sshfl [vmem:[#allocation1] sm:$0xff pattern:$0x75316420]  ;;  %v3084_v25 = vld.sshfl [vmem:[#allocation1 + $0x8] sm:$0xff pattern:$0x75316420] }
 0x1f8   : > { %3085 = vrot.lane.b32.xlu2 %v3083_v9, %s4255_s13  ;;  %3087 = vrot.lane.b32.xlu0 %v3084_v25, %s4255_s13 }
 0x1f9   : > { %v2448_v15 = vpop.f32.mrf.mxu2  ;;  %v2468_v17 = vpop.f32.mrf.mxu3 }
 0x1fa   : > { %v2471_v26 = vadd.f32 %v2448_v15, %v2383_v8  ;;  %v2472_v27 = vadd.f32 %v2468_v17, %v2403_v19 }
 0x1fb   : > { %v2536_v24 = vpop.f32.mrf.mxu1  ;;  %v2516_v16 = vpop.f32.mrf.mxu0 }
 0x1fc   : > { %v2539_v28 = vadd.f32 %v2516_v16, %v2471_v26  ;;  %v2540_v29 = vadd.f32 %v2536_v24, %v2472_v27 }
 0x201   : > { %v2916_v1 = vpop.permute.xlu1 %2915 }
 0x209   : > { %v2584_v20 = vpop.f32.mrf.mxu2  ;;  %v2604_v22 = vpop.f32.mrf.mxu3 }
 0x20a   : > { %v2607_v30 = vadd.f32 %v2584_v20, %v2539_v28  ;;  %v2608_v37 = vadd.f32 %v2604_v22, %v2540_v29  ;;  %v2918_v20 = vpop.permute.xlu2 %2917 }
 0x20b   : > { %v2672_v34 = vpop.f32.mrf.mxu1  ;;  %v2652_v36 = vpop.f32.mrf.mxu0  ;;  %v2919_v22 = vsel %vm652_vm4, %v2916_v1, %v2918_v20 }
 0x20c   : > { %v2675_v38 = vadd.f32 %v2652_v36, %v2607_v30  ;;  %v2676_v39 = vadd.f32 %v2672_v34, %v2608_v37  ;;  %4095 = vmatpush.msk.msrb.mxu0 %vm398_vm1, %v2919_v22  ;;  %v4144_v22 = vld [vmem:[%s5136_s3 + $0x50] sm:$0xff] }
 0x212   : > { %v2998_v16 = vpop.permute.xlu2 %2997 }
 0x219   : > { %v2720_v32 = vpop.f32.mrf.mxu2  ;;  %v2740_v33 = vpop.f32.mrf.mxu3 }
 0x21a   : > { %v2743_v40 = vadd.f32 %v2720_v32, %v2675_v38  ;;  %v2744_v41 = vadd.f32 %v2740_v33, %v2676_v39 }
 0x227   : > { %v2996_v13 = vpop.permute.xlu1 %2995 }
 0x228   : > { %v2999_v9 = vsel %vm1361_vm6, %v2996_v13, %v2998_v16  ;;  %v4137_v13 = vld [vmem:[%s5137_s4 + $0x48] sm:$0xff] }
 0x229   : > { %v2857_v42 = vpop.f32.mrf.mxu2  ;;  %v2877_v43 = vpop.f32.mrf.mxu3  ;;  %4106 = vmatpush.msk.msrb.mxu2 %vm398_vm1, %v2999_v9  ;;  %v4145_v9 = vld [vmem:[%s5136_s3 + $0x58] sm:$0xff] }
 0x22b   : > { %v2788_v44 = vpop.f32.mrf.mxu0  ;;  %v2808_v45 = vpop.f32.mrf.mxu1 }
 0x22c   : > { %v2811_v46 = vadd.f32 %v2788_v44, %v2743_v40  ;;  %v2812_v2 = vadd.f32 %v2808_v45, %v2744_v41  ;;  %v2905_v40 = vld [vmem:[%s5136_s3] sm:$0xff]  ;;  %v4101_v44 = vld [vmem:[%s5136_s3 + $0x10] sm:$0xff]  ;;  %v2909_v45 = vld [vmem:[%s5137_s4 + $0x8] sm:$0xff] }
 0x22e   : > { %v2880_v47 = vadd.f32 %v2857_v42, %v2811_v46  ;;  %v2881_v49 = vadd.f32 %v2877_v43, %v2812_v2  ;;  %v4103_v43 = vld [vmem:[%s5137_s4 + $0x10] sm:$0xff]  ;;  %v2906_v46 = vld [vmem:[%s5136_s3 + $0x8] sm:$0xff]  ;;  %v4104_v2 = vld [vmem:[%s5137_s4 + $0x18] sm:$0xff] }
 0x22f   : > { %4107 = vmatmul.msk.f32.vlgmr.msrb.gmra.mxu2 %vm394_vm2, %v4103_v43 }
 0x230   : > { %v2882_v50 = vadd.f32 %v2880_v47, %v4848_v54  ;;  %v2883_v51 = vadd.f32 %v2881_v49, %v4848_v54  ;;  %v4127_v54 = vld [vmem:[%s4324_s8 + $0xc] sm:$0xff]  ;;  %v4102_v47 = vld [vmem:[%s5136_s3 + $0x18] sm:$0xff]  ;;  %s4190_s8 = sshll.u32 %s5146_s24, 4 }
 0x232   : > { %vm2884_vm5 = vcmp.gt.f32.partialorder %v2882_v50, 0.0  ;;  %v2886_v53 = vmul.f32 0.01, %v2882_v50  ;;  %vm2885_vm7 = vcmp.gt.f32.partialorder %v2883_v51, 0.0  ;;  %v2887_v55 = vmul.f32 0.01, %v2883_v51 }
 0x234   : > { %v2888_v57 = vsel %vm2884_vm5, %v2882_v50, %v2886_v53  ;;  %v2889_v58 = vsel %vm2885_vm7, %v2883_v51, %v2887_v55  ;;  %v4112_v51 = vld [vmem:[%s5136_s3 + $0x20] sm:$0xff]  ;;  %v4115_v53 = vld [vmem:[%s5137_s4 + $0x28] sm:$0xff] }
 0x235   : > { %v2898_v59 = vmul.f32 %v2894_v52, %v2889_v58  ;;  %v2897_v60 = vmul.f32 %v2893_v56, %v2888_v57  ;;  %v4125_v57 = vld [vmem:[%s5137_s4 + $0x30] sm:$0xff]  ;;  %v4113_v58 = vld [vmem:[%s5136_s3 + $0x28] sm:$0xff] }
 0x237   : > { %v2901_v61 = vrot.slane %v2898_v59, 4  ;;  %4108 = vmatmul.msk.f32.gmra.mxu2 %vm394_vm2, %v4104_v2  ;;  %v4180_v2 = vld [vmem:[%s5137_s4 + $0x88] sm:$0xff] }
 0x239   : > { %v4894_v62 = vsel %vm398_vm1, %v2897_v60, %v2901_v61 }
 0x23a   : > { %2904 = vst [vmem:[#allocation5] sm:$0xff] %v4894_v62 }
 0x23b   : > { %3122 = vst [vmem:[#allocation1] ss:$2 sm:$0xff] %v4894_v62 }
 0x241   : > { %v2907_v63 = vld [vmem:[#allocation5] sm:$0xf] }
 0x242   : > { %4098 = vmatpush.msk.msrb.mxu1 %vm398_vm1, %v2907_v63  ;;  %v3124_v3 = vld.sshfl [vmem:[#allocation1 + $0x8] sm:$0xff pattern:$0x75316420]  ;;  %v3123_v4 = vld.sshfl [vmem:[#allocation1] sm:$0xff pattern:$0x75316420] }
 0x243   : > { %3127 = vrot.lane.b32.xlu2 %v3124_v3, %s4251_s9  ;;  %3125 = vrot.lane.b32.xlu1 %v3123_v4, %s4251_s9  ;;  %3172 = vst [vmem:[#allocation1] ss:$2 sm:$0xff] %v4127_v54 }
 0x244   : > { %4099 = vmatmul.msk.f32.vlgmr.msrb.gmra.mxu1 %vm394_vm2, %v2905_v40  ;;  %v4166_v40 = vld [vmem:[%s5136_s3 + $0x70] sm:$0xff] }
 0x24a   : > { %v3173_v5 = vld.sshfl [vmem:[#allocation1] sm:$0xff pattern:$0x75316420]  ;;  %v3174_v6 = vld.sshfl [vmem:[#allocation1 + $0x8] sm:$0xff pattern:$0x75316420] }
 0x24b   : > { %3175 = vrot.lane.b32.xlu0 %v3173_v5, %s4257_s21  ;;  %3177 = vrot.lane.b32.xlu1 %v3174_v6, %s4257_s21  ;;  %3212 = vst [vmem:[#allocation1] ss:$2 sm:$0xff] %v4860_v23  ;;  %v4124_v5 = vld [vmem:[%s5136_s3 + $0x38] sm:$0xff]  ;;  %v4136_v6 = vld [vmem:[%s5137_s4 + $0x40] sm:$0xff] }
 0x24c   : > { %4100 = vmatmul.msk.f32.gmra.mxu1 %vm394_vm2, %v2906_v46 }
 0x252   : > { %v3214_v0 = vld.sshfl [vmem:[#allocation1 + $0x8] sm:$0xff pattern:$0x75316420]  ;;  %v3213_v12 = vld.sshfl [vmem:[#allocation1] sm:$0xff pattern:$0x75316420]  ;;  %v3086_v33 = vpop.permute.xlu2 %3085 }
 0x253   : > { %3217 = vrot.lane.b32.xlu0 %v3214_v0, %s4252_s10  ;;  %3215 = vrot.lane.b32.xlu2 %v3213_v12, %s4252_s10  ;;  %3262 = vst [vmem:[#allocation1] ss:$2 sm:$0xff] %v3260_v7  ;;  %v4134_v12 = vld [vmem:[%s5136_s3 + $0x40] sm:$0xff] }
 0x25a   : > { %v3263_v14 = vld.sshfl [vmem:[#allocation1] sm:$0xff pattern:$0x75316420]  ;;  %v3264_v15 = vld.sshfl [vmem:[#allocation1 + $0x8] sm:$0xff pattern:$0x75316420] }
 0x25b   : > { %3265 = vrot.lane.b32.xlu1 %v3263_v14, %s4259_s12  ;;  %3267 = vrot.lane.b32.xlu2 %v3264_v15, %s4259_s12  ;;  %3302 = vst [vmem:[#allocation1] ss:$2 sm:$0xff] %v4857_v21 }
 0x262   : > { %v3304_v17 = vld.sshfl [vmem:[#allocation1 + $0x8] sm:$0xff pattern:$0x75316420]  ;;  %v3303_v11 = vld.sshfl [vmem:[#allocation1] sm:$0xff pattern:$0x75316420]  ;;  %v3038_v18 = vpop.permute.xlu1 %3037  ;;  %v3036_v8 = vpop.permute.xlu0 %3035 }
 0x263   : > { %3307 = vrot.lane.b32.xlu1 %v3304_v17, %s4253_s11  ;;  %3305 = vrot.lane.b32.xlu0 %v3303_v11, %s4253_s11  ;;  %3352 = vst [vmem:[#allocation1] ss:$2 sm:$0xff] %v4127_v54  ;;  %v3039_v19 = vsel %vm391_vm0, %v3036_v8, %v3038_v18  ;;  %v4126_v54 = vld [vmem:[%s5137_s4 + $0x38] sm:$0xff]  ;;  %v4146_v11 = vld [vmem:[%s5137_s4 + $0x50] sm:$0xff] }
 0x264   : > { %4109 = vmatpush.msk.msrb.mxu3 %vm398_vm1, %v3039_v19  ;;  %v4135_v18 = vld [vmem:[%s5136_s3 + $0x48] sm:$0xff] }
 0x265   : > { %4110 = vmatmul.msk.f32.vlgmr.msrb.gmra.mxu3 %vm394_vm2, %v4101_v44  ;;  %v4167_v44 = vld [vmem:[%s5136_s3 + $0x78] sm:$0xff] }
 0x26a   : > { %v3353_v24 = vld.sshfl [vmem:[#allocation1] sm:$0xff pattern:$0x75316420]  ;;  %v3354_v21 = vld.sshfl [vmem:[#allocation1 + $0x8] sm:$0xff pattern:$0x75316420]  ;;  %v3088_v34 = vpop.permute.xlu0 %3087 }
 0x26b   : > { %3355 = vrot.lane.b32.xlu2 %v3353_v24, %s4259_s12  ;;  %3357 = vrot.lane.b32.xlu0 %v3354_v21, %s4259_s12  ;;  %3392 = vst [vmem:[#allocation1] ss:$2 sm:$0xff] %v4860_v23  ;;  %v3089_v36 = vsel %vm1361_vm6, %v3086_v33, %v3088_v34  ;;  %v4147_v24 = vld [vmem:[%s5137_s4 + $0x58] sm:$0xff] }
 0x26c   : > { %4117 = vmatpush.msk.msra.mxu0 %vm398_vm1, %v3089_v36  ;;  %v4156_v36 = vld [vmem:[%s5136_s3 + $0x68] sm:$0xff] }
 0x26d   : > { %4111 = vmatmul.msk.f32.gmra.mxu3 %vm394_vm2, %v4102_v47 }
 0x272   : > { %v3394_v25 = vld.sshfl [vmem:[#allocation1 + $0x8] sm:$0xff pattern:$0x75316420]  ;;  %v3393_v26 = vld.sshfl [vmem:[#allocation1] sm:$0xff pattern:$0x75316420] }
 0x273   : > { %3397 = vrot.lane.b32.xlu2 %v3394_v25, %s4253_s11  ;;  %3395 = vrot.lane.b32.xlu1 %v3393_v26, %s4253_s11  ;;  %3442 = vst [vmem:[#allocation1] ss:$2 sm:$0xff] %v4863_v31  ;;  %v4157_v26 = vld [vmem:[%s5137_s4 + $0x60] sm:$0xff] }
 0x27a   : > { %v3443_v27 = vld.sshfl [vmem:[#allocation1] sm:$0xff pattern:$0x75316420]  ;;  %v3444_v28 = vld.sshfl [vmem:[#allocation1 + $0x8] sm:$0xff pattern:$0x75316420] }
 0x27b   : > { %3445 = vrot.lane.b32.xlu0 %v3443_v27, %s4257_s21  ;;  %3447 = vrot.lane.b32.xlu1 %v3444_v28, %s4257_s21  ;;  %3482 = vst [vmem:[#allocation1] ss:$2 sm:$0xff] %v4894_v62  ;;  %s366_s21 = scalar_lea.vmem %s5140_s7, %s4190_s8 }
 0x282   : > { %v3484_v23 = vld.sshfl [vmem:[#allocation1 + $0x8] sm:$0xff pattern:$0x75316420]  ;;  %v3483_v29 = vld.sshfl [vmem:[#allocation1] sm:$0xff pattern:$0x75316420] }
 0x283   : > { %3487 = vrot.lane.b32.xlu0 %v3484_v23, %s4252_s10  ;;  %3485 = vrot.lane.b32.xlu2 %v3483_v29, %s4252_s10  ;;  %3532 = vst [vmem:[#allocation1] ss:$2 sm:$0xff] %v4867_v35  ;;  %v4155_v29 = vld [vmem:[%s5136_s3 + $0x60] sm:$0xff] }
 0x28a   : > { %v3533_v30 = vld.sshfl [vmem:[#allocation1] sm:$0xff pattern:$0x75316420]  ;;  %v3534_v32 = vld.sshfl [vmem:[#allocation1 + $0x8] sm:$0xff pattern:$0x75316420] }
 0x28b   : > { %3535 = vrot.lane.b32.xlu1 %v3533_v30, %s4259_s12  ;;  %3537 = vrot.lane.b32.xlu2 %v3534_v32, %s4259_s12  ;;  %3572 = vst [vmem:[#allocation1] ss:$2 sm:$0xff] %v4880_v10  ;;  %v2908_v10 = vld [vmem:[%s5137_s4] sm:$0xff]  ;;  %v4158_v30 = vld [vmem:[%s5137_s4 + $0x68] sm:$0xff] }
 0x28c   : > { %4096 = vmatmul.msk.f32.vlgmr.msrb.gmra.mxu0 %vm394_vm2, %v2908_v10 }
 0x292   : > { %v3574_v37 = vld.sshfl [vmem:[#allocation1 + $0x8] sm:$0xff pattern:$0x75316420]  ;;  %v3573_v38 = vld.sshfl [vmem:[#allocation1] sm:$0xff pattern:$0x75316420] }
 0x293   : > { %3577 = vrot.lane.b32.xlu1 %v3574_v37, %s4253_s11  ;;  %3575 = vrot.lane.b32.xlu0 %v3573_v38, %s4253_s11  ;;  %3622 = vst [vmem:[#allocation1] ss:$2 sm:$0xff] %v4863_v31  ;;  %v3703_v31 = vld [vmem:[%s5138_s5] sm:$0xff]  ;;  %v4168_v37 = vld [vmem:[%s5137_s4 + $0x70] sm:$0xff] }
 0x294   : > { %4097 = vmatmul.msk.f32.gmra.mxu0 %vm394_vm2, %v2909_v45  ;;  %v4179_v45 = vld [vmem:[%s5137_s4 + $0x80] sm:$0xff] }
 0x29a   : > { %v3624_v35 = vld.sshfl [vmem:[#allocation1 + $0x8] sm:$0xff pattern:$0x75316420]  ;;  %v3623_v39 = vld.sshfl [vmem:[#allocation1] sm:$0xff pattern:$0x75316420] }
 0x29b   : > { %3627 = vrot.lane.b32.xlu0 %v3624_v35, %s4259_s12  ;;  %3625 = vrot.lane.b32.xlu2 %v3623_v39, %s4259_s12  ;;  %3662 = vst [vmem:[#allocation1] ss:$2 sm:$0xff] %v4894_v62  ;;  %v4123_v62 = vld [vmem:[%s5136_s3 + $0x30] sm:$0xff]  ;;  %v3704_v35 = vld [vmem:[%s5138_s5 + $0x8] sm:$0xff] }
 0x29c   : > { %4118 = vmatmul.msk.f32.vlgmr.msra.gmra.mxu0 %vm394_vm2, %v4114_v48 }
 0x29d   : > { %v3128_v49 = vpop.permute.xlu2 %3127 }
 0x2a2   : > { %v3664_v41 = vld.sshfl [vmem:[#allocation1 + $0x8] sm:$0xff pattern:$0x75316420]  ;;  %v3663_v42 = vld.sshfl [vmem:[#allocation1] sm:$0xff pattern:$0x75316420] }
 0x2a3   : > { %3707 = vperm.xlu0 %4225, %v3703_v31   ;;  %3667 = vrot.lane.b32.xlu2 %v3664_v41, %s4253_s11  ;;  %v4169_v31 = vld [vmem:[%s5137_s4 + $0x78] sm:$0xff] }
 0x2a4   : > { %3665 = vrot.lane.b32.xlu1 %v3663_v42, %s4253_s11  ;;  %4119 = vmatmul.msk.f32.gmra.mxu0 %vm394_vm2, %v4115_v53 }
 0x2ac   : > { %3712 = vperm.xlu1 %4226, %v3704_v35  }
 0x2ad   : > { %v3216_v60 = vpop.permute.xlu2 %3215 }
 0x2b5   : > { %v3126_v50 = vpop.permute.xlu1 %3125  ;;  %v3268_v3 = vpop.permute.xlu2 %3267 }
 0x2b6   : > { %v3129_v52 = vsel %vm391_vm0, %v3126_v50, %v3128_v49  ;;  %v4177_v49 = vld [vmem:[%s5136_s3 + $0x80] sm:$0xff] }
 0x2b7   : > { %4120 = vmatpush.msk.msra.mxu1 %vm398_vm1, %v3129_v52 }
 0x2b8   : > { %4121 = vmatmul.msk.f32.vlgmr.msra.gmra.mxu1 %vm394_vm2, %v4112_v51  ;;  %v4178_v51 = vld [vmem:[%s5136_s3 + $0x88] sm:$0xff] }
 0x2bd   : > { %v3176_v55 = vpop.permute.xlu0 %3175  ;;  %v3178_v56 = vpop.permute.xlu1 %3177 }
 0x2be   : > { %v3179_v59 = vsel %vm2130_vm8, %v3176_v55, %v3178_v56 }
 0x2bf   : > { %4128 = vmatpush.msk.msra.mxu2 %vm398_vm1, %v3179_v59 }
 0x2c0   : > { %4129 = vmatmul.msk.f32.vlgmr.msra.gmra.mxu2 %vm394_vm2, %v4125_v57  ;;  %4122 = vmatmul.msk.f32.gmra.mxu1 %vm394_vm2, %v4113_v58  ;;  %v3025_v57 = vpop.f32.mrf.mxu2 }
 0x2c1   : > { %v2977_v53 = vpop.f32.mrf.mxu1 }
 0x2c5   : > { %v3218_v61 = vpop.permute.xlu0 %3217  ;;  %v3356_v15 = vpop.permute.xlu2 %3355 }
 0x2c6   : > { %v3219_v63 = vsel %vm582_vm3, %v3216_v60, %v3218_v61 }
 0x2c7   : > { %4131 = vmatpush.msk.msra.mxu3 %vm398_vm1, %v3219_v63 }
 0x2c8   : > { %4132 = vmatmul.msk.f32.vlgmr.msra.gmra.mxu3 %vm394_vm2, %v4123_v62  ;;  %4130 = vmatmul.msk.f32.gmra.mxu2 %vm394_vm2, %v4126_v54  ;;  %v3028_v61 = vpop.f32.mrf.mxu2 }
 0x2c9   : > { %v2980_v56 = vpop.f32.mrf.mxu1 }
 0x2cd   : > { %v3266_v4 = vpop.permute.xlu1 %3265  ;;  %v3398_v19 = vpop.permute.xlu2 %3397 }
 0x2ce   : > { %v3269_v1 = vsel %vm2830_vm9, %v3266_v4, %v3268_v3 }
 0x2cf   : > { %4138 = vmatpush.msk.msrb.mxu0 %vm398_vm1, %v3269_v1 }
 0x2d0   : > { %4133 = vmatmul.msk.f32.gmra.mxu3 %vm394_vm2, %v4124_v5  ;;  %4139 = vmatmul.msk.f32.vlgmr.msrb.gmra.mxu0 %vm394_vm2, %v4136_v6 }
 0x2d5   : > { %v3308_v7 = vpop.permute.xlu1 %3307  ;;  %v3306_v0 = vpop.permute.xlu0 %3305 }
 0x2d6   : > { %v3309_v14 = vsel %vm652_vm4, %v3306_v0, %v3308_v7 }
 0x2d7   : > { %4141 = vmatpush.msk.msrb.mxu1 %vm398_vm1, %v3309_v14 }
 0x2d8   : > { %4142 = vmatmul.msk.f32.vlgmr.msrb.gmra.mxu1 %vm394_vm2, %v4134_v12  ;;  %4140 = vmatmul.msk.f32.gmra.mxu0 %vm394_vm2, %v4137_v13 }
 0x2dd   : > { %v3358_v17 = vpop.permute.xlu0 %3357  ;;  %v3486_v28 = vpop.permute.xlu2 %3485 }
 0x2de   : > { %v3359_v8 = vsel %vm2830_vm9, %v3356_v15, %v3358_v17 }
 0x2df   : > { %4149 = vmatpush.msk.msrb.mxu2 %vm398_vm1, %v3359_v8 }
 0x2e0   : > { %4150 = vmatmul.msk.f32.vlgmr.msrb.gmra.mxu2 %vm394_vm2, %v4146_v11  ;;  %4143 = vmatmul.msk.f32.gmra.mxu1 %vm394_vm2, %v4135_v18 }
 0x2e5   : > { %v3396_v20 = vpop.permute.xlu1 %3395  ;;  %v3538_v33 = vpop.permute.xlu2 %3537 }
 0x2e6   : > { %v3399_v21 = vsel %vm652_vm4, %v3396_v20, %v3398_v19 }
 0x2e7   : > { %4152 = vmatpush.msk.msrb.mxu3 %vm398_vm1, %v3399_v21 }
 0x2e8   : > { %4153 = vmatmul.msk.f32.vlgmr.msrb.gmra.mxu3 %vm394_vm2, %v4144_v22  ;;  %4151 = vmatmul.msk.f32.gmra.mxu2 %vm394_vm2, %v4147_v24  ;;  %v3065_v58 = vpop.f32.mrf.mxu3 }
 0x2e9   : > { %v3066_v11 = vadd.f32 %v3065_v58, %v3025_v57 }
 0x2ed   : > { %v3446_v16 = vpop.permute.xlu0 %3445  ;;  %v3448_v25 = vpop.permute.xlu1 %3447 }
 0x2ee   : > { %v3449_v27 = vsel %vm2130_vm8, %v3446_v16, %v3448_v25 }
 0x2ef   : > { %4160 = vmatpush.msk.msra.mxu0 %vm398_vm1, %v3449_v27 }
 0x2f0   : > { %4154 = vmatmul.msk.f32.gmra.mxu3 %vm394_vm2, %v4145_v9  ;;  %4161 = vmatmul.msk.f32.vlgmr.msra.gmra.mxu0 %vm394_vm2, %v4157_v26  ;;  %v3068_v62 = vpop.f32.mrf.mxu3 }
 0x2f1   : > { %v3069_v21 = vadd.f32 %v3068_v62, %v3028_v61 }
 0x2f5   : > { %v3488_v23 = vpop.permute.xlu0 %3487  ;;  %v3626_v42 = vpop.permute.xlu2 %3625 }
 0x2f6   : > { %v3489_v32 = vsel %vm582_vm3, %v3486_v28, %v3488_v23 }
 0x2f7   : > { %4163 = vmatpush.msk.msra.mxu1 %vm398_vm1, %v3489_v32 }
 0x2f8   : > { %4164 = vmatmul.msk.f32.vlgmr.msra.gmra.mxu1 %vm394_vm2, %v4155_v29  ;;  %4162 = vmatmul.msk.f32.gmra.mxu0 %vm394_vm2, %v4158_v30 }
 0x2fd   : > { %v3536_v34 = vpop.permute.xlu1 %3535  ;;  %v3668_v47 = vpop.permute.xlu2 %3667 }
 0x2fe   : > { %v3539_v38 = vsel %vm2830_vm9, %v3536_v34, %v3538_v33 }
 0x2ff   : > { %4171 = vmatpush.msk.msra.mxu2 %vm398_vm1, %v3539_v38 }
 0x300   : > { %4165 = vmatmul.msk.f32.gmra.mxu1 %vm394_vm2, %v4156_v36  ;;  %4172 = vmatmul.msk.f32.vlgmr.msra.gmra.mxu2 %vm394_vm2, %v4168_v37 }
 0x305   : > { %v3578_v39 = vpop.permute.xlu1 %3577  ;;  %v3576_v10 = vpop.permute.xlu0 %3575 }
 0x306   : > { %v3579_v41 = vsel %vm652_vm4, %v3576_v10, %v3578_v39 }
 0x307   : > { %4174 = vmatpush.msk.msra.mxu3 %vm398_vm1, %v3579_v41 }
 0x308   : > { %4175 = vmatmul.msk.f32.vlgmr.msra.gmra.mxu3 %vm394_vm2, %v4166_v40  ;;  %4173 = vmatmul.msk.f32.gmra.mxu2 %vm394_vm2, %v4169_v31 }
 0x309   : > { %v2945_v52 = vpop.f32.mrf.mxu0 }
 0x30a   : > { %v2978_v17 = vadd.f32 %v2977_v53, %v2945_v52 }
 0x30c   : > { %v3071_v8 = vadd.f32 %v3066_v11, %v2978_v17 }
 0x30d   : > { %v3628_v43 = vpop.permute.xlu0 %3627 }
 0x30e   : > { %v3629_v46 = vsel %vm2830_vm9, %v3626_v42, %v3628_v43 }
 0x30f   : > { %4182 = vmatpush.msk.msrb.mxu0 %vm398_vm1, %v3629_v46 }
 0x310   : > { %4176 = vmatmul.msk.f32.gmra.mxu3 %vm394_vm2, %v4167_v44  ;;  %4183 = vmatmul.msk.f32.vlgmr.msrb.gmra.mxu0 %vm394_vm2, %v4179_v45 }
 0x311   : > { %v2948_v55 = vpop.f32.mrf.mxu0 }
 0x312   : > { %v2981_v24 = vadd.f32 %v2980_v56, %v2948_v55 }
 0x314   : > { %v3072_v26 = vadd.f32 %v3069_v21, %v2981_v24 }
 0x316   : > { %v3666_v48 = vpop.permute.xlu1 %3665 }
 0x317   : > { %v3669_v50 = vsel %vm652_vm4, %v3666_v48, %v3668_v47 }
 0x318   : > { %4185 = vmatpush.msk.msrb.mxu1 %vm398_vm1, %v3669_v50  ;;  %4184 = vmatmul.msk.f32.gmra.mxu0 %vm394_vm2, %v4180_v2  ;;  %v3708_v50 = vpop.permute.xlu0 %3707 }
 0x319   : > { %4186 = vmatmul.msk.f32.vlgmr.msrb.gmra.mxu1 %vm394_vm2, %v4177_v49  ;;  %v3115_v59 = vpop.f32.mrf.mxu0 }
 0x31e   : > { %v3713_v62 = vpop.permute.xlu1 %3712 }
 0x321   : > { %4187 = vmatmul.msk.f32.gmra.mxu1 %vm394_vm2, %v4178_v51  ;;  %v3118_v54 = vpop.f32.mrf.mxu0 }
 0x335   : > { %v3155_v60 = vpop.f32.mrf.mxu1 }
 0x336   : > { %v3156_v19 = vadd.f32 %v3155_v60, %v3115_v59 }
 0x338   : > { %v3161_v16 = vadd.f32 %v3156_v19, %v3071_v8 }
 0x33d   : > { %v3158_v63 = vpop.f32.mrf.mxu1 }
 0x33e   : > { %v3159_v28 = vadd.f32 %v3158_v63, %v3118_v54 }
 0x340   : > { %v3162_v34 = vadd.f32 %v3159_v28, %v3072_v26 }
 0x343   : > { %v3205_v3 = vpop.f32.mrf.mxu2 }
 0x34b   : > { %v3245_v4 = vpop.f32.mrf.mxu3  ;;  %v3208_v1 = vpop.f32.mrf.mxu2 }
 0x34c   : > { %v3246_v9 = vadd.f32 %v3245_v4, %v3205_v3 }
 0x34d   : > { %v3295_v5 = vpop.f32.mrf.mxu0 }
 0x34e   : > { %v3251_v27 = vadd.f32 %v3246_v9, %v3161_v16 }
 0x353   : > { %v3248_v7 = vpop.f32.mrf.mxu3 }
 0x354   : > { %v3249_v36 = vadd.f32 %v3248_v7, %v3208_v1 }
 0x355   : > { %v3335_v6 = vpop.f32.mrf.mxu1  ;;  %v3298_v0 = vpop.f32.mrf.mxu0 }
 0x356   : > { %v3336_v23 = vadd.f32 %v3335_v6, %v3295_v5  ;;  %v3252_v40 = vadd.f32 %v3249_v36, %v3162_v34 }
 0x358   : > { %v3341_v37 = vadd.f32 %v3336_v23, %v3251_v27 }
 0x35d   : > { %v3338_v12 = vpop.f32.mrf.mxu1 }
 0x35e   : > { %v3339_v31 = vadd.f32 %v3338_v12, %v3298_v0 }
 0x360   : > { %v3342_v47 = vadd.f32 %v3339_v31, %v3252_v40 }
 0x363   : > { %v3385_v13 = vpop.f32.mrf.mxu2 }
 0x36b   : > { %v3425_v14 = vpop.f32.mrf.mxu3  ;;  %v3388_v20 = vpop.f32.mrf.mxu2 }
 0x36c   : > { %v3426_v33 = vadd.f32 %v3425_v14, %v3385_v13 }
 0x36d   : > { %v3475_v15 = vpop.f32.mrf.mxu0 }
 0x36e   : > { %v3431_v39 = vadd.f32 %v3426_v33, %v3341_v37 }
 0x373   : > { %v3428_v22 = vpop.f32.mrf.mxu3 }
 0x374   : > { %v3429_v43 = vadd.f32 %v3428_v22, %v3388_v20 }
 0x375   : > { %v3515_v18 = vpop.f32.mrf.mxu1  ;;  %v3478_v25 = vpop.f32.mrf.mxu0 }
 0x376   : > { %v3516_v38 = vadd.f32 %v3515_v18, %v3475_v15  ;;  %v3432_v51 = vadd.f32 %v3429_v43, %v3342_v47 }
 0x378   : > { %v3521_v41 = vadd.f32 %v3516_v38, %v3431_v39 }
 0x37d   : > { %v3518_v29 = vpop.f32.mrf.mxu1 }
 0x37e   : > { %v3519_v48 = vadd.f32 %v3518_v29, %v3478_v25 }
 0x380   : > { %v3522_v56 = vadd.f32 %v3519_v48, %v3432_v51 }
 0x383   : > { %v3565_v30 = vpop.f32.mrf.mxu2 }
 0x38b   : > { %v3605_v32 = vpop.f32.mrf.mxu3  ;;  %v3568_v46 = vpop.f32.mrf.mxu2 }
 0x38c   : > { %v3606_v10 = vadd.f32 %v3605_v32, %v3565_v30 }
 0x38d   : > { %v3655_v35 = vpop.f32.mrf.mxu0 }
 0x38e   : > { %v3611_v44 = vadd.f32 %v3606_v10, %v3521_v41 }
 0x393   : > { %v3608_v2 = vpop.f32.mrf.mxu3 }
 0x394   : > { %v3609_v52 = vadd.f32 %v3608_v2, %v3568_v46 }
 0x395   : > { %v3658_v55 = vpop.f32.mrf.mxu0 }
 0x396   : > { %v3695_v42 = vpop.f32.mrf.mxu1  ;;  %v3612_v59 = vadd.f32 %v3609_v52, %v3522_v56 }
 0x397   : > { %v3696_v45 = vadd.f32 %v3695_v42, %v3655_v35 }
 0x399   : > { %v3701_v49 = vadd.f32 %v3696_v45, %v3611_v44 }
 0x39b   : > { %v3715_v53 = vadd.f32 %v3708_v50, %v3701_v49 }
 0x39d   : > { %vm3717_vm0 = vcmp.gt.f32.partialorder %v3715_v53, 0.0  ;;  %v3719_v57 = vmul.f32 0.01, %v3715_v53 }
 0x39e   : > { %v3698_v58 = vpop.f32.mrf.mxu1 }
 0x39f   : > { %v3699_v60 = vadd.f32 %v3698_v58, %v3658_v55  ;;  %v3721_v61 = vsel %vm3717_vm0, %v3715_v53, %v3719_v57 }
 0x3a0   : > { %3723 = vst [vmem:[%s366_s21] sm:$0xff] %v3721_v61 }
 0x3a1   : > { %v3702_v54 = vadd.f32 %v3699_v60, %v3612_v59 }
 0x3a3   : > { %v3716_v63 = vadd.f32 %v3713_v62, %v3702_v54 }
 0x3a5   : > { %vm3718_vm1 = vcmp.gt.f32.partialorder %v3716_v63, 0.0  ;;  %v3720_v3 = vmul.f32 0.01, %v3716_v63 }
 0x3a7   : > { %v3722_v4 = vsel %vm3718_vm1, %v3716_v63, %v3720_v3 }
 0x3a8   : > { %3724 = vst [vmem:[%s366_s21 + $0x8] sm:$0xff] %v3722_v4 }
 0x3a9 PF: > { %s17_s26 = sadd.s32 1, %s4249_s26   ;;  %s5141_s24 = smov %s4245_s25 }
 0x3aa   : > { %p14_p5 = scmp.ge.s32.totalorder %s17_s26, 4   ;;  %s5142_s25 = smov %s5144_s27 }
 0x3ac   :  { %16 = sbr.rel (!%p14_p5) target bundleno = 2 (0x2), region = 152 }

</bundles_post_ra>
